<compile_context>
chip_gen: v6e
topology: v6e:2x2x1
jax: 0.10.0
libtpu: 0.0.40
codegen_flags: <defaults>
</compile_context>

<pallas_src>
import functools

import jax
import jax.numpy as jnp
from jax import lax
from jax.experimental import pallas as pl
from jax.experimental.pallas import tpu as pltpu

LRELU_SLOPE = 0.1


def _round_up(x, m):
    return ((x + m - 1) // m) * m


def _leaky_relu(x, slope=LRELU_SLOPE):
    return jnp.where(x >= 0, x, x * slope)


# ---------------------------------------------------------------------------
# Fused kernel: all three (c1, c2) pairs for one (batch, L-tile) grid cell.
# ---------------------------------------------------------------------------
def _resblock1_kernel(
    xprev_ref,   # (1, HALO, Cp)  rows [t*LT - HALO, t*LT)        (clamped+masked)
    xcen_ref,    # (1, LT,   Cp)  rows [t*LT, (t+1)*LT)
    xnext_ref,   # (1, HALO, Cp)  rows [(t+1)*LT, (t+1)*LT+HALO)  (clamped+masked)
    w1_ref,      # (P, K, Cp, Cp) per-tap convs1 weights (conv dtype)
    b1_ref,      # (P, 1, Cp)     f32 biases
    w2_ref,      # (P, K, Cp, Cp) per-tap convs2 weights
    b2_ref,      # (P, 1, Cp)     f32 biases
    o_ref,       # (1, LT, Cp)
    xres_ref,    # VMEM scratch (EXT, Cp) f32: residual carrier
    *,
    dilations,
    k_taps,
    l_tile,
    l_true,
    halo,
    guard,
):
    t = pl.program_id(1)
    ext = l_tile + 2 * halo
    cp = o_ref.shape[-1]
    half_k = (k_taps - 1) // 2
    cdt = w1_ref.dtype                      # MXU operand dtype (bf16 by default)

    # Residual carrier (f32) staged in VMEM: [prev halo | tile | next halo].
    xres_ref[0:halo, :] = xprev_ref[0].astype(jnp.float32)
    xres_ref[halo:halo + l_tile, :] = xcen_ref[0].astype(jnp.float32)
    xres_ref[halo + l_tile:ext, :] = xnext_ref[0].astype(jnp.float32)

    # Rows whose absolute position lies outside [0, L) must look like the conv's
    # zero padding for EVERY conv input (PyTorch pads each conv independently).
    # Broadcast the mask once and reuse it: JAX does not CSE broadcast_in_dim.
    pos = t * l_tile - halo + lax.broadcasted_iota(jnp.int32, (ext, 1), 0)
    mask = jnp.broadcast_to((pos >= 0) & (pos < l_true), (ext, cp))

    zguard = jnp.zeros((guard, cp), cdt)     # guard rows == the conv's zero pad

    def conv_same(act, w_ref, b_ref, p, d):
        # act: (EXT, Cp) f32, already masked.  'same' zero-padded conv with
        # dilation d, evaluated as k_taps accumulating MXU matmuls.  Shifted
        # taps are static slices of a zero-guarded in-register value (sublane
        # shifts go to the XLU; no VMEM staging, no misaligned vld, operands
        # stay lane-dense because Cp is a multiple of 128).
        a = act.astype(cdt)
        padded = jnp.concatenate([zguard, a, zguard], axis=0)   # (EXT + 2G, Cp)
        y = None
        for k in range(k_taps):
            off = guard + (k - half_k) * d                      # tap at t + (k-hk)*d
            tap = a if off == guard else padded[off:off + ext, :]
            part = jnp.dot(tap, w_ref[p, k], preferred_element_type=jnp.float32)
            y = part if y is None else y + part
        return y + b_ref[p]                                     # (1, Cp) f32 bias

    for p, d in enumerate(dilations):        # static, fully unrolled (3 pairs)
        x = xres_ref[...]
        a = jnp.where(mask, _leaky_relu(x), 0.0)
        y = conv_same(a, w1_ref, b1_ref, p, d)
        a = jnp.where(mask, _leaky_relu(y), 0.0)
        y = conv_same(a, w2_ref, b2_ref, p, 1)
        xres_ref[...] = y + x                 # residual; stays resident in VMEM

    o_ref[0] = xres_ref[halo:halo + l_tile, :].astype(o_ref.dtype)


# ---------------------------------------------------------------------------
# Wrapper: (B, L, C) layout (preferred; channels land on TPU lanes).
# ---------------------------------------------------------------------------
def resblock1_forward_nlc(x_blc, params, dilations=(1, 3, 5), *, l_tile=512,
                          conv_dtype=jnp.bfloat16):
    """params: list of (w1, b1, w2, b2) per pair in PyTorch Conv1d layout
    (w: (C_out, C_in, K), b: (C_out,)).  weight_norm at inference time is a
    plain conv, so only the effective weights are consumed.
    conv_dtype: dtype fed to the MXU (bf16 default; jnp.float32 for strict parity)."""
    B, L, C = x_blc.shape
    P = len(params)
    assert P == len(dilations)
    K = int(params[0][0].shape[-1])
    assert K % 2 == 1, "'same' zero padding needs an odd kernel size"
    half_k = (K - 1) // 2
    dtype = x_blc.dtype

    # Channels live on TPU lanes (width 128): pad so every conv operand is
    # lane-dense and the output stores are unmasked.  No-op for C >= 128 stages.
    Cp = _round_up(C, 128)

    def fold_w(w):   # (C_out, C_in, K) -> (K, Cp_in, Cp_out): one matmul per tap
        wk = jnp.transpose(jnp.asarray(w, conv_dtype), (2, 1, 0))
        return jnp.pad(wk, ((0, 0), (0, Cp - C), (0, Cp - C)))

    def fold_b(b):
        return jnp.pad(jnp.asarray(b, jnp.float32), (0, Cp - C)).reshape(1, Cp)

    W1 = jnp.stack([fold_w(p[0]) for p in params])      # (P, K, Cp, Cp)
    B1 = jnp.stack([fold_b(p[1]) for p in params])      # (P, 1, Cp)
    W2 = jnp.stack([fold_w(p[2]) for p in params])
    B2 = jnp.stack([fold_b(p[3]) for p in params])

    # halo = receptive-field growth of the fused 6-conv chain (conv1 dilation d
    # plus conv2 dilation 1 per pair); must be fully covered so tile-local
    # results equal the global convolution.
    growth = sum(half_k * (int(d) + 1) for d in dilations)
    halo = max(8, _round_up(growth, 8))
    assert halo >= growth, "halo under-provisioned for this kernel/dilation config"
    # guard = zero rows framing each conv input ('same' padding), sublane-rounded.
    guard = max(8, _round_up(half_k * max(max(int(d) for d in dilations), 1), 8))

    # L tile: multiple of halo (so the halo BlockSpecs tile L evenly).  Big
    # tiles amortize per-step overhead and the halo re-read; shrink if needed
    # so the (parallel) grid has >= 2 cells for v7x's two TensorCores.
    lt = _round_up(min(max(l_tile, halo), _round_up(L, halo)), halo)
    while B * ((L + lt - 1) // lt) < 2 and lt > halo:
        lt = max(halo, _round_up(lt // 2, halo))
    Lp = _round_up(L, lt)
    n_lt = Lp // lt
    hb = lt // halo                      # halo-sized blocks per L tile
    max_hblk = Lp // halo - 1
    ext = lt + 2 * halo

    xp = x_blc
    if (Lp, Cp) != (L, C):
        xp = jnp.pad(x_blc, ((0, 0), (0, Lp - L), (0, Cp - C)))

    kernel = functools.partial(
        _resblock1_kernel,
        dilations=tuple(int(d) for d in dilations), k_taps=K,
        l_tile=lt, l_true=L, halo=halo, guard=guard)

    # Honest VMEM budget: double-buffered x/out blocks + resident weights +
    # f32 carrier scratch + in-flight temporaries, 2x headroom, capped at 3/4
    # of the queried physical VMEM (~48 MiB on v7x, ~96 MiB on v5e/v6e).
    isz_x = jnp.dtype(dtype).itemsize
    isz_w = jnp.dtype(conv_dtype).itemsize
    need = (
        2 * isz_x * (lt + 2 * halo) * Cp        # x blocks (center + 2 halos), 2-buffered
        + 2 * isz_x * lt * Cp                   # out block, 2-buffered
        + isz_w * P * K * Cp * Cp + 4 * P * Cp  # resident folded weights + f32 biases
        + 4 * ext * Cp                          # f32 residual-carrier scratch
        + (8 + 4 * isz_w) * ext * Cp            # act / shifted taps / f32 partials
    )
    try:
        phys_vmem = int(pltpu.get_tpu_info().vmem_capacity_bytes)
    except Exception:
        phys_vmem = 64 * 1024 * 1024            # conservative fallback (v7x size)
    vmem_limit = int(min(3 * phys_vmem // 4, max(32 * 1024 * 1024, 2 * need)))

    # NOTE: if profiling at large C shows the center-x / out DMAs exposed, sweep
    # pipeline_mode=pl.Buffered(3) on those BlockSpecs (after settling lt --
    # the optimum shifts with tile size).
    out = pl.pallas_call(
        kernel,
        out_shape=jax.ShapeDtypeStruct((B, Lp, Cp), dtype),
        grid_spec=pltpu.PrefetchScalarGridSpec(
            num_scalar_prefetch=0,
            grid=(B, n_lt),
            in_specs=[
                # halo before the tile (clamped at the front; masked in-kernel)
                pl.BlockSpec((1, halo, Cp),
                             lambda b, t: (b, jnp.maximum(t * hb - 1, 0), 0)),
                # the tile itself
                pl.BlockSpec((1, lt, Cp), lambda b, t: (b, t, 0)),
                # halo after the tile (clamped at the back; masked in-kernel)
                pl.BlockSpec((1, halo, Cp),
                             lambda b, t: (b, jnp.minimum((t + 1) * hb, max_hblk), 0)),
                # weights/biases: constant index map -> fetched once, stay resident
                pl.BlockSpec(W1.shape, lambda b, t: (0, 0, 0, 0)),
                pl.BlockSpec(B1.shape, lambda b, t: (0, 0, 0)),
                pl.BlockSpec(W2.shape, lambda b, t: (0, 0, 0, 0)),
                pl.BlockSpec(B2.shape, lambda b, t: (0, 0, 0)),
            ],
            out_specs=pl.BlockSpec((1, lt, Cp), lambda b, t: (b, t, 0)),
            scratch_shapes=[pltpu.VMEM((ext, Cp), jnp.float32)],
        ),
        compiler_params=pltpu.CompilerParams(
            dimension_semantics=("parallel", "parallel"),
            vmem_limit_bytes=vmem_limit,
        ),
    )(xp, xp, xp, W1, B1, W2, B2)

    if (Lp, Cp) != (L, C):
        out = out[:, :L, :C]
    return out


def resblock1_forward_ncl(x_ncl, params, dilations=(1, 3, 5), *, l_tile=512,
                          conv_dtype=jnp.bfloat16):
    """Drop-in (B, C, L) wrapper matching the PyTorch module.  In a full model
    keep activations in (B, L, C) and call resblock1_forward_nlc directly to
    avoid these two transpose HBM round trips."""
    x = jnp.transpose(x_ncl, (0, 2, 1))
    y = resblock1_forward_nlc(x, params, dilations, l_tile=l_tile,
                              conv_dtype=conv_dtype)
    return jnp.transpose(y, (0, 2, 1))


# ---------------------------------------------------------------------------
# Pure-JAX reference (NCL, lax.conv_general_dilated) for correctness check
# ---------------------------------------------------------------------------
def _ref_conv1d(x, w, b, dilation):
    pad = dilation * (w.shape[-1] - 1) // 2
    y = lax.conv_general_dilated(
        x, w, window_strides=(1,), padding=[(pad, pad)],
        rhs_dilation=(dilation,), dimension_numbers=("NCH", "OIH", "NCH"))
    return y + b[None, :, None]


def _ref_forward(x, params, dilations):
    for (w1, b1, w2, b2), d in zip(params, dilations):
        xt = jnp.where(x >= 0, x, LRELU_SLOPE * x)
        xt = _ref_conv1d(xt, w1, b1, d)
        xt = jnp.where(xt >= 0, xt, LRELU_SLOPE * xt)
        xt = _ref_conv1d(xt, w2, b2, 1)
        x = xt + x
    return x


# ---------------------------------------------------------------------------
if __name__ == "__main__":
    B, C, L, K = 2, 32, 64, 3
    dilations = (1, 3, 5)

    key = jax.random.PRNGKey(0)
    keys = jax.random.split(key, 1 + 4 * 3)
    x_ncl = jax.random.normal(keys[0], (B, C, L), dtype=jnp.float32)

    # init_weights uses normal(0, 0.01); weight_norm at forward time is a plain conv.
    params = []
    ki = 1
    for _ in range(3):
        w1 = 0.01 * jax.random.normal(keys[ki], (C, C, K), jnp.float32); ki += 1
        b1 = 0.01 * jax.random.normal(keys[ki], (C,), jnp.float32); ki += 1
        w2 = 0.01 * jax.random.normal(keys[ki], (C, C, K), jnp.float32); ki += 1
        b2 = 0.01 * jax.random.normal(keys[ki], (C,), jnp.float32); ki += 1
        params.append((w1, b1, w2, b2))

    ref = _ref_forward(x_ncl, params, dilations)

    # 1) Strict f32 MXU path, single L tile per batch element.
    out_f32 = jax.block_until_ready(
        resblock1_forward_ncl(x_ncl, params, dilations, conv_dtype=jnp.float32))
    assert out_f32.shape == (B, C, L)
    assert jnp.allclose(out_f32, ref, atol=1e-4, rtol=1e-4), "f32 mismatch vs reference"

    # 2) Multi-tile config (exercises interior halos + boundary clamps), strict f32.
    out_tiled = jax.block_until_ready(
        resblock1_forward_ncl(x_ncl, params, dilations, l_tile=16,
                              conv_dtype=jnp.float32))
    assert jnp.allclose(out_tiled, ref, atol=1e-4, rtol=1e-4), "tiled mismatch"

    # 3) Default perf path: bf16 MXU operands, f32 accumulation / elementwise.
    out_bf_mxu = jax.block_until_ready(resblock1_forward_ncl(x_ncl, params, dilations))
    assert jnp.allclose(out_bf_mxu, ref, atol=2e-2, rtol=2e-2), "bf16-MXU mismatch"

    # 4) bf16 storage end to end (halves HBM/VMEM traffic); accumulation stays f32.
    x_bf = x_ncl.astype(jnp.bfloat16)
    params_bf = [tuple(jnp.asarray(t, jnp.bfloat16) for t in p) for p in params]
    out_bf = jax.block_until_ready(resblock1_forward_ncl(x_bf, params_bf, dilations))
    assert jnp.allclose(out_bf.astype(jnp.float32), ref, atol=5e-2, rtol=5e-2), \
        "bf16 mismatch vs reference"

    print("KERNEL_OK")
</pallas_src>

<mosaic_0001>
module attributes {stable_mosaic.version = 11 : i64} {
  func.func @_resblock1_kernel(%arg0: i32, %arg1: i32, %arg2: memref<1x16x128xf32, #tpu.memory_space<vmem>>, %arg3: memref<1x64x128xf32, #tpu.memory_space<vmem>>, %arg4: memref<1x16x128xf32, #tpu.memory_space<vmem>>, %arg5: memref<3x3x128x128xf32, #tpu.memory_space<vmem>>, %arg6: memref<3x1x128xf32, #tpu.memory_space<vmem>>, %arg7: memref<3x3x128x128xf32, #tpu.memory_space<vmem>>, %arg8: memref<3x1x128xf32, #tpu.memory_space<vmem>>, %arg9: memref<1x64x128xf32, #tpu.memory_space<vmem>>, %arg10: memref<96x128xf32, #tpu.memory_space<vmem>>) attributes {dimension_semantics = [#tpu.dimension_semantics<parallel>, #tpu.dimension_semantics<parallel>], iteration_bounds = array<i64: 2, 1>, scalar_prefetch = 0 : i64, scratch_operands = 1 : i64, tpu.core_type = #tpu.core_type<tc>, window_params = [{transform_indices = @transform_0, window_bounds = array<i64: 1, 16, 128>}, {transform_indices = @transform_1, window_bounds = array<i64: 1, 64, 128>}, {transform_indices = @transform_2, window_bounds = array<i64: 1, 16, 128>}, {pipeline_mode = #tpu.pipeline_mode<synchronous>, transform_indices = @transform_3, window_bounds = array<i64: 3, 3, 128, 128>}, {pipeline_mode = #tpu.pipeline_mode<synchronous>, transform_indices = @transform_4, window_bounds = array<i64: 3, 1, 128>}, {pipeline_mode = #tpu.pipeline_mode<synchronous>, transform_indices = @transform_5, window_bounds = array<i64: 3, 3, 128, 128>}, {pipeline_mode = #tpu.pipeline_mode<synchronous>, transform_indices = @transform_6, window_bounds = array<i64: 3, 1, 128>}, {transform_indices = @transform_7, window_bounds = array<i64: 1, 64, 128>}]} {
    %c0 = arith.constant 0 : index
    %c0_0 = arith.constant 0 : index
    %c0_1 = arith.constant 0 : index
    %0 = vector.load %arg2[%c0, %c0_0, %c0_1] : memref<1x16x128xf32, #tpu.memory_space<vmem>>, vector<1x16x128xf32>
    %1 = vector.shape_cast %0 : vector<1x16x128xf32> to vector<16x128xf32>
    %c0_2 = arith.constant 0 : index
    %c0_3 = arith.constant 0 : index
    %2 = vector.load %arg10[%c0_2, %c0_3] : memref<96x128xf32, #tpu.memory_space<vmem>>, vector<16x128xf32>
    tpu.vector_store %arg10[%c0_2, %c0_3], %1 {strides = array<i32>} : memref<96x128xf32, #tpu.memory_space<vmem>>, vector<16x128xf32>,
    %c0_4 = arith.constant 0 : index
    %c0_5 = arith.constant 0 : index
    %c0_6 = arith.constant 0 : index
    %3 = vector.load %arg3[%c0_4, %c0_5, %c0_6] : memref<1x64x128xf32, #tpu.memory_space<vmem>>, vector<1x64x128xf32>
    %4 = vector.shape_cast %3 : vector<1x64x128xf32> to vector<64x128xf32>
    %c16 = arith.constant 16 : index
    %c0_7 = arith.constant 0 : index
    %5 = vector.load %arg10[%c16, %c0_7] : memref<96x128xf32, #tpu.memory_space<vmem>>, vector<64x128xf32>
    tpu.vector_store %arg10[%c16, %c0_7], %4 {strides = array<i32>} : memref<96x128xf32, #tpu.memory_space<vmem>>, vector<64x128xf32>,
    %c0_8 = arith.constant 0 : index
    %c0_9 = arith.constant 0 : index
    %c0_10 = arith.constant 0 : index
    %6 = vector.load %arg4[%c0_8, %c0_9, %c0_10] : memref<1x16x128xf32, #tpu.memory_space<vmem>>, vector<1x16x128xf32>
    %7 = vector.shape_cast %6 : vector<1x16x128xf32> to vector<16x128xf32>
    %c80 = arith.constant 80 : index
    %c0_11 = arith.constant 0 : index
    %8 = vector.load %arg10[%c80, %c0_11] : memref<96x128xf32, #tpu.memory_space<vmem>>, vector<16x128xf32>
    tpu.vector_store %arg10[%c80, %c0_11], %7 {strides = array<i32>} : memref<96x128xf32, #tpu.memory_space<vmem>>, vector<16x128xf32>,
    %c64_i32 = arith.constant 64 : i32
    %9 = arith.muli %arg1, %c64_i32 : i32
    %c16_i32 = arith.constant 16 : i32
    %10 = arith.subi %9, %c16_i32 : i32
    %11 = tpu.iota {dimensions = array<i32: 0>} : vector<96x1xi32>
    %12 = vector.broadcast %10 : i32 to vector<96x1xi32>
    %13 = arith.addi %12, %11 : vector<96x1xi32>
    %c0_i32 = arith.constant 0 : i32
    %14 = vector.broadcast %c0_i32 : i32 to vector<96x1xi32>
    %15 = arith.cmpi sge, %13, %14 : vector<96x1xi32>
    %c64_i32_12 = arith.constant 64 : i32
    %16 = vector.broadcast %c64_i32_12 : i32 to vector<96x1xi32>
    %17 = arith.cmpi slt, %13, %16 : vector<96x1xi32>
    %18 = arith.andi %15, %17 : vector<96x1xi1>
    %19 = vector.shape_cast %18 : vector<96x1xi1> to vector<96x1xi1>
    %20 = vector.broadcast %19 : vector<96x1xi1> to vector<96x128xi1>
    %cst = arith.constant 0.000000e+00 : f32
    %21 = vector.broadcast %cst : f32 to vector<8x128xf32>
    %c0_13 = arith.constant 0 : index
    %c0_14 = arith.constant 0 : index
    %22 = vector.load %arg10[%c0_13, %c0_14] : memref<96x128xf32, #tpu.memory_space<vmem>>, vector<96x128xf32>
    %cst_15 = arith.constant 0.000000e+00 : f32
    %23 = vector.broadcast %cst_15 : f32 to vector<96x128xf32>
    %24 = arith.cmpf oge, %22, %23 : vector<96x128xf32>
    %cst_16 = arith.constant 1.000000e-01 : f32
    %25 = vector.broadcast %cst_16 : f32 to vector<96x128xf32>
    %26 = arith.mulf %22, %25 : vector<96x128xf32>
    %27 = arith.select %24, %22, %26 : vector<96x128xi1>, vector<96x128xf32>
    %cst_17 = arith.constant 0.000000e+00 : f32
    %28 = vector.broadcast %cst_17 : f32 to vector<96x128xf32>
    %29 = arith.select %20, %27, %28 : vector<96x128xi1>, vector<96x128xf32>
    %30 = tpu.concatenate %21, %29, %21 in 0 : vector<8x128xf32>, vector<96x128xf32>, vector<8x128xf32> -> vector<112x128xf32>
    %31 = vector.extract_strided_slice %30 {offsets = [7, 0], sizes = [96, 128], strides = [1, 1]} : vector<112x128xf32> to vector<96x128xf32>
    %c0_18 = arith.constant 0 : index
    %c0_19 = arith.constant 0 : index
    %c0_20 = arith.constant 0 : index
    %c0_21 = arith.constant 0 : index
    %32 = vector.load %arg5[%c0_18, %c0_19, %c0_20, %c0_21] : memref<3x3x128x128xf32, #tpu.memory_space<vmem>>, vector<1x1x128x128xf32>
    %33 = vector.shape_cast %32 : vector<1x1x128x128xf32> to vector<128x128xf32>
    %cst_22 = arith.constant dense<0.000000e+00> : vector<96x128xf32>
    %34 = tpu.matmul %31, %33, %cst_22 {dimension_numbers = #tpu.dot_dimension_numbers<[1], [0], [0], [1], [0, 0, 1, 1], [], []>} : vector<96x128xf32>, vector<128x128xf32>, vector<96x128xf32> -> vector<96x128xf32>
    %c0_23 = arith.constant 0 : index
    %c1 = arith.constant 1 : index
    %c0_24 = arith.constant 0 : index
    %c0_25 = arith.constant 0 : index
    %35 = vector.load %arg5[%c0_23, %c1, %c0_24, %c0_25] : memref<3x3x128x128xf32, #tpu.memory_space<vmem>>, vector<1x1x128x128xf32>
    %36 = vector.shape_cast %35 : vector<1x1x128x128xf32> to vector<128x128xf32>
    %cst_26 = arith.constant dense<0.000000e+00> : vector<96x128xf32>
    %37 = tpu.matmul %29, %36, %cst_26 {dimension_numbers = #tpu.dot_dimension_numbers<[1], [0], [0], [1], [0, 0, 1, 1], [], []>} : vector<96x128xf32>, vector<128x128xf32>, vector<96x128xf32> -> vector<96x128xf32>
    %38 = arith.addf %34, %37 : vector<96x128xf32>
    %39 = vector.extract_strided_slice %30 {offsets = [9, 0], sizes = [96, 128], strides = [1, 1]} : vector<112x128xf32> to vector<96x128xf32>
    %c0_27 = arith.constant 0 : index
    %c2 = arith.constant 2 : index
    %c0_28 = arith.constant 0 : index
    %c0_29 = arith.constant 0 : index
    %40 = vector.load %arg5[%c0_27, %c2, %c0_28, %c0_29] : memref<3x3x128x128xf32, #tpu.memory_space<vmem>>, vector<1x1x128x128xf32>
    %41 = vector.shape_cast %40 : vector<1x1x128x128xf32> to vector<128x128xf32>
    %cst_30 = arith.constant dense<0.000000e+00> : vector<96x128xf32>
    %42 = tpu.matmul %39, %41, %cst_30 {dimension_numbers = #tpu.dot_dimension_numbers<[1], [0], [0], [1], [0, 0, 1, 1], [], []>} : vector<96x128xf32>, vector<128x128xf32>, vector<96x128xf32> -> vector<96x128xf32>
    %43 = arith.addf %38, %42 : vector<96x128xf32>
    %c0_31 = arith.constant 0 : index
    %c0_32 = arith.constant 0 : index
    %c0_33 = arith.constant 0 : index
    %44 = vector.load %arg6[%c0_31, %c0_32, %c0_33] : memref<3x1x128xf32, #tpu.memory_space<vmem>>, vector<1x1x128xf32>
    %45 = vector.shape_cast %44 : vector<1x1x128xf32> to vector<1x128xf32>
    %46 = vector.broadcast %45 : vector<1x128xf32> to vector<96x128xf32>
    %47 = arith.addf %43, %46 : vector<96x128xf32>
    %cst_34 = arith.constant 0.000000e+00 : f32
    %48 = vector.broadcast %cst_34 : f32 to vector<96x128xf32>
    %49 = arith.cmpf oge, %47, %48 : vector<96x128xf32>
    %cst_35 = arith.constant 1.000000e-01 : f32
    %50 = vector.broadcast %cst_35 : f32 to vector<96x128xf32>
    %51 = arith.mulf %47, %50 : vector<96x128xf32>
    %52 = arith.select %49, %47, %51 : vector<96x128xi1>, vector<96x128xf32>
    %cst_36 = arith.constant 0.000000e+00 : f32
    %53 = vector.broadcast %cst_36 : f32 to vector<96x128xf32>
    %54 = arith.select %20, %52, %53 : vector<96x128xi1>, vector<96x128xf32>
    %55 = tpu.concatenate %21, %54, %21 in 0 : vector<8x128xf32>, vector<96x128xf32>, vector<8x128xf32> -> vector<112x128xf32>
    %56 = vector.extract_strided_slice %55 {offsets = [7, 0], sizes = [96, 128], strides = [1, 1]} : vector<112x128xf32> to vector<96x128xf32>
    %c0_37 = arith.constant 0 : index
    %c0_38 = arith.constant 0 : index
    %c0_39 = arith.constant 0 : index
    %c0_40 = arith.constant 0 : index
    %57 = vector.load %arg7[%c0_37, %c0_38, %c0_39, %c0_40] : memref<3x3x128x128xf32, #tpu.memory_space<vmem>>, vector<1x1x128x128xf32>
    %58 = vector.shape_cast %57 : vector<1x1x128x128xf32> to vector<128x128xf32>
    %cst_41 = arith.constant dense<0.000000e+00> : vector<96x128xf32>
    %59 = tpu.matmul %56, %58, %cst_41 {dimension_numbers = #tpu.dot_dimension_numbers<[1], [0], [0], [1], [0, 0, 1, 1], [], []>} : vector<96x128xf32>, vector<128x128xf32>, vector<96x128xf32> -> vector<96x128xf32>
    %c0_42 = arith.constant 0 : index
    %c1_43 = arith.constant 1 : index
    %c0_44 = arith.constant 0 : index
    %c0_45 = arith.constant 0 : index
    %60 = vector.load %arg7[%c0_42, %c1_43, %c0_44, %c0_45] : memref<3x3x128x128xf32, #tpu.memory_space<vmem>>, vector<1x1x128x128xf32>
    %61 = vector.shape_cast %60 : vector<1x1x128x128xf32> to vector<128x128xf32>
    %cst_46 = arith.constant dense<0.000000e+00> : vector<96x128xf32>
    %62 = tpu.matmul %54, %61, %cst_46 {dimension_numbers = #tpu.dot_dimension_numbers<[1], [0], [0], [1], [0, 0, 1, 1], [], []>} : vector<96x128xf32>, vector<128x128xf32>, vector<96x128xf32> -> vector<96x128xf32>
    %63 = arith.addf %59, %62 : vector<96x128xf32>
    %64 = vector.extract_strided_slice %55 {offsets = [9, 0], sizes = [96, 128], strides = [1, 1]} : vector<112x128xf32> to vector<96x128xf32>
    %c0_47 = arith.constant 0 : index
    %c2_48 = arith.constant 2 : index
    %c0_49 = arith.constant 0 : index
    %c0_50 = arith.constant 0 : index
    %65 = vector.load %arg7[%c0_47, %c2_48, %c0_49, %c0_50] : memref<3x3x128x128xf32, #tpu.memory_space<vmem>>, vector<1x1x128x128xf32>
    %66 = vector.shape_cast %65 : vector<1x1x128x128xf32> to vector<128x128xf32>
    %cst_51 = arith.constant dense<0.000000e+00> : vector<96x128xf32>
    %67 = tpu.matmul %64, %66, %cst_51 {dimension_numbers = #tpu.dot_dimension_numbers<[1], [0], [0], [1], [0, 0, 1, 1], [], []>} : vector<96x128xf32>, vector<128x128xf32>, vector<96x128xf32> -> vector<96x128xf32>
    %68 = arith.addf %63, %67 : vector<96x128xf32>
    %c0_52 = arith.constant 0 : index
    %c0_53 = arith.constant 0 : index
    %c0_54 = arith.constant 0 : index
    %69 = vector.load %arg8[%c0_52, %c0_53, %c0_54] : memref<3x1x128xf32, #tpu.memory_space<vmem>>, vector<1x1x128xf32>
    %70 = vector.shape_cast %69 : vector<1x1x128xf32> to vector<1x128xf32>
    %71 = vector.broadcast %70 : vector<1x128xf32> to vector<96x128xf32>
    %72 = arith.addf %68, %71 : vector<96x128xf32>
    %73 = arith.addf %72, %22 : vector<96x128xf32>
    %c0_55 = arith.constant 0 : index
    %c0_56 = arith.constant 0 : index
    %74 = vector.load %arg10[%c0_55, %c0_56] : memref<96x128xf32, #tpu.memory_space<vmem>>, vector<96x128xf32>
    tpu.vector_store %arg10[%c0_55, %c0_56], %73 {strides = array<i32>} : memref<96x128xf32, #tpu.memory_space<vmem>>, vector<96x128xf32>,
    %c0_57 = arith.constant 0 : index
    %c0_58 = arith.constant 0 : index
    %75 = vector.load %arg10[%c0_57, %c0_58] : memref<96x128xf32, #tpu.memory_space<vmem>>, vector<96x128xf32>
    %cst_59 = arith.constant 0.000000e+00 : f32
    %76 = vector.broadcast %cst_59 : f32 to vector<96x128xf32>
    %77 = arith.cmpf oge, %75, %76 : vector<96x128xf32>
    %cst_60 = arith.constant 1.000000e-01 : f32
    %78 = vector.broadcast %cst_60 : f32 to vector<96x128xf32>
    %79 = arith.mulf %75, %78 : vector<96x128xf32>
    %80 = arith.select %77, %75, %79 : vector<96x128xi1>, vector<96x128xf32>
    %cst_61 = arith.constant 0.000000e+00 : f32
    %81 = vector.broadcast %cst_61 : f32 to vector<96x128xf32>
    %82 = arith.select %20, %80, %81 : vector<96x128xi1>, vector<96x128xf32>
    %83 = tpu.concatenate %21, %82, %21 in 0 : vector<8x128xf32>, vector<96x128xf32>, vector<8x128xf32> -> vector<112x128xf32>
    %84 = vector.extract_strided_slice %83 {offsets = [5, 0], sizes = [96, 128], strides = [1, 1]} : vector<112x128xf32> to vector<96x128xf32>
    %c1_62 = arith.constant 1 : index
    %c0_63 = arith.constant 0 : index
    %c0_64 = arith.constant 0 : index
    %c0_65 = arith.constant 0 : index
    %85 = vector.load %arg5[%c1_62, %c0_63, %c0_64, %c0_65] : memref<3x3x128x128xf32, #tpu.memory_space<vmem>>, vector<1x1x128x128xf32>
    %86 = vector.shape_cast %85 : vector<1x1x128x128xf32> to vector<128x128xf32>
    %cst_66 = arith.constant dense<0.000000e+00> : vector<96x128xf32>
    %87 = tpu.matmul %84, %86, %cst_66 {dimension_numbers = #tpu.dot_dimension_numbers<[1], [0], [0], [1], [0, 0, 1, 1], [], []>} : vector<96x128xf32>, vector<128x128xf32>, vector<96x128xf32> -> vector<96x128xf32>
    %c1_67 = arith.constant 1 : index
    %c1_68 = arith.constant 1 : index
    %c0_69 = arith.constant 0 : index
    %c0_70 = arith.constant 0 : index
    %88 = vector.load %arg5[%c1_67, %c1_68, %c0_69, %c0_70] : memref<3x3x128x128xf32, #tpu.memory_space<vmem>>, vector<1x1x128x128xf32>
    %89 = vector.shape_cast %88 : vector<1x1x128x128xf32> to vector<128x128xf32>
    %cst_71 = arith.constant dense<0.000000e+00> : vector<96x128xf32>
    %90 = tpu.matmul %82, %89, %cst_71 {dimension_numbers = #tpu.dot_dimension_numbers<[1], [0], [0], [1], [0, 0, 1, 1], [], []>} : vector<96x128xf32>, vector<128x128xf32>, vector<96x128xf32> -> vector<96x128xf32>
    %91 = arith.addf %87, %90 : vector<96x128xf32>
    %92 = vector.extract_strided_slice %83 {offsets = [11, 0], sizes = [96, 128], strides = [1, 1]} : vector<112x128xf32> to vector<96x128xf32>
    %c1_72 = arith.constant 1 : index
    %c2_73 = arith.constant 2 : index
    %c0_74 = arith.constant 0 : index
    %c0_75 = arith.constant 0 : index
    %93 = vector.load %arg5[%c1_72, %c2_73, %c0_74, %c0_75] : memref<3x3x128x128xf32, #tpu.memory_space<vmem>>, vector<1x1x128x128xf32>
    %94 = vector.shape_cast %93 : vector<1x1x128x128xf32> to vector<128x128xf32>
    %cst_76 = arith.constant dense<0.000000e+00> : vector<96x128xf32>
    %95 = tpu.matmul %92, %94, %cst_76 {dimension_numbers = #tpu.dot_dimension_numbers<[1], [0], [0], [1], [0, 0, 1, 1], [], []>} : vector<96x128xf32>, vector<128x128xf32>, vector<96x128xf32> -> vector<96x128xf32>
    %96 = arith.addf %91, %95 : vector<96x128xf32>
    %c1_77 = arith.constant 1 : index
    %c0_78 = arith.constant 0 : index
    %c0_79 = arith.constant 0 : index
    %97 = vector.load %arg6[%c1_77, %c0_78, %c0_79] : memref<3x1x128xf32, #tpu.memory_space<vmem>>, vector<1x1x128xf32>
    %98 = vector.shape_cast %97 : vector<1x1x128xf32> to vector<1x128xf32>
    %99 = vector.broadcast %98 : vector<1x128xf32> to vector<96x128xf32>
    %100 = arith.addf %96, %99 : vector<96x128xf32>
    %cst_80 = arith.constant 0.000000e+00 : f32
    %101 = vector.broadcast %cst_80 : f32 to vector<96x128xf32>
    %102 = arith.cmpf oge, %100, %101 : vector<96x128xf32>
    %cst_81 = arith.constant 1.000000e-01 : f32
    %103 = vector.broadcast %cst_81 : f32 to vector<96x128xf32>
    %104 = arith.mulf %100, %103 : vector<96x128xf32>
    %105 = arith.select %102, %100, %104 : vector<96x128xi1>, vector<96x128xf32>
    %cst_82 = arith.constant 0.000000e+00 : f32
    %106 = vector.broadcast %cst_82 : f32 to vector<96x128xf32>
    %107 = arith.select %20, %105, %106 : vector<96x128xi1>, vector<96x128xf32>
    %108 = tpu.concatenate %21, %107, %21 in 0 : vector<8x128xf32>, vector<96x128xf32>, vector<8x128xf32> -> vector<112x128xf32>
    %109 = vector.extract_strided_slice %108 {offsets = [7, 0], sizes = [96, 128], strides = [1, 1]} : vector<112x128xf32> to vector<96x128xf32>
    %c1_83 = arith.constant 1 : index
    %c0_84 = arith.constant 0 : index
    %c0_85 = arith.constant 0 : index
    %c0_86 = arith.constant 0 : index
    %110 = vector.load %arg7[%c1_83, %c0_84, %c0_85, %c0_86] : memref<3x3x128x128xf32, #tpu.memory_space<vmem>>, vector<1x1x128x128xf32>
    %111 = vector.shape_cast %110 : vector<1x1x128x128xf32> to vector<128x128xf32>
    %cst_87 = arith.constant dense<0.000000e+00> : vector<96x128xf32>
    %112 = tpu.matmul %109, %111, %cst_87 {dimension_numbers = #tpu.dot_dimension_numbers<[1], [0], [0], [1], [0, 0, 1, 1], [], []>} : vector<96x128xf32>, vector<128x128xf32>, vector<96x128xf32> -> vector<96x128xf32>
    %c1_88 = arith.constant 1 : index
    %c1_89 = arith.constant 1 : index
    %c0_90 = arith.constant 0 : index
    %c0_91 = arith.constant 0 : index
    %113 = vector.load %arg7[%c1_88, %c1_89, %c0_90, %c0_91] : memref<3x3x128x128xf32, #tpu.memory_space<vmem>>, vector<1x1x128x128xf32>
    %114 = vector.shape_cast %113 : vector<1x1x128x128xf32> to vector<128x128xf32>
    %cst_92 = arith.constant dense<0.000000e+00> : vector<96x128xf32>
    %115 = tpu.matmul %107, %114, %cst_92 {dimension_numbers = #tpu.dot_dimension_numbers<[1], [0], [0], [1], [0, 0, 1, 1], [], []>} : vector<96x128xf32>, vector<128x128xf32>, vector<96x128xf32> -> vector<96x128xf32>
    %116 = arith.addf %112, %115 : vector<96x128xf32>
    %117 = vector.extract_strided_slice %108 {offsets = [9, 0], sizes = [96, 128], strides = [1, 1]} : vector<112x128xf32> to vector<96x128xf32>
    %c1_93 = arith.constant 1 : index
    %c2_94 = arith.constant 2 : index
    %c0_95 = arith.constant 0 : index
    %c0_96 = arith.constant 0 : index
    %118 = vector.load %arg7[%c1_93, %c2_94, %c0_95, %c0_96] : memref<3x3x128x128xf32, #tpu.memory_space<vmem>>, vector<1x1x128x128xf32>
    %119 = vector.shape_cast %118 : vector<1x1x128x128xf32> to vector<128x128xf32>
    %cst_97 = arith.constant dense<0.000000e+00> : vector<96x128xf32>
    %120 = tpu.matmul %117, %119, %cst_97 {dimension_numbers = #tpu.dot_dimension_numbers<[1], [0], [0], [1], [0, 0, 1, 1], [], []>} : vector<96x128xf32>, vector<128x128xf32>, vector<96x128xf32> -> vector<96x128xf32>
    %121 = arith.addf %116, %120 : vector<96x128xf32>
    %c1_98 = arith.constant 1 : index
    %c0_99 = arith.constant 0 : index
    %c0_100 = arith.constant 0 : index
    %122 = vector.load %arg8[%c1_98, %c0_99, %c0_100] : memref<3x1x128xf32, #tpu.memory_space<vmem>>, vector<1x1x128xf32>
    %123 = vector.shape_cast %122 : vector<1x1x128xf32> to vector<1x128xf32>
    %124 = vector.broadcast %123 : vector<1x128xf32> to vector<96x128xf32>
    %125 = arith.addf %121, %124 : vector<96x128xf32>
    %126 = arith.addf %125, %75 : vector<96x128xf32>
    %c0_101 = arith.constant 0 : index
    %c0_102 = arith.constant 0 : index
    %127 = vector.load %arg10[%c0_101, %c0_102] : memref<96x128xf32, #tpu.memory_space<vmem>>, vector<96x128xf32>
    tpu.vector_store %arg10[%c0_101, %c0_102], %126 {strides = array<i32>} : memref<96x128xf32, #tpu.memory_space<vmem>>, vector<96x128xf32>,
    %c0_103 = arith.constant 0 : index
    %c0_104 = arith.constant 0 : index
    %128 = vector.load %arg10[%c0_103, %c0_104] : memref<96x128xf32, #tpu.memory_space<vmem>>, vector<96x128xf32>
    %cst_105 = arith.constant 0.000000e+00 : f32
    %129 = vector.broadcast %cst_105 : f32 to vector<96x128xf32>
    %130 = arith.cmpf oge, %128, %129 : vector<96x128xf32>
    %cst_106 = arith.constant 1.000000e-01 : f32
    %131 = vector.broadcast %cst_106 : f32 to vector<96x128xf32>
    %132 = arith.mulf %128, %131 : vector<96x128xf32>
    %133 = arith.select %130, %128, %132 : vector<96x128xi1>, vector<96x128xf32>
    %cst_107 = arith.constant 0.000000e+00 : f32
    %134 = vector.broadcast %cst_107 : f32 to vector<96x128xf32>
    %135 = arith.select %20, %133, %134 : vector<96x128xi1>, vector<96x128xf32>
    %136 = tpu.concatenate %21, %135, %21 in 0 : vector<8x128xf32>, vector<96x128xf32>, vector<8x128xf32> -> vector<112x128xf32>
    %137 = vector.extract_strided_slice %136 {offsets = [3, 0], sizes = [96, 128], strides = [1, 1]} : vector<112x128xf32> to vector<96x128xf32>
    %c2_108 = arith.constant 2 : index
    %c0_109 = arith.constant 0 : index
    %c0_110 = arith.constant 0 : index
    %c0_111 = arith.constant 0 : index
    %138 = vector.load %arg5[%c2_108, %c0_109, %c0_110, %c0_111] : memref<3x3x128x128xf32, #tpu.memory_space<vmem>>, vector<1x1x128x128xf32>
    %139 = vector.shape_cast %138 : vector<1x1x128x128xf32> to vector<128x128xf32>
    %cst_112 = arith.constant dense<0.000000e+00> : vector<96x128xf32>
    %140 = tpu.matmul %137, %139, %cst_112 {dimension_numbers = #tpu.dot_dimension_numbers<[1], [0], [0], [1], [0, 0, 1, 1], [], []>} : vector<96x128xf32>, vector<128x128xf32>, vector<96x128xf32> -> vector<96x128xf32>
    %c2_113 = arith.constant 2 : index
    %c1_114 = arith.constant 1 : index
    %c0_115 = arith.constant 0 : index
    %c0_116 = arith.constant 0 : index
    %141 = vector.load %arg5[%c2_113, %c1_114, %c0_115, %c0_116] : memref<3x3x128x128xf32, #tpu.memory_space<vmem>>, vector<1x1x128x128xf32>
    %142 = vector.shape_cast %141 : vector<1x1x128x128xf32> to vector<128x128xf32>
    %cst_117 = arith.constant dense<0.000000e+00> : vector<96x128xf32>
    %143 = tpu.matmul %135, %142, %cst_117 {dimension_numbers = #tpu.dot_dimension_numbers<[1], [0], [0], [1], [0, 0, 1, 1], [], []>} : vector<96x128xf32>, vector<128x128xf32>, vector<96x128xf32> -> vector<96x128xf32>
    %144 = arith.addf %140, %143 : vector<96x128xf32>
    %145 = vector.extract_strided_slice %136 {offsets = [13, 0], sizes = [96, 128], strides = [1, 1]} : vector<112x128xf32> to vector<96x128xf32>
    %c2_118 = arith.constant 2 : index
    %c2_119 = arith.constant 2 : index
    %c0_120 = arith.constant 0 : index
    %c0_121 = arith.constant 0 : index
    %146 = vector.load %arg5[%c2_118, %c2_119, %c0_120, %c0_121] : memref<3x3x128x128xf32, #tpu.memory_space<vmem>>, vector<1x1x128x128xf32>
    %147 = vector.shape_cast %146 : vector<1x1x128x128xf32> to vector<128x128xf32>
    %cst_122 = arith.constant dense<0.000000e+00> : vector<96x128xf32>
    %148 = tpu.matmul %145, %147, %cst_122 {dimension_numbers = #tpu.dot_dimension_numbers<[1], [0], [0], [1], [0, 0, 1, 1], [], []>} : vector<96x128xf32>, vector<128x128xf32>, vector<96x128xf32> -> vector<96x128xf32>
    %149 = arith.addf %144, %148 : vector<96x128xf32>
    %c2_123 = arith.constant 2 : index
    %c0_124 = arith.constant 0 : index
    %c0_125 = arith.constant 0 : index
    %150 = vector.load %arg6[%c2_123, %c0_124, %c0_125] : memref<3x1x128xf32, #tpu.memory_space<vmem>>, vector<1x1x128xf32>
    %151 = vector.shape_cast %150 : vector<1x1x128xf32> to vector<1x128xf32>
    %152 = vector.broadcast %151 : vector<1x128xf32> to vector<96x128xf32>
    %153 = arith.addf %149, %152 : vector<96x128xf32>
    %cst_126 = arith.constant 0.000000e+00 : f32
    %154 = vector.broadcast %cst_126 : f32 to vector<96x128xf32>
    %155 = arith.cmpf oge, %153, %154 : vector<96x128xf32>
    %cst_127 = arith.constant 1.000000e-01 : f32
    %156 = vector.broadcast %cst_127 : f32 to vector<96x128xf32>
    %157 = arith.mulf %153, %156 : vector<96x128xf32>
    %158 = arith.select %155, %153, %157 : vector<96x128xi1>, vector<96x128xf32>
    %cst_128 = arith.constant 0.000000e+00 : f32
    %159 = vector.broadcast %cst_128 : f32 to vector<96x128xf32>
    %160 = arith.select %20, %158, %159 : vector<96x128xi1>, vector<96x128xf32>
    %161 = tpu.concatenate %21, %160, %21 in 0 : vector<8x128xf32>, vector<96x128xf32>, vector<8x128xf32> -> vector<112x128xf32>
    %162 = vector.extract_strided_slice %161 {offsets = [7, 0], sizes = [96, 128], strides = [1, 1]} : vector<112x128xf32> to vector<96x128xf32>
    %c2_129 = arith.constant 2 : index
    %c0_130 = arith.constant 0 : index
    %c0_131 = arith.constant 0 : index
    %c0_132 = arith.constant 0 : index
    %163 = vector.load %arg7[%c2_129, %c0_130, %c0_131, %c0_132] : memref<3x3x128x128xf32, #tpu.memory_space<vmem>>, vector<1x1x128x128xf32>
    %164 = vector.shape_cast %163 : vector<1x1x128x128xf32> to vector<128x128xf32>
    %cst_133 = arith.constant dense<0.000000e+00> : vector<96x128xf32>
    %165 = tpu.matmul %162, %164, %cst_133 {dimension_numbers = #tpu.dot_dimension_numbers<[1], [0], [0], [1], [0, 0, 1, 1], [], []>} : vector<96x128xf32>, vector<128x128xf32>, vector<96x128xf32> -> vector<96x128xf32>
    %c2_134 = arith.constant 2 : index
    %c1_135 = arith.constant 1 : index
    %c0_136 = arith.constant 0 : index
    %c0_137 = arith.constant 0 : index
    %166 = vector.load %arg7[%c2_134, %c1_135, %c0_136, %c0_137] : memref<3x3x128x128xf32, #tpu.memory_space<vmem>>, vector<1x1x128x128xf32>
    %167 = vector.shape_cast %166 : vector<1x1x128x128xf32> to vector<128x128xf32>
    %cst_138 = arith.constant dense<0.000000e+00> : vector<96x128xf32>
    %168 = tpu.matmul %160, %167, %cst_138 {dimension_numbers = #tpu.dot_dimension_numbers<[1], [0], [0], [1], [0, 0, 1, 1], [], []>} : vector<96x128xf32>, vector<128x128xf32>, vector<96x128xf32> -> vector<96x128xf32>
    %169 = arith.addf %165, %168 : vector<96x128xf32>
    %170 = vector.extract_strided_slice %161 {offsets = [9, 0], sizes = [96, 128], strides = [1, 1]} : vector<112x128xf32> to vector<96x128xf32>
    %c2_139 = arith.constant 2 : index
    %c2_140 = arith.constant 2 : index
    %c0_141 = arith.constant 0 : index
    %c0_142 = arith.constant 0 : index
    %171 = vector.load %arg7[%c2_139, %c2_140, %c0_141, %c0_142] : memref<3x3x128x128xf32, #tpu.memory_space<vmem>>, vector<1x1x128x128xf32>
    %172 = vector.shape_cast %171 : vector<1x1x128x128xf32> to vector<128x128xf32>
    %cst_143 = arith.constant dense<0.000000e+00> : vector<96x128xf32>
    %173 = tpu.matmul %170, %172, %cst_143 {dimension_numbers = #tpu.dot_dimension_numbers<[1], [0], [0], [1], [0, 0, 1, 1], [], []>} : vector<96x128xf32>, vector<128x128xf32>, vector<96x128xf32> -> vector<96x128xf32>
    %174 = arith.addf %169, %173 : vector<96x128xf32>
    %c2_144 = arith.constant 2 : index
    %c0_145 = arith.constant 0 : index
    %c0_146 = arith.constant 0 : index
    %175 = vector.load %arg8[%c2_144, %c0_145, %c0_146] : memref<3x1x128xf32, #tpu.memory_space<vmem>>, vector<1x1x128xf32>
    %176 = vector.shape_cast %175 : vector<1x1x128xf32> to vector<1x128xf32>
    %177 = vector.broadcast %176 : vector<1x128xf32> to vector<96x128xf32>
    %178 = arith.addf %174, %177 : vector<96x128xf32>
    %179 = arith.addf %178, %128 : vector<96x128xf32>
    %c0_147 = arith.constant 0 : index
    %c0_148 = arith.constant 0 : index
    %180 = vector.load %arg10[%c0_147, %c0_148] : memref<96x128xf32, #tpu.memory_space<vmem>>, vector<96x128xf32>
    tpu.vector_store %arg10[%c0_147, %c0_148], %179 {strides = array<i32>} : memref<96x128xf32, #tpu.memory_space<vmem>>, vector<96x128xf32>,
    %c16_149 = arith.constant 16 : index
    %c0_150 = arith.constant 0 : index
    %181 = vector.load %arg10[%c16_149, %c0_150] : memref<96x128xf32, #tpu.memory_space<vmem>>, vector<64x128xf32>
    %c0_151 = arith.constant 0 : index
    %c0_152 = arith.constant 0 : index
    %c0_153 = arith.constant 0 : index
    %182 = vector.load %arg9[%c0_151, %c0_152, %c0_153] : memref<1x64x128xf32, #tpu.memory_space<vmem>>, vector<1x64x128xf32>
    %183 = vector.shape_cast %182 : vector<1x64x128xf32> to vector<64x128xf32>
    %184 = vector.shape_cast %181 : vector<64x128xf32> to vector<1x64x128xf32>
    tpu.vector_store %arg9[%c0_151, %c0_152, %c0_153], %184 {strides = array<i32>} : memref<1x64x128xf32, #tpu.memory_space<vmem>>, vector<1x64x128xf32>,
    return
  }
  func.func @transform_0(%arg0: i32, %arg1: i32) -> (i32, i32, i32) {
    %c4_i32 = arith.constant 4 : i32
    %0 = arith.muli %arg1, %c4_i32 : i32
    %c1_i32 = arith.constant 1 : i32
    %1 = arith.subi %0, %c1_i32 : i32
    %c0_i32 = arith.constant 0 : i32
    %2 = arith.maxsi %1, %c0_i32 : i32
    %c0_i32_0 = arith.constant 0 : i32
    %c0_i32_1 = arith.constant 0 : i32
    return %arg0, %2, %c0_i32_0 : i32, i32, i32
  }
  func.func @transform_1(%arg0: i32, %arg1: i32) -> (i32, i32, i32) {
    %c0_i32 = arith.constant 0 : i32
    %c0_i32_0 = arith.constant 0 : i32
    return %arg0, %arg1, %c0_i32 : i32, i32, i32
  }
  func.func @transform_2(%arg0: i32, %arg1: i32) -> (i32, i32, i32) {
    %c1_i32 = arith.constant 1 : i32
    %0 = arith.addi %arg1, %c1_i32 : i32
    %c4_i32 = arith.constant 4 : i32
    %1 = arith.muli %0, %c4_i32 : i32
    %c3_i32 = arith.constant 3 : i32
    %2 = arith.minsi %1, %c3_i32 : i32
    %c0_i32 = arith.constant 0 : i32
    %c0_i32_0 = arith.constant 0 : i32
    return %arg0, %2, %c0_i32 : i32, i32, i32
  }
  func.func @transform_3(%arg0: i32, %arg1: i32) -> (i32, i32, i32, i32) {
    %c0_i32 = arith.constant 0 : i32
    %c0_i32_0 = arith.constant 0 : i32
    %c0_i32_1 = arith.constant 0 : i32
    %c0_i32_2 = arith.constant 0 : i32
    %c0_i32_3 = arith.constant 0 : i32
    return %c0_i32, %c0_i32_0, %c0_i32_1, %c0_i32_2 : i32, i32, i32, i32
  }
  func.func @transform_4(%arg0: i32, %arg1: i32) -> (i32, i32, i32) {
    %c0_i32 = arith.constant 0 : i32
    %c0_i32_0 = arith.constant 0 : i32
    %c0_i32_1 = arith.constant 0 : i32
    %c0_i32_2 = arith.constant 0 : i32
    return %c0_i32, %c0_i32_0, %c0_i32_1 : i32, i32, i32
  }
  func.func @transform_5(%arg0: i32, %arg1: i32) -> (i32, i32, i32, i32) {
    %c0_i32 = arith.constant 0 : i32
    %c0_i32_0 = arith.constant 0 : i32
    %c0_i32_1 = arith.constant 0 : i32
    %c0_i32_2 = arith.constant 0 : i32
    %c0_i32_3 = arith.constant 0 : i32
    return %c0_i32, %c0_i32_0, %c0_i32_1, %c0_i32_2 : i32, i32, i32, i32
  }
  func.func @transform_6(%arg0: i32, %arg1: i32) -> (i32, i32, i32) {
    %c0_i32 = arith.constant 0 : i32
    %c0_i32_0 = arith.constant 0 : i32
    %c0_i32_1 = arith.constant 0 : i32
    %c0_i32_2 = arith.constant 0 : i32
    return %c0_i32, %c0_i32_0, %c0_i32_1 : i32, i32, i32
  }
  func.func @transform_7(%arg0: i32, %arg1: i32) -> (i32, i32, i32) {
    %c0_i32 = arith.constant 0 : i32
    %c0_i32_0 = arith.constant 0 : i32
    return %arg0, %arg1, %c0_i32 : i32, i32, i32
  }
}

</mosaic_0001>

<bundles_post_ra>
// kernel: tpu_custom_call.1
= control target key start
LH: loop header
LB: loop body
LE: loop exit
PB: predicated region body
PF: predicated region fallthrough
CT: control target
= control target key end

     0   :  { %s7015_s0 = inlined_call_operand.hbm [shape: f32[2,64,128], index: 0, kind: input, shape index: {}]   ;;  %s7016_s1 = inlined_call_operand.hbm [shape: f32[2,64,128], index: 1, kind: input, shape index: {}]   ;;  %s7017_s2 = inlined_call_operand.hbm [shape: f32[2,64,128], index: 2, kind: input, shape index: {}]   ;;  %s7018_s3 = inlined_call_operand.hbm [shape: f32[3,3,128,128], index: 3, kind: input, shape index: {}]   ;;  %s7019_s4 = inlined_call_operand.vmem [shape: f32[3,1,128], index: 4, kind: input, shape index: {}]   ;;  %s7020_s5 = inlined_call_operand.hbm [shape: f32[3,3,128,128], index: 5, kind: input, shape index: {}]   ;;  %s7021_s6 = inlined_call_operand.vmem [shape: f32[3,1,128], index: 6, kind: input, shape index: {}]   ;;  %s7022_s7 = inlined_call_operand.hbm [shape: f32[2,64,128], index: 7, kind: output, shape index: {}]  }
   0x1   :  { %7037 = sst [smem:[#allocation23_spill]] %s7016_s1 }
   0x2   :  { %7038 = sst [smem:[#allocation24_spill]] %s7018_s3 }
   0x3   :  { %7039 = sst [smem:[#allocation25_spill]] %s7022_s7 }
   0x4   :  { %12 = vsyncpa [#allocation4], 0 }
   0x5   :  { %14 = vsyncpa [#allocation4 + $0x1], 0 }
   0x6   :  { %15 = vsyncpa [#allocation7], 0 }
   0x7   :  { %17 = vsyncpa [#allocation7 + $0x1], 0 }
   0x8   :  { %18 = vsyncpa [#allocation10], 0 }
   0x9   :  { %19 = vsyncpa [#allocation5], 0 }
   0xa   :  { %21 = vsyncpa [#allocation5 + $0x1], 0  ;;  %s6247_s24 = smov 0   ;;  %s6249_s25 = smov 0  }
   0xb   :  { %s6251_s26 = smov 0   ;;  %s6253_s27 = smov 0  }
   0xc   :  { %s6255_s28 = smov 0   ;;  %s6257_s29 = smov 0  }
   0xd LB: > { %7040 = sst [smem:[#allocation17_spill]] %s6174_s24  ;;  %s6278_s30 = sadd.s32 4294967295, %s6194_s29   ;;  %s6194_s29 = sphi %s6257_s29, %s27_s29   ;;  %s6190_s28 = sphi %s6255_s28, %s7073_s28   ;;  %s6186_s27 = sphi %s6253_s27, %s7072_s27   ;;  %s6182_s26 = sphi %s6251_s26, %s7071_s26   ;;  %s6178_s25 = sphi %s6249_s25, %s7075_s25   ;;  %s6174_s24 = sphi %s6247_s24, %s7074_s24  }
   0xe   : > { %7041 = sst [smem:[#allocation18_spill]] %s6182_s26  ;;  %s4418_s8 = sadd.s32 4294967294, %s6194_s29  }
   0xf   : > { %7042 = sst [smem:[#allocation19_spill]] %s6190_s28  ;;  %p63_p0 = scmp.ne.s32.totalorder %s6182_s26, %s6178_s25 }
  0x10   : > { %p64_p1 = scmp.eq.s32.totalorder %s6194_s29, 0  ;;  %p69_p2 = scmp.ne.s32.totalorder %s6178_s25, %s6174_s24 }
  0x11   : > { %p7023_p3 = scmp.eq.s32.totalorder %s6278_s30, 0  ;;  %p243_p5 = scmp.eq.s32.totalorder %s6278_s30, 1 }
  0x12   : > { %p6287_p4 = por %p64_p1, %p63_p0  ;;  %p249_p7 = scmp.eq.s32.totalorder %s4418_s8, 1 }
  0x13   : > { %p6294_p6 = por %p7023_p3, %p69_p2  ;;  %p6298_p8 = por %p243_p5, %p63_p0 }
  0x14   : > { %p4419_p9 = scmp.ge.s32.totalorder %s6194_s29, 1  ;;  %p6303_p10 = por %p249_p7, %p69_p2 }
  0x15   : > { %s7044_s10 = scalar_select %p6294_p6, 1, 0 }
  0x16   : > { %s7045_s11 = scalar_select %p6298_p8, 1, 0 }
  0x17   : > { %s7046_s12 = scalar_select %p6303_p10, 1, 0 }
  0x18   : > { %p256_p11 = scmp.lt.s32.totalorder %s6194_s29, 3  ;;  %s6196_s14 = smov [#allocation9]  }
  0x19   : > { %7047 = sst [smem:[#allocation20_spill]] %s7046_s12  ;;  %s268_s15 = sshll.u32 %s6196_s14, 4  ;;  %s269_s15 = int_to_ptr.vmem [resolvable:$true] %s268_s15 }
  0x1a   : > { %p6308_p12 = pnand %p4419_p9, %p256_p11  ;;  %s39_s17 = sadd.s32 1, %s6190_s28 }
  0x1b   : > { %s56_s18 = sadd.s32 1, %s6182_s26  ;;  %p6323_p2 = scmp.ge.s32.totalorder %s39_s17, 2 }
  0x1c   : > { %p5880_p13 = pneg %p6308_p12  ;;  %s5981_s20 = scalar_lea.vmem %s269_s15, 18432 }
  0x1d   : > { %p5982_p7 = scmp.ne.s32.totalorder %s269_s15, %s5981_s20  ;;  %p5990_p0 = scmp.lt.s32.totalorder %s5981_s20, %s5981_s20 }
  0x1e   : > { %p6317_p1 = pnand %p5880_p13, %p7023_p3  ;;  %p5989_p13 = scmp.lt.s32.totalorder %s269_s15, %s269_s15 }
  0x20   : > { %p5972_p5 = pneg %p6317_p1  ;;  %p5991_p3 = por %p5990_p0, %p5989_p13 }
  0x22   : > { %p5984_p9 = pnand %p5982_p7, %p5972_p5 }
  0x24   : > { %p5985_p11 = pneg %p5984_p9 }
  0x26   : > { %p5992_p10 = pnand %p5991_p3, %p5985_p11 }
  0x28   : > { %5995 = shalt.err (!%p5992_p10)
}
  0x29   : > { %s7026_s21 = smov 128   ;;  %s7028_s22 = smov 8  }
  0x2a   : > { %s7051_s3 = sld [smem:[#allocation24_spill]]  ;;  %s7077_s17 = smov (%p6323_p2, %s39_s17), 0 }
  0x2b   : > { %7052 = sst [smem:[#allocation21_spill]] %s7077_s17  ;;  %p5903_p3 = scmp.lt.s32.totalorder %s6194_s29, 2 }
  0x2c   : > { %s6346_s14 = sand.u32 1, %s6182_s26   ;;  %s51_s20 = ssub.s32 %s6190_s28, %s7077_s17 }
  0x2d   : > { %s6351_s12 = sshll.u32 %s6190_s28, 10  ;;  %p54_p10 = scmp.eq.s32.totalorder %s51_s20, 0 }
  0x2e   : > { %p6355_p0 = pnand %p5903_p3, %p6287_p4  ;;  %s4426_s19 = sshll.u32 %s6346_s14, 6 }
  0x2f   : > { %s6362_s23 = scalar_select %p54_p10, %s6182_s26, %s56_s18  }
  0x30   : > { %5883 = dma.hbm_to_vmem [thread:$0]  (!%p6317_p1), %s7051_s3, 18432, %s269_s15, [#allocation10], %s7026_s21, %s7026_s21, %s7028_s22  }
  0x31   : > { %s328_s15 = sand.u32 1, %s6194_s29   ;;  %7054 = sst [smem:[#allocation22_spill]] %s6362_s23 }
  0x32   : > { %s7055_s1 = sld [smem:[#allocation23_spill]]  ;;  %s332_s3 = scalar_lea.vmem [#allocation6], %s4426_s19 }
  0x33   : > { %s341_s17 = sshll.u32 %s332_s3, 4  ;;  %s6199_s28 = smov [#allocation11]   ;;  %s342_s17 = int_to_ptr.vmem [resolvable:$true] %s341_s17 }
  0x34   : > { %s284_s20 = sshll.u32 %s6199_s28, 4  ;;  %s6368_s9 = scalar_lea.sflag [#allocation7], %s328_s15  ;;  %s285_s20 = int_to_ptr.vmem [resolvable:$true] %s284_s20 }
  0x35   : > { %p7033_p4 = pneg %p6355_p0  ;;  %s6009_s7 = scalar_lea.vmem %s342_s17, 1024 }
  0x36   : > { %p6010_p2 = scmp.ne.s32.totalorder %s342_s17, %s6009_s7  ;;  %s6200_s18 = smov [#allocation6]  }
  0x37   : > { %s6014_s23 = sshll.u32 %s6200_s18, 4  ;;  %s6015_s23 = int_to_ptr.vmem [resolvable:$false] %s6014_s23 }
  0x38   : > { %s340_s22 = scalar_lea.hbm %s7055_s1, %s6351_s12  ;;  %p6012_p7 = pnand %p6010_p2, %p7033_p4 }
  0x39   : > { %s6016_s21 = scalar_lea.vmem %s6015_s23, 2048  ;;  %p6017_p11 = scmp.lt.s32.totalorder %s342_s17, %s6015_s23 }
  0x3a   : > { %p6013_p9 = pneg %p6012_p7  ;;  %p6018_p13 = scmp.lt.s32.totalorder %s6016_s21, %s6009_s7 }
  0x3c   : > { %p6019_p3 = por %p6018_p13, %p6017_p11 }
  0x3e   : > { %p6020_p10 = pnand %p6019_p3, %p6013_p9 }
  0x40   : > { %6023 = shalt.err (!%p6020_p10)
}
  0x41   : > { %s7056_s3 = smov 8   ;;  %s7057_s28 = smov 128  }
  0x42   : > { %5893 = dma.hbm_to_vmem [thread:$0]  (!%p6355_p0), %s340_s22, 1024, %s342_s17, %s6368_s9, %s7057_s28, %s7057_s28, %s7056_s3  }
  0x43   : > { %s6035_s15 = scalar_lea.vmem %s285_s20, 18432  ;;  %p6043_p8 = scmp.lt.s32.totalorder %s285_s20, %s285_s20 }
  0x44   : > { %p6036_p2 = scmp.ne.s32.totalorder %s285_s20, %s6035_s15  ;;  %p6044_p6 = scmp.lt.s32.totalorder %s6035_s15, %s6035_s15 }
  0x46   : > { %p6038_p7 = pnand %p6036_p2, %p5972_p5  ;;  %p6045_p11 = por %p6044_p6, %p6043_p8 }
  0x48   : > { %p6039_p4 = pneg %p6038_p7 }
  0x4a   : > { %p6046_p9 = pnand %p6045_p11, %p6039_p4 }
  0x4c   : > { %6049 = shalt.err (!%p6046_p9)
}
  0x4d   : > { %5886 = dma.hbm_to_vmem [thread:$0]  (!%p6317_p1), %s7020_s5, 18432, %s285_s20, [#allocation10], %s7057_s28, %s7057_s28, %s7056_s3  }
  0x4e   : > { %s4423_s17 = sshll.u32 %s6346_s14, 4  ;;  %s317_s8 = scalar_lea.hbm %s7015_s0, %s6351_s12 }
  0x4f   : > { %s305_s18 = scalar_lea.vmem [#allocation3], %s4423_s17  ;;  %s355_s15 = scalar_lea.vmem [#allocation8], %s4423_s17 }
  0x50   : > { %s318_s21 = sshll.u32 %s305_s18, 4  ;;  %s368_s16 = sshll.u32 %s355_s15, 4  ;;  %s319_s21 = int_to_ptr.vmem [resolvable:$true] %s318_s21  ;;  %s6397_s16 = int_to_ptr.vmem [resolvable:$true] %s368_s16 }
  0x51   : > { %s302_s1 = scalar_lea.sflag [#allocation4], %s6346_s14  ;;  %s6063_s26 = scalar_lea.vmem %s319_s21, 256 }
  0x52   : > { %p6064_p6 = scmp.ne.s32.totalorder %s319_s21, %s6063_s26  ;;  %p7058_p8 = pneg %p6355_p0 }
  0x53   : > { %s6201_s20 = smov [#allocation3]  }
  0x54   : > { %p6066_p5 = pnand %p6064_p6, %p7058_p8  ;;  %s6068_s7 = sshll.u32 %s6201_s20, 4  ;;  %s6069_s7 = int_to_ptr.vmem [resolvable:$false] %s6068_s7 }
  0x55   : > { %s6070_s19 = scalar_lea.vmem %s6069_s7, 512  ;;  %p6071_p1 = scmp.lt.s32.totalorder %s319_s21, %s6069_s7 }
  0x56   : > { %p6067_p4 = pneg %p6066_p5  ;;  %p6072_p13 = scmp.lt.s32.totalorder %s6070_s19, %s6063_s26 }
  0x58   : > { %p6073_p3 = por %p6072_p13, %p6071_p1 }
  0x5a   : > { %p6074_p10 = pnand %p6073_p3, %p6067_p4 }
  0x5c   : > { %6077 = shalt.err (!%p6074_p10)
}
  0x5d   : > { %5890 = dma.hbm_to_vmem [thread:$0]  (!%p6355_p0), %s317_s8, 256, %s319_s21, %s302_s1, %s7057_s28, %s7057_s28, %s7056_s3  }
  0x5e   : > { %s4457_s14 = sadd.s32 768, %s6351_s12  ;;  %s6091_s26 = scalar_lea.vmem %s6397_s16, 256 }
  0x5f   : > { %s367_s23 = scalar_lea.hbm %s7017_s2, %s4457_s14  ;;  %p6092_p2 = scmp.ne.s32.totalorder %s6397_s16, %s6091_s26 }
  0x60   : > { %p7059_p7 = pmov %p7058_p8  ;;  %s6202_s18 = smov [#allocation8]  }
  0x61   : > { %s6096_s15 = sshll.u32 %s6202_s18, 4  ;;  %s6097_s15 = int_to_ptr.vmem [resolvable:$false] %s6096_s15 }
  0x62   : > { %p6094_p11 = pnand %p6092_p2, %p7059_p7  ;;  %s6098_s20 = scalar_lea.vmem %s6097_s15, 512 }
  0x63   : > { %p6099_p6 = scmp.lt.s32.totalorder %s6397_s16, %s6097_s15  ;;  %p6100_p8 = scmp.lt.s32.totalorder %s6098_s20, %s6091_s26 }
  0x64   : > { %p6095_p9 = pneg %p6094_p11 }
  0x65   : > { %p6101_p5 = por %p6100_p8, %p6099_p6 }
  0x67   : > { %p6102_p4 = pnand %p6101_p5, %p6095_p9 }
  0x69   : > { %6105 = shalt.err (!%p6102_p4)
}
  0x6a   : > { %5896 = dma.hbm_to_vmem [thread:$0]  (!%p6355_p0), %s367_s23, 256, %s6397_s16, %s6368_s9, %s7057_s28, %s7057_s28, %s7056_s3  }
  0x6b   : > { %380 = sbr.rel (%p6308_p12) target bundleno = 1557 (0x615), region = 48  ;;  %s6428_s1 = sand.u32 (!%p6308_p12), 1, %s6178_s25  }
  0x6c   : > { %s383_s12 = scalar_lea.sflag (!%p6308_p12), [#allocation4], %s6428_s1  ;;  %p7060_p1 = scmp.ne.s32.totalorder (!%p6308_p12), %s7044_s10, 0 }
  0x70   : > { %6157 = dma.done.wait (%p7060_p1), %s383_s12, 256  }
  0x71   : > { %6159 = vsyncadd (%p7060_p1), %s383_s12, 4294967040  ;;  %s391_s24 = sand.u32 1, %s6278_s30   ;;  %s4434_s9 = sshll.u32 %s6428_s1, 6 }
  0x72   : > { %s392_s3 = scalar_lea.sflag [#allocation7], %s391_s24  ;;  %s6439_s13 = scalar_lea.vmem [#allocation6], %s4434_s9 }
  0x73   : > { %6161 = dma.done.wait (%p7060_p1), %s392_s3, 1280  }
  0x74   : > { %6163 = vsyncadd (%p7060_p1), %s392_s3, 4294966016  ;;  %p7061_p12 = scmp.eq.s32.totalorder %s6278_s30, 0 }
  0x76   : > { %6165 = dma.done.wait (%p7061_p12), [#allocation10], 36864   ;;  %p7062_p0 = pmov %p7061_p12 }
  0x77   : > { %v6203_v0 = vmov 0.0   ;;  %v669_v2 = vld [vmem:[#allocation9 + $0xf8] sm:$0xff]  ;;  %v668_v3 = vld [vmem:[#allocation9 + $0xf0] sm:$0xff]  ;;  %v667_v5 = vld [vmem:[#allocation9 + $0xe8] sm:$0xff]  ;;  %vm808_vm3 = vcmask 1040384   ;;  %vm988_vm9 = vcmask 1046528  }
  0x78   : > { %6167 = vsyncadd (%p7062_p0), [#allocation10], 4294930432  ;;  %4996 = vmatprep.mubr.f32.mxu0 %v6203_v0  ;;  %v6451_v1 = vrot.slane %v6203_v0, 7  ;;  %4964 = vmatprep.subr.mxu0 %v669_v2  ;;  %v652_v4 = vld [vmem:[#allocation9 + $0x78] sm:$0xff]  ;;  %v651_v6 = vld [vmem:[#allocation9 + $0x70] sm:$0xff]  ;;  %s6943_s26 = scalar_lea.vmem [#allocation12], %s4434_s9 }
  0x79   : > { %4965 = vmatpush3.msra.mxu0 %v669_v2  ;;  %5014 = vmatprep.subr.mxu1 %v652_v4  ;;  %v650_v7 = vld [vmem:[#allocation9 + $0x68] sm:$0xff]  ;;  %v666_v8 = vld [vmem:[#allocation9 + $0xe0] sm:$0xff]  ;;  %v665_v10 = vld [vmem:[#allocation9 + $0xd8] sm:$0xff]  ;;  %s4458_s18 = sshll.u32 %s6186_s27, 10  ;;  %s4262_s15 = sshll.u32 %s6943_s26, 4  ;;  %s6964_s15 = int_to_ptr.vmem [resolvable:$true] %s4262_s15 }
  0x7a   : > { %5046 = vmatprep.mubr.f32.mxu1 %v6451_v1  ;;  %4966 = vmatprep.subr.mxu0 %v668_v3  ;;  %v649_v9 = vld [vmem:[#allocation9 + $0x60] sm:$0xff]  ;;  %v648_v11 = vld [vmem:[#allocation9 + $0x58] sm:$0xff]  ;;  %v664_v12 = vld [vmem:[#allocation9 + $0xd0] sm:$0xff]  ;;  %s7063_s24 = sld [smem:[#allocation25_spill]]  ;;  %s4247_s27 = scalar_lea.sflag [#allocation5], %s6428_s1 }
  0x7b   : > { %5015 = vmatpush3.msra.mxu1 %v652_v4  ;;  %4967 = vmatpush3.msra.mxu0 %v668_v3  ;;  %v647_v13 = vld [vmem:[#allocation9 + $0x50] sm:$0xff]  ;;  %v663_v14 = vld [vmem:[#allocation9 + $0xc8] sm:$0xff]  ;;  %v662_v16 = vld [vmem:[#allocation9 + $0xc0] sm:$0xff]  ;;  %p7065_p3 = scmp.ne.s32.totalorder %s7045_s11, 0  ;;  %s6204_s30 = smov [#allocation12]  }
  0x7c   : > { %5016 = vmatprep.subr.mxu1 %v651_v6  ;;  %4968 = vmatprep.subr.mxu0 %v667_v5  ;;  %v646_v15 = vld [vmem:[#allocation9 + $0x48] sm:$0xff]  ;;  %v645_v17 = vld [vmem:[#allocation9 + $0x40] sm:$0xff]  ;;  %v661_v18 = vld [vmem:[#allocation9 + $0xb8] sm:$0xff]  ;;  %s6110_s10 = sshll.u32 %s6204_s30, 4  ;;  %s6111_s10 = int_to_ptr.vmem [resolvable:$false] %s6110_s10 }
  0x7d   : > { %5017 = vmatpush3.msra.mxu1 %v651_v6  ;;  %4969 = vmatpush3.msra.mxu0 %v667_v5  ;;  %v644_v19 = vld [vmem:[#allocation9 + $0x38] sm:$0xff]  ;;  %v660_v20 = vld [vmem:[#allocation9 + $0xb0] sm:$0xff]  ;;  %v659_v22 = vld [vmem:[#allocation9 + $0xa8] sm:$0xff]  ;;  %s6112_s28 = scalar_lea.vmem %s6111_s10, 2048  ;;  %p6113_p7 = scmp.lt.s32.totalorder %s6964_s15, %s6111_s10 }
  0x7e   : > { %5018 = vmatprep.subr.mxu1 %v650_v7  ;;  %4970 = vmatprep.subr.mxu0 %v666_v8  ;;  %v643_v21 = vld [vmem:[#allocation9 + $0x30] sm:$0xff]  ;;  %v642_v23 = vld [vmem:[#allocation9 + $0x28] sm:$0xff]  ;;  %v658_v24 = vld [vmem:[#allocation9 + $0xa0] sm:$0xff] }
  0x7f   : > { %5019 = vmatpush3.msra.mxu1 %v650_v7  ;;  %4971 = vmatpush3.msra.mxu0 %v666_v8  ;;  %v469_v25 = vld [vmem:[%s6439_s13] sm:$0xff]  ;;  %v657_v27 = vld [vmem:[#allocation9 + $0x98] sm:$0xff]  ;;  %v470_v30 = vld [vmem:[%s6439_s13 + $0x8] sm:$0xff] }
  0x80   : > { %5020 = vmatprep.subr.mxu1 %v649_v9  ;;  %4972 = vmatprep.subr.mxu0 %v665_v10  ;;  %v641_v26 = vld [vmem:[#allocation9 + $0x20] sm:$0xff]  ;;  %v640_v28 = vld [vmem:[#allocation9 + $0x18] sm:$0xff]  ;;  %v603_v29 = vmul.f32 0.1, %v469_v25  ;;  %v656_v31 = vld [vmem:[#allocation9 + $0x90] sm:$0xff]  ;;  %vm591_vm0 = vcmp.ge.f32.partialorder %v469_v25, 0.0  ;;  %s7064_s9 = smov %s7063_s24  ;;  %s6962_s3 = scalar_lea.hbm %s7063_s24, %s4458_s18 }
  0x81   : > { %5021 = vmatpush3.msra.mxu1 %v649_v9  ;;  %4973 = vmatpush3.msra.mxu0 %v665_v10  ;;  %v639_v32 = vld [vmem:[#allocation9 + $0x10] sm:$0xff]  ;;  %v655_v34 = vld [vmem:[#allocation9 + $0x88] sm:$0xff]  ;;  %v604_v35 = vmul.f32 0.1, %v470_v30  ;;  %vm592_vm1 = vcmp.ge.f32.partialorder %v470_v30, 0.0  ;;  %v472_v38 = vld [vmem:[%s6439_s13 + $0x18] sm:$0xff] }
  0x82   : > { %5022 = vmatprep.subr.mxu1 %v648_v11  ;;  %4974 = vmatprep.subr.mxu0 %v664_v12  ;;  %v471_v33 = vld [vmem:[%s6439_s13 + $0x10] sm:$0xff]  ;;  %v638_v36 = vld [vmem:[#allocation9 + $0x8] sm:$0xff]  ;;  %v6457_v37 = vsel %vm591_vm0, %v469_v25, %v603_v29  ;;  %v654_v39 = vld [vmem:[#allocation9 + $0x80] sm:$0xff]  ;;  %v606_v46 = vmul.f32 0.1, %v472_v38  ;;  %vm594_vm4 = vcmp.ge.f32.partialorder %v472_v38, 0.0 }
  0x83   : > { %5023 = vmatpush3.msra.mxu1 %v648_v11  ;;  %4975 = vmatpush3.msra.mxu0 %v664_v12  ;;  %v605_v40 = vmul.f32 0.1, %v471_v33  ;;  %v637_v41 = vld [vmem:[#allocation9] sm:$0xff]  ;;  %vm593_vm2 = vcmp.ge.f32.partialorder %v471_v33, 0.0  ;;  %v987_v43 = vld [vmem:[#allocation9 + $0x178] sm:$0xff]  ;;  %v814_v44 = vrot.slane %v6457_v37, 7  ;;  %v6462_v45 = vsel %vm592_vm1, %v470_v30, %v604_v35 }
  0x84   : > { %5024 = vmatprep.subr.mxu1 %v647_v13  ;;  %4976 = vmatprep.subr.mxu0 %v663_v14  ;;  %v473_v42 = vld [vmem:[%s6439_s13 + $0x20] sm:$0xff]  ;;  %v474_v47 = vld [vmem:[%s6439_s13 + $0x28] sm:$0xff]  ;;  %v986_v48 = vld [vmem:[#allocation9 + $0x170] sm:$0xff]  ;;  %v816_v51 = vrot.slane %v6462_v45, 7  ;;  %v6474_v55 = vsel %vm594_vm4, %v472_v38, %v606_v46  ;;  %v994_v29 = vrot.slane %v6462_v45, 1 }
  0x85   : > { %5025 = vmatpush3.msra.mxu1 %v647_v13  ;;  %4977 = vmatpush3.msra.mxu0 %v663_v14  ;;  %v6466_v49 = vsel %vm593_vm2, %v471_v33, %v605_v40  ;;  %v607_v50 = vmul.f32 0.1, %v473_v42  ;;  %vm595_vm5 = vcmp.ge.f32.partialorder %v473_v42, 0.0  ;;  %v475_v52 = vld [vmem:[%s6439_s13 + $0x30] sm:$0xff]  ;;  %v985_v53 = vld [vmem:[#allocation9 + $0x168] sm:$0xff]  ;;  %v815_v54 = vsel %vm808_vm3, %v6451_v1, %v814_v44  ;;  %v476_v58 = vld [vmem:[%s6439_s13 + $0x38] sm:$0xff] }
  0x86   : > { %5026 = vmatprep.subr.mxu1 %v646_v15  ;;  %4978 = vmatprep.subr.mxu0 %v662_v16  ;;  %v608_v56 = vmul.f32 0.1, %v474_v47  ;;  %v818_v57 = vrot.slane %v6466_v49, 7  ;;  %vm596_vm6 = vcmp.ge.f32.partialorder %v474_v47, 0.0  ;;  %v984_v59 = vld [vmem:[#allocation9 + $0x160] sm:$0xff]  ;;  %v817_v62 = vsel %vm808_vm3, %v814_v44, %v816_v51  ;;  %v983_v2 = vld [vmem:[#allocation9 + $0x158] sm:$0xff] }
  0x87   : > { %5027 = vmatpush3.msra.mxu1 %v646_v15  ;;  %4979 = vmatpush3.msra.mxu0 %v662_v16  ;;  %v6481_v60 = vsel %vm595_vm5, %v473_v42, %v607_v50  ;;  %v609_v61 = vmul.f32 0.1, %v475_v52  ;;  %v820_v63 = vrot.slane %v6474_v55, 7  ;;  %vm597_vm7 = vcmp.ge.f32.partialorder %v475_v52, 0.0  ;;  %v982_v7 = vld [vmem:[#allocation9 + $0x150] sm:$0xff]  ;;  %v981_v11 = vld [vmem:[#allocation9 + $0x148] sm:$0xff] }
  0x88   : > { %5028 = vmatprep.subr.mxu1 %v645_v17  ;;  %4980 = vmatprep.subr.mxu0 %v661_v18  ;;  %v6485_v3 = vsel %vm596_vm6, %v474_v47, %v608_v56  ;;  %v610_v4 = vmul.f32 0.1, %v476_v58  ;;  %v819_v5 = vsel %vm808_vm3, %v816_v51, %v818_v57  ;;  %v822_v6 = vrot.slane %v6481_v60, 7  ;;  %v980_v15 = vld [vmem:[#allocation9 + $0x140] sm:$0xff]  ;;  %v975_v25 = vld [vmem:[#allocation9 + $0x118] sm:$0xff]  ;;  %v1261_v47 = vld [vmem:[#allocation11 + $0xf0] sm:$0xff] }
  0x89   : > { %5029 = vmatpush3.msra.mxu1 %v645_v17  ;;  %4981 = vmatpush3.msra.mxu0 %v661_v18  ;;  %vm598_vm8 = vcmp.ge.f32.partialorder %v476_v58, 0.0  ;;  %v6490_v8 = vsel %vm597_vm7, %v475_v52, %v609_v61  ;;  %v821_v9 = vsel %vm808_vm3, %v818_v57, %v820_v63  ;;  %v824_v10 = vrot.slane %v6485_v3, 7  ;;  %v979_v18 = vld [vmem:[#allocation9 + $0x138] sm:$0xff]  ;;  %v972_v30 = vld [vmem:[#allocation9 + $0x100] sm:$0xff]  ;;  %v1257_v51 = vld [vmem:[#allocation11 + $0xd0] sm:$0xff] }
  0x8a   : > { %5030 = vmatprep.subr.mxu1 %v644_v19  ;;  %4982 = vmatprep.subr.mxu0 %v660_v20  ;;  %v6495_v12 = vsel %vm598_vm8, %v476_v58, %v610_v4  ;;  %v823_v13 = vsel %vm808_vm3, %v820_v63, %v822_v6  ;;  %v826_v14 = vrot.slane %v6490_v8, 7  ;;  %v998_v33 = vrot.slane %v6474_v55, 1  ;;  %v1262_v46 = vld [vmem:[#allocation11 + $0xf8] sm:$0xff]  ;;  %v1256_v52 = vld [vmem:[#allocation11 + $0xc8] sm:$0xff]  ;;  %v1253_v58 = vld [vmem:[#allocation11 + $0xb0] sm:$0xff] }
  0x8b   : > { %5031 = vmatpush3.msra.mxu1 %v644_v19  ;;  %4983 = vmatpush3.msra.mxu0 %v660_v20  ;;  %v825_v16 = vsel %vm808_vm3, %v822_v6, %v824_v10  ;;  %v828_v17 = vrot.slane %v6495_v12, 7  ;;  %v978_v20 = vld [vmem:[#allocation9 + $0x130] sm:$0xff]  ;;  %v1000_v35 = vrot.slane %v6481_v60, 1  ;;  %v1258_v50 = vld [vmem:[#allocation11 + $0xd8] sm:$0xff]  ;;  %v1243_v57 = vld [vmem:[#allocation11 + $0x68] sm:$0xff]  ;;  %vm2025_vm5 = vcmask 1042432  }
  0x8c   : > { %5032 = vmatprep.subr.mxu1 %v643_v21  ;;  %4984 = vmatprep.subr.mxu0 %v659_v22  ;;  %v827_v19 = vsel %vm808_vm3, %v824_v10, %v826_v14  ;;  %v1254_v56 = vld [vmem:[#allocation11 + $0xb8] sm:$0xff]  ;;  %v1240_v63 = vld [vmem:[#allocation11 + $0x50] sm:$0xff]  ;;  %v1238_v4 = vld [vmem:[#allocation11 + $0x40] sm:$0xff] }
  0x8d   : > { %5033 = vmatpush3.msra.mxu1 %v643_v21  ;;  %4985 = vmatpush3.msra.mxu0 %v659_v22  ;;  %v829_v21 = vsel %vm808_vm3, %v826_v14, %v828_v17  ;;  %v977_v22 = vld [vmem:[#allocation9 + $0x128] sm:$0xff]  ;;  %v1001_v40 = vsel %vm988_vm9, %v998_v33, %v1000_v35  ;;  %v1241_v61 = vld [vmem:[#allocation11 + $0x58] sm:$0xff]  ;;  %v831_v6 = vsel %vm808_vm3, %v828_v17, %v6451_v1  ;;  %v1236_v10 = vld [vmem:[#allocation11 + $0x30] sm:$0xff] }
  0x8e   : > { %5034 = vmatprep.subr.mxu1 %v642_v23  ;;  %4986 = vmatprep.subr.mxu0 %v658_v24  ;;  %v1576_v14 = vld [vmem:[#allocation11 + $0x170] sm:$0xff] }
  0x8f   : > { %5035 = vmatpush3.msra.mxu1 %v642_v23  ;;  %4987 = vmatpush3.msra.mxu0 %v658_v24  ;;  %v976_v23 = vld [vmem:[#allocation9 + $0x120] sm:$0xff]  ;;  %v6511_v24 = vrot.slane %v6203_v0, 1  ;;  %v1232_v17 = vld [vmem:[#allocation11 + $0x10] sm:$0xff] }
  0x90   : > { %5036 = vmatprep.subr.mxu1 %v641_v26  ;;  %4988 = vmatprep.subr.mxu0 %v657_v27 }
  0x91   : > { %5037 = vmatpush3.msra.mxu1 %v641_v26  ;;  %4989 = vmatpush3.msra.mxu0 %v657_v27  ;;  %v974_v26 = vld [vmem:[#allocation9 + $0x110] sm:$0xff]  ;;  %v992_v27 = vrot.slane %v6457_v37, 1 }
  0x92   : > { %5038 = vmatprep.subr.mxu1 %v640_v28  ;;  %4990 = vmatprep.subr.mxu0 %v656_v31 }
  0x93   : > { %5039 = vmatpush3.msra.mxu1 %v640_v28  ;;  %4991 = vmatpush3.msra.mxu0 %v656_v31  ;;  %v973_v28 = vld [vmem:[#allocation9 + $0x108] sm:$0xff]  ;;  %v996_v31 = vrot.slane %v6466_v49, 1 }
  0x94   : > { %5040 = vmatprep.subr.mxu1 %v639_v32  ;;  %4992 = vmatprep.subr.mxu0 %v655_v34 }
  0x95   : > { %5041 = vmatpush3.msra.mxu1 %v639_v32  ;;  %4993 = vmatpush3.msra.mxu0 %v655_v34  ;;  %v993_v32 = vsel %vm988_vm9, %v6511_v24, %v992_v27  ;;  %v995_v34 = vsel %vm988_vm9, %v992_v27, %v994_v29  ;;  %v999_v38 = vsel %vm988_vm9, %v996_v31, %v998_v33  ;;  %v1568_v27 = vld [vmem:[#allocation11 + $0x130] sm:$0xff]  ;;  %v1562_v33 = vld [vmem:[#allocation11 + $0x100] sm:$0xff] }
  0x96   : > { %5042 = vmatprep.subr.mxu1 %v638_v36  ;;  %4994 = vmatprep.subr.mxu0 %v654_v39 }
  0x97   : > { %5043 = vmatpush3.msra.mxu1 %v638_v36  ;;  %4995 = vmatpush3.msra.mxu0 %v654_v39  ;;  %v997_v36 = vsel %vm988_vm9, %v994_v29, %v996_v31  ;;  %v1004_v39 = vrot.slane %v6490_v8, 1  ;;  %v1566_v29 = vld [vmem:[#allocation11 + $0x120] sm:$0xff]  ;;  %v1564_v31 = vld [vmem:[#allocation11 + $0x110] sm:$0xff] }
  0x98   : > { %5044 = vmatprep.subr.mxu1 %v637_v41  ;;  %4997 = vmatmul.mubr.f32.vlgmr.msra.gmra.mxu0 %v6203_v0 }
  0x99   : > { %5064 = vmatprep.subr.mxu0 %v987_v43  ;;  %5045 = vmatpush3.msra.mxu1 %v637_v41  ;;  %v1006_v41 = vrot.slane %v6495_v12, 1 }
  0x9a   : > { %5065 = vmatpush3.msra.mxu0 %v987_v43  ;;  %5047 = vmatmul.mubr.f32.vlgmr.msra.gmra.mxu1 %v6451_v1 }
  0x9b   : > { %5066 = vmatprep.subr.mxu0 %v986_v48  ;;  %4999 = vmatprep.mubr.f32.mxu0 %v6457_v37  ;;  %v1002_v37 = vrot.slane %v6485_v3, 1  ;;  %v1007_v44 = vsel %vm988_vm9, %v1004_v39, %v1006_v41 }
  0x9c   : > { %5067 = vmatpush3.msra.mxu0 %v986_v48  ;;  %5049 = vmatprep.mubr.f32.mxu1 %v815_v54  ;;  %v1260_v48 = vld [vmem:[#allocation11 + $0xe8] sm:$0xff]  ;;  %v1255_v54 = vld [vmem:[#allocation11 + $0xc0] sm:$0xff] }
  0x9d   : > { %5068 = vmatprep.subr.mxu0 %v985_v53  ;;  %5000 = vmatmul.mubr.f32.gmra.mxu0 %v6462_v45  ;;  %v1003_v42 = vsel %vm988_vm9, %v1000_v35, %v1002_v37  ;;  %v1005_v43 = vsel %vm988_vm9, %v1002_v37, %v1004_v39  ;;  %v1009_v45 = vsel %vm988_vm9, %v1006_v41, %v6511_v24  ;;  %v1886_v35 = vld [vmem:[#allocation9 + $0x270] sm:$0xff]  ;;  %v1884_v37 = vld [vmem:[#allocation9 + $0x260] sm:$0xff] }
  0x9e   : > { %5069 = vmatpush3.msra.mxu0 %v985_v53  ;;  %5050 = vmatmul.mubr.f32.gmra.mxu1 %v817_v62  ;;  %v1245_v53 = vld [vmem:[#allocation11 + $0x78] sm:$0xff]  ;;  %v1251_v62 = vld [vmem:[#allocation11 + $0xa0] sm:$0xff] }
  0x9f   : > { %5070 = vmatprep.subr.mxu0 %v984_v59  ;;  %5002 = vmatprep.mubr.f32.mxu0 %v6466_v49  ;;  %v1259_v49 = vld [vmem:[#allocation11 + $0xe0] sm:$0xff] }
  0xa0   : > { %5071 = vmatpush3.msra.mxu0 %v984_v59  ;;  %5052 = vmatprep.mubr.f32.mxu1 %v819_v5  ;;  %v1242_v59 = vld [vmem:[#allocation11 + $0x60] sm:$0xff]  ;;  %v1249_v5 = vld [vmem:[#allocation11 + $0x90] sm:$0xff] }
  0xa1   : > { %5072 = vmatprep.subr.mxu0 %v983_v2  ;;  %5003 = vmatmul.mubr.f32.gmra.mxu0 %v6474_v55  ;;  %v1244_v55 = vld [vmem:[#allocation11 + $0x70] sm:$0xff] }
  0xa2   : > { %5073 = vmatpush3.msra.mxu0 %v983_v2  ;;  %5053 = vmatmul.mubr.f32.gmra.mxu1 %v821_v9  ;;  %v1250_v2 = vld [vmem:[#allocation11 + $0x98] sm:$0xff]  ;;  %v1247_v9 = vld [vmem:[#allocation11 + $0x80] sm:$0xff] }
  0xa3   : > { %5074 = vmatprep.subr.mxu0 %v982_v7  ;;  %5005 = vmatprep.mubr.f32.mxu0 %v6481_v60  ;;  %v1252_v60 = vld [vmem:[#allocation11 + $0xa8] sm:$0xff] }
  0xa4   : > { %5075 = vmatpush3.msra.mxu0 %v982_v7  ;;  %5055 = vmatprep.mubr.f32.mxu1 %v823_v13  ;;  %v1248_v7 = vld [vmem:[#allocation11 + $0x88] sm:$0xff]  ;;  %v1234_v13 = vld [vmem:[#allocation11 + $0x20] sm:$0xff] }
  0xa5   : > { %5076 = vmatprep.subr.mxu0 %v981_v11  ;;  %5006 = vmatmul.mubr.f32.gmra.mxu0 %v6485_v3  ;;  %v1239_v3 = vld [vmem:[#allocation11 + $0x48] sm:$0xff] }
  0xa6   : > { %5077 = vmatpush3.msra.mxu0 %v981_v11  ;;  %5056 = vmatmul.mubr.f32.gmra.mxu1 %v825_v16  ;;  %v1235_v11 = vld [vmem:[#allocation11 + $0x28] sm:$0xff] }
  0xa7   : > { %5078 = vmatprep.subr.mxu0 %v980_v15  ;;  %5008 = vmatprep.mubr.f32.mxu0 %v6490_v8  ;;  %v1237_v8 = vld [vmem:[#allocation11 + $0x38] sm:$0xff]  ;;  %v1575_v16 = vld [vmem:[#allocation11 + $0x168] sm:$0xff] }
  0xa8   : > { %5079 = vmatpush3.msra.mxu0 %v980_v15  ;;  %5058 = vmatprep.mubr.f32.mxu1 %v827_v19  ;;  %v1233_v15 = vld [vmem:[#allocation11 + $0x18] sm:$0xff]  ;;  %v1231_v19 = vld [vmem:[#allocation11 + $0x8] sm:$0xff] }
  0xa9   : > { %5080 = vmatprep.subr.mxu0 %v979_v18  ;;  %5009 = vmatmul.mubr.f32.gmra.mxu0 %v6495_v12  ;;  %v1577_v12 = vld [vmem:[#allocation11 + $0x178] sm:$0xff] }
  0xaa   : > { %5081 = vmatpush3.msra.mxu0 %v979_v18  ;;  %5059 = vmatmul.mubr.f32.gmra.mxu1 %v829_v21  ;;  %v1574_v18 = vld [vmem:[#allocation11 + $0x160] sm:$0xff] }
  0xab   : > { %5082 = vmatprep.subr.mxu0 %v978_v20  ;;  %5011 = vmatprep.mubr.f32.mxu0 %v6203_v0  ;;  %v1230_v21 = vld [vmem:[#allocation11] sm:$0xff] }
  0xac   : > { %5083 = vmatpush3.msra.mxu0 %v978_v20  ;;  %5114 = vmatprep.subr.mxu1 %v1262_v46  ;;  %v1573_v20 = vld [vmem:[#allocation11 + $0x158] sm:$0xff] }
  0xad   : > { %5084 = vmatprep.subr.mxu0 %v977_v22  ;;  %5012 = vmatmul.mubr.f32.gmra.mxu0 %v6203_v0 }
  0xae   : > { %5085 = vmatpush3.msra.mxu0 %v977_v22  ;;  %5096 = vmatprep.mubr.f32.mxu0 %v6511_v24  ;;  %v1572_v22 = vld [vmem:[#allocation11 + $0x150] sm:$0xff] }
  0xaf   : > { %5086 = vmatprep.subr.mxu0 %v976_v23  ;;  %5115 = vmatpush3.msra.mxu1 %v1262_v46 }
  0xb0   : > { %5087 = vmatpush3.msra.mxu0 %v976_v23  ;;  %5116 = vmatprep.subr.mxu1 %v1261_v47  ;;  %v1571_v23 = vld [vmem:[#allocation11 + $0x148] sm:$0xff] }
  0xb1   : > { %5088 = vmatprep.subr.mxu0 %v975_v25  ;;  %5117 = vmatpush3.msra.mxu1 %v1261_v47 }
  0xb2   : > { %5089 = vmatpush3.msra.mxu0 %v975_v25  ;;  %5118 = vmatprep.subr.mxu1 %v1260_v48  ;;  %v1570_v25 = vld [vmem:[#allocation11 + $0x140] sm:$0xff] }
  0xb3   : > { %5090 = vmatprep.subr.mxu0 %v974_v26  ;;  %5119 = vmatpush3.msra.mxu1 %v1260_v48 }
  0xb4   : > { %5091 = vmatpush3.msra.mxu0 %v974_v26  ;;  %5120 = vmatprep.subr.mxu1 %v1259_v49  ;;  %v1569_v26 = vld [vmem:[#allocation11 + $0x138] sm:$0xff] }
  0xb5   : > { %5092 = vmatprep.subr.mxu0 %v973_v28  ;;  %5121 = vmatpush3.msra.mxu1 %v1259_v49 }
  0xb6   : > { %5093 = vmatpush3.msra.mxu0 %v973_v28  ;;  %5122 = vmatprep.subr.mxu1 %v1258_v50  ;;  %v1567_v28 = vld [vmem:[#allocation11 + $0x128] sm:$0xff] }
  0xb7   : > { %5094 = vmatprep.subr.mxu0 %v972_v30  ;;  %5123 = vmatpush3.msra.mxu1 %v1258_v50 }
  0xb8   : > { %5095 = vmatpush3.msra.mxu0 %v972_v30  ;;  %5124 = vmatprep.subr.mxu1 %v1257_v51  ;;  %v1565_v30 = vld [vmem:[#allocation11 + $0x118] sm:$0xff] }
  0xb9   : > { %5097 = vmatmul.mubr.f32.vlgmr.msra.gmra.mxu0 %v993_v32  ;;  %5125 = vmatpush3.msra.mxu1 %v1257_v51  ;;  %v1563_v32 = vld [vmem:[#allocation11 + $0x108] sm:$0xff] }
  0xba   : > { %5099 = vmatprep.mubr.f32.mxu0 %v995_v34  ;;  %5164 = vmatprep.subr.mxu0 %v1245_v53  ;;  %v1887_v34 = vld [vmem:[#allocation9 + $0x278] sm:$0xff] }
  0xbb   : > { %5126 = vmatprep.subr.mxu1 %v1256_v52  ;;  %5165 = vmatpush3.msra.mxu0 %v1245_v53 }
  0xbc   : > { %5127 = vmatpush3.msra.mxu1 %v1256_v52  ;;  %5166 = vmatprep.subr.mxu0 %v1244_v55 }
  0xbd   : > { %5100 = vmatmul.mubr.f32.gmra.mxu0 %v997_v36  ;;  %5128 = vmatprep.subr.mxu1 %v1255_v54  ;;  %v1885_v36 = vld [vmem:[#allocation9 + $0x268] sm:$0xff] }
  0xbe   : > { %5102 = vmatprep.mubr.f32.mxu0 %v999_v38  ;;  %5167 = vmatpush3.msra.mxu0 %v1244_v55 }
  0xbf   : > { %5129 = vmatpush3.msra.mxu1 %v1255_v54  ;;  %5168 = vmatprep.subr.mxu0 %v1243_v57 }
  0xc0   : > { %5130 = vmatprep.subr.mxu1 %v1254_v56  ;;  %5169 = vmatpush3.msra.mxu0 %v1243_v57 }
  0xc1   : > { %5103 = vmatmul.mubr.f32.gmra.mxu0 %v1001_v40  ;;  %5131 = vmatpush3.msra.mxu1 %v1254_v56 }
  0xc2   : > { %5105 = vmatprep.mubr.f32.mxu0 %v1003_v42  ;;  %5170 = vmatprep.subr.mxu0 %v1242_v59 }
  0xc3   : > { %5132 = vmatprep.subr.mxu1 %v1253_v58  ;;  %5171 = vmatpush3.msra.mxu0 %v1242_v59 }
  0xc4   : > { %5133 = vmatpush3.msra.mxu1 %v1253_v58  ;;  %5172 = vmatprep.subr.mxu0 %v1241_v61 }
  0xc5   : > { %5106 = vmatmul.mubr.f32.gmra.mxu0 %v1005_v43  ;;  %5134 = vmatprep.subr.mxu1 %v1252_v60 }
  0xc6   : > { %5108 = vmatprep.mubr.f32.mxu0 %v1007_v44  ;;  %5173 = vmatpush3.msra.mxu0 %v1241_v61  ;;  %v6549_v61 = vld [vmem:[%s7019_s4] ss:$0 sm:$0xff] }
  0xc7   : > { %5135 = vmatpush3.msra.mxu1 %v1252_v60  ;;  %5174 = vmatprep.subr.mxu0 %v1240_v63 }
  0xc8   : > { %5136 = vmatprep.subr.mxu1 %v1251_v62  ;;  %5175 = vmatpush3.msra.mxu0 %v1240_v63 }
  0xc9   : > { %5109 = vmatmul.mubr.f32.gmra.mxu0 %v1009_v45  ;;  %5137 = vmatpush3.msra.mxu1 %v1251_v62 }
  0xca   : > { %5111 = vmatprep.mubr.f32.mxu0 %v6511_v24  ;;  %5176 = vmatprep.subr.mxu0 %v1239_v3 }
  0xcb   : > { %5138 = vmatprep.subr.mxu1 %v1250_v2  ;;  %5177 = vmatpush3.msra.mxu0 %v1239_v3 }
  0xcc   : > { %5139 = vmatpush3.msra.mxu1 %v1250_v2  ;;  %5178 = vmatprep.subr.mxu0 %v1238_v4 }
  0xcd   : > { %5112 = vmatmul.mubr.f32.gmra.mxu0 %v6511_v24  ;;  %5140 = vmatprep.subr.mxu1 %v1249_v5 }
  0xce   : > { %5196 = vmatprep.mubr.f32.mxu0 %v6451_v1  ;;  %5061 = vmatprep.mubr.f32.mxu1 %v831_v6 }
  0xcf   : > { %5141 = vmatpush3.msra.mxu1 %v1249_v5  ;;  %5179 = vmatpush3.msra.mxu0 %v1238_v4 }
  0xd0   : > { %5062 = vmatmul.mubr.f32.gmra.mxu1 %v6451_v1  ;;  %5142 = vmatprep.subr.mxu1 %v1248_v7 }
  0xd1   : > { %5180 = vmatprep.subr.mxu0 %v1237_v8  ;;  %5143 = vmatpush3.msra.mxu1 %v1248_v7 }
  0xd2   : > { %5181 = vmatpush3.msra.mxu0 %v1237_v8  ;;  %5144 = vmatprep.subr.mxu1 %v1247_v9 }
  0xd3   : > { %5182 = vmatprep.subr.mxu0 %v1236_v10  ;;  %5145 = vmatpush3.msra.mxu1 %v1247_v9 }
  0xd4   : > { %5146 = vmatprep.mubr.f32.mxu1 %v6203_v0  ;;  %5183 = vmatpush3.msra.mxu0 %v1236_v10 }
  0xd5   : > { %5147 = vmatmul.mubr.f32.vlgmr.msra.gmra.mxu1 %v6203_v0  ;;  %5184 = vmatprep.subr.mxu0 %v1235_v11 }
  0xd6   : > { %5185 = vmatpush3.msra.mxu0 %v1235_v11  ;;  %5214 = vmatprep.subr.mxu1 %v1577_v12 }
  0xd7   : > { %5186 = vmatprep.subr.mxu0 %v1234_v13  ;;  %5215 = vmatpush3.msra.mxu1 %v1577_v12 }
  0xd8   : > { %5187 = vmatpush3.msra.mxu0 %v1234_v13  ;;  %5216 = vmatprep.subr.mxu1 %v1576_v14 }
  0xd9   : > { %5188 = vmatprep.subr.mxu0 %v1233_v15  ;;  %5217 = vmatpush3.msra.mxu1 %v1576_v14 }
  0xda   : > { %5189 = vmatpush3.msra.mxu0 %v1233_v15  ;;  %5218 = vmatprep.subr.mxu1 %v1575_v16 }
  0xdb   : > { %5190 = vmatprep.subr.mxu0 %v1232_v17  ;;  %5219 = vmatpush3.msra.mxu1 %v1575_v16 }
  0xdc   : > { %5191 = vmatpush3.msra.mxu0 %v1232_v17  ;;  %5220 = vmatprep.subr.mxu1 %v1574_v18 }
  0xdd   : > { %5192 = vmatprep.subr.mxu0 %v1231_v19  ;;  %5221 = vmatpush3.msra.mxu1 %v1574_v18 }
  0xde   : > { %5193 = vmatpush3.msra.mxu0 %v1231_v19  ;;  %5222 = vmatprep.subr.mxu1 %v1573_v20 }
  0xdf   : > { %5194 = vmatprep.subr.mxu0 %v1230_v21  ;;  %5223 = vmatpush3.msra.mxu1 %v1573_v20 }
  0xe0   : > { %5195 = vmatpush3.msra.mxu0 %v1230_v21  ;;  %5224 = vmatprep.subr.mxu1 %v1572_v22 }
  0xe1   : > { %5197 = vmatmul.mubr.f32.vlgmr.msra.gmra.mxu0 %v6451_v1  ;;  %5225 = vmatpush3.msra.mxu1 %v1572_v22 }
  0xe2   : > { %5226 = vmatprep.subr.mxu1 %v1571_v23  ;;  %5264 = vmatprep.subr.mxu0 %v1887_v34 }
  0xe3   : > { %5227 = vmatpush3.msra.mxu1 %v1571_v23  ;;  %5265 = vmatpush3.msra.mxu0 %v1887_v34 }
  0xe4   : > { %5228 = vmatprep.subr.mxu1 %v1570_v25  ;;  %5266 = vmatprep.subr.mxu0 %v1886_v35 }
  0xe5   : > { %5229 = vmatpush3.msra.mxu1 %v1570_v25  ;;  %5267 = vmatpush3.msra.mxu0 %v1886_v35 }
  0xe6   : > { %5230 = vmatprep.subr.mxu1 %v1569_v26  ;;  %5268 = vmatprep.subr.mxu0 %v1885_v36 }
  0xe7   : > { %5231 = vmatpush3.msra.mxu1 %v1569_v26  ;;  %5269 = vmatpush3.msra.mxu0 %v1885_v36 }
  0xe8   : > { %5232 = vmatprep.subr.mxu1 %v1568_v27  ;;  %5270 = vmatprep.subr.mxu0 %v1884_v37 }
  0xe9   : > { %5233 = vmatpush3.msra.mxu1 %v1568_v27  ;;  %5271 = vmatpush3.msra.mxu0 %v1884_v37 }
  0xea   : > { %5234 = vmatprep.subr.mxu1 %v1567_v28 }
  0xeb   : > { %5235 = vmatpush3.msra.mxu1 %v1567_v28 }
  0xec   : > { %5236 = vmatprep.subr.mxu1 %v1566_v29 }
  0xed   : > { %5237 = vmatpush3.msra.mxu1 %v1566_v29 }
  0xee   : > { %5238 = vmatprep.subr.mxu1 %v1565_v30 }
  0xef   : > { %5239 = vmatpush3.msra.mxu1 %v1565_v30 }
  0xf0   : > { %5240 = vmatprep.subr.mxu1 %v1564_v31 }
  0xf1   : > { %5241 = vmatpush3.msra.mxu1 %v1564_v31 }
  0xf2   : > { %5242 = vmatprep.subr.mxu1 %v1563_v32 }
  0xf3   : > { %5243 = vmatpush3.msra.mxu1 %v1563_v32 }
  0xf4   : > { %5244 = vmatprep.subr.mxu1 %v1562_v33 }
  0xf5   : > { %5245 = vmatpush3.msra.mxu1 %v1562_v33 }
 0x158   : > { %v4998_v38 = vpop.f32.mrf.mxu0 }
 0x15a   : > { %v736_v39 = vpop.f32.mrf.mxu0  ;;  %v5048_v40 = vpop.f32.mrf.mxu1 }
 0x15c   : > { %v912_v41 = vpop.f32.mrf.mxu1 }
 0x15d   : > { %v5001_v42 = vpop.f32.mrf.mxu0 }
 0x15e   : > { %v5051_v48 = vpop.f32.mrf.mxu1 }
 0x15f   : > { %v746_v43 = vpop.f32.mrf.mxu0  ;;  %v928_v59 = vadd.f32 %v5051_v48, %v5001_v42 }
 0x160   : > { %v922_v51 = vpop.f32.mrf.mxu1 }
 0x161   : > { %v5004_v44 = vpop.f32.mrf.mxu0  ;;  %v923_v62 = vadd.f32 %v922_v51, %v746_v43 }
 0x162   : > { %v5054_v54 = vpop.f32.mrf.mxu1 }
 0x163   : > { %v756_v45 = vpop.f32.mrf.mxu0  ;;  %v938_v4 = vadd.f32 %v5054_v54, %v5004_v44 }
 0x164   : > { %v932_v55 = vpop.f32.mrf.mxu1 }
 0x165   : > { %v5007_v46 = vpop.f32.mrf.mxu0  ;;  %v933_v7 = vadd.f32 %v932_v55, %v756_v45 }
 0x166   : > { %v5057_v57 = vpop.f32.mrf.mxu1 }
 0x167   : > { %v766_v47 = vpop.f32.mrf.mxu0  ;;  %v948_v13 = vadd.f32 %v5057_v57, %v5007_v46 }
 0x168   : > { %v942_v63 = vpop.f32.mrf.mxu1 }
 0x169   : > { %v5010_v49 = vpop.f32.mrf.mxu0  ;;  %v943_v20 = vadd.f32 %v942_v63, %v766_v47 }
 0x16a   : > { %v5060_v9 = vpop.f32.mrf.mxu1 }
 0x16b   : > { %v776_v50 = vpop.f32.mrf.mxu0  ;;  %v958_v26 = vadd.f32 %v5060_v9, %v5010_v49 }
 0x16c   : > { %v952_v21 = vpop.f32.mrf.mxu1 }
 0x16d   : > { %v5013_v52 = vpop.f32.mrf.mxu0  ;;  %v953_v33 = vadd.f32 %v952_v21, %v776_v50 }
 0x16f   : > { %v786_v53 = vpop.f32.mrf.mxu0 }
 0x179   : > { %v5098_v56 = vpop.f32.mrf.mxu0 }
 0x17b   : > { %v1092_v58 = vpop.f32.mrf.mxu0 }
 0x17d   : > { %v5101_v60 = vpop.f32.mrf.mxu0 }
 0x17e   : > { %v1154_v2 = vadd.f32 %v5101_v60, %v928_v59 }
 0x17f   : > { %v1102_v3 = vpop.f32.mrf.mxu0 }
 0x180   : > { %v1173_v5 = vadd.f32 %v6549_v61, %v1154_v2  ;;  %v1153_v6 = vadd.f32 %v1102_v3, %v923_v62 }
 0x181   : > { %v5104_v8 = vpop.f32.mrf.mxu0 }
 0x182   : > { %v1172_v10 = vadd.f32 %v6549_v61, %v1153_v6  ;;  %v1156_v11 = vadd.f32 %v5104_v8, %v938_v4  ;;  %vm1185_vm10 = vcmp.ge.f32.partialorder %v1173_v5, 0.0  ;;  %v1197_v12 = vmul.f32 0.1, %v1173_v5 }
 0x183   : > { %v1112_v14 = vpop.f32.mrf.mxu0 }
 0x184   : > { %v1175_v15 = vadd.f32 %v6549_v61, %v1156_v11  ;;  %v1155_v16 = vadd.f32 %v1112_v14, %v933_v7  ;;  %vm1184_vm11 = vcmp.ge.f32.partialorder %v1172_v10, 0.0  ;;  %v1196_v17 = vmul.f32 0.1, %v1172_v10 }
 0x185   : > { %v5107_v18 = vpop.f32.mrf.mxu0  ;;  %v6554_v19 = vsel %vm1185_vm10, %v1173_v5, %v1197_v12 }
 0x186   : > { %v1174_v22 = vadd.f32 %v6549_v61, %v1155_v16  ;;  %v1158_v23 = vadd.f32 %v5107_v18, %v948_v13  ;;  %v6557_v25 = vsel %vm1184_vm11, %v1172_v10, %v1196_v17  ;;  %v1406_v29 = vrot.slane %v6554_v19, 7 }
 0x187   : > { %v1122_v27 = vpop.f32.mrf.mxu0  ;;  %5149 = vmatprep.mubr.f32.mxu1 %v6557_v25  ;;  %v1404_v28 = vrot.slane %v6557_v25, 7  ;;  %vm1187_vm12 = vcmp.ge.f32.partialorder %v1175_v15, 0.0  ;;  %v1199_v37 = vmul.f32 0.1, %v1175_v15  ;;  %v1581_v6 = vrot.slane %v6557_v25, 1 }
 0x188   : > { %v1177_v30 = vadd.f32 %v6549_v61, %v1158_v23  ;;  %v1157_v31 = vadd.f32 %v1122_v27, %v943_v20  ;;  %5150 = vmatmul.mubr.f32.gmra.mxu1 %v6554_v19  ;;  %vm1186_vm13 = vcmp.ge.f32.partialorder %v1174_v22, 0.0  ;;  %v1198_v32 = vmul.f32 0.1, %v1174_v22 }
 0x189   : > { %v5110_v34 = vpop.f32.mrf.mxu0  ;;  %v1405_v35 = vsel %vm808_vm3, %v6451_v1, %v1404_v28  ;;  %v1407_v36 = vsel %vm808_vm3, %v1404_v28, %v1406_v29  ;;  %v6573_v43 = vsel %vm1187_vm12, %v1175_v15, %v1199_v37  ;;  %v1583_v8 = vrot.slane %v6554_v19, 1  ;;  %v1879_v37 = vld [vmem:[#allocation9 + $0x238] sm:$0xff] }
 0x18a   : > { %v1176_v38 = vadd.f32 %v6549_v61, %v1157_v31  ;;  %v1160_v39 = vadd.f32 %v5110_v34, %v958_v26  ;;  %5199 = vmatprep.mubr.f32.mxu0 %v1405_v35  ;;  %v6568_v40 = vsel %vm1186_vm13, %v1174_v22, %v1198_v32  ;;  %vm1189_vm14 = vcmp.ge.f32.partialorder %v1177_v30, 0.0  ;;  %v1882_v32 = vld [vmem:[#allocation9 + $0x250] sm:$0xff]  ;;  %v1870_v34 = vld [vmem:[#allocation9 + $0x1f8] sm:$0xff]  ;;  %v1880_v35 = vld [vmem:[#allocation9 + $0x240] sm:$0xff] }
 0x18b   : > { %v1132_v41 = vpop.f32.mrf.mxu0  ;;  %5152 = vmatprep.mubr.f32.mxu1 %v6568_v40  ;;  %v1408_v42 = vrot.slane %v6568_v40, 7  ;;  %5200 = vmatmul.mubr.f32.gmra.mxu0 %v1407_v36  ;;  %v1201_v44 = vmul.f32 0.1, %v1177_v30  ;;  %v1410_v47 = vrot.slane %v6573_v43, 7  ;;  %v1585_v9 = vrot.slane %v6568_v40, 1  ;;  %v1869_v36 = vld [vmem:[#allocation9 + $0x1f0] sm:$0xff] }
 0x18c   : > { %v1179_v45 = vadd.f32 %v6549_v61, %v1160_v39  ;;  %v1159_v46 = vadd.f32 %v1132_v41, %v953_v33  ;;  %5153 = vmatmul.mubr.f32.gmra.mxu1 %v6573_v43  ;;  %vm1188_vm15 = vcmp.ge.f32.partialorder %v1176_v38, 0.0  ;;  %v1200_v49 = vmul.f32 0.1, %v1176_v38  ;;  %v1881_v33 = vld [vmem:[#allocation9 + $0x248] sm:$0xff]  ;;  %5314 = vmatprep.subr.mxu1 %v1870_v34  ;;  %v1878_v39 = vld [vmem:[#allocation9 + $0x230] sm:$0xff]  ;;  %v1867_v40 = vld [vmem:[#allocation9 + $0x1e0] sm:$0xff] }
 0x18d   : > { %v1409_v48 = vsel %vm808_vm3, %v1406_v29, %v1408_v42  ;;  %v1213_v50 = vsel %vm1189_vm14, %v1177_v30, %v1201_v44  ;;  %v5113_v51 = vpop.f32.mrf.mxu0  ;;  %v1411_v53 = vsel %vm808_vm3, %v1408_v42, %v1410_v47  ;;  %v1582_v10 = vsel %vm988_vm9, %v6511_v24, %v1581_v6  ;;  %v1883_v30 = vld [vmem:[#allocation9 + $0x258] sm:$0xff]  ;;  %v1877_v41 = vld [vmem:[#allocation9 + $0x228] sm:$0xff]  ;;  %v1865_v44 = vld [vmem:[#allocation9 + $0x1d0] sm:$0xff] }
 0x18e   : > { %v1178_v52 = vadd.f32 %v6549_v61, %v1159_v46  ;;  %5202 = vmatprep.mubr.f32.mxu0 %v1409_v48  ;;  %v1212_v54 = vsel %vm1188_vm15, %v1176_v38, %v1200_v49  ;;  %vm1191_vm0 = vcmp.ge.f32.partialorder %v1179_v45, 0.0  ;;  %v1203_v55 = vmul.f32 0.1, %v1179_v45  ;;  %5272 = vmatprep.subr.mxu0 %v1883_v30  ;;  %v1868_v38 = vld [vmem:[#allocation9 + $0x1e8] sm:$0xff]  ;;  %v1866_v42 = vld [vmem:[#allocation9 + $0x1d8] sm:$0xff]  ;;  %v1863_v48 = vld [vmem:[#allocation9 + $0x1c0] sm:$0xff] }
 0x18f   : > { %5203 = vmatmul.mubr.f32.gmra.mxu0 %v1411_v53  ;;  %v1142_v56 = vpop.f32.mrf.mxu0  ;;  %5155 = vmatprep.mubr.f32.mxu1 %v1212_v54  ;;  %v1412_v57 = vrot.slane %v1212_v54, 7  ;;  %v1414_v58 = vrot.slane %v1213_v50, 7  ;;  %v1584_v11 = vsel %vm988_vm9, %v1581_v6, %v1583_v8  ;;  %v1587_v12 = vrot.slane %v6573_v43, 1  ;;  %v1876_v43 = vld [vmem:[#allocation9 + $0x220] sm:$0xff]  ;;  %v1864_v46 = vld [vmem:[#allocation9 + $0x1c8] sm:$0xff]  ;;  %v2196_v6 = vld [vmem:[#allocation9 + $0x2b8] sm:$0xff] }
 0x190   : > { %vm1190_vm1 = vcmp.ge.f32.partialorder %v1178_v52, 0.0  ;;  %v1202_v59 = vmul.f32 0.1, %v1178_v52  ;;  %5156 = vmatmul.mubr.f32.gmra.mxu1 %v1213_v50  ;;  %v1215_v60 = vsel %vm1191_vm0, %v1179_v45, %v1203_v55  ;;  %v1589_v13 = vrot.slane %v1212_v54, 1  ;;  %v5063_v25 = vpop.f32.mrf.mxu1  ;;  %5273 = vmatpush3.msra.mxu0 %v1883_v30  ;;  %v1875_v45 = vld [vmem:[#allocation9 + $0x218] sm:$0xff]  ;;  %v1873_v49 = vld [vmem:[#allocation9 + $0x208] sm:$0xff] }
 0x191   : > { %v1413_v62 = vsel %vm808_vm3, %v1410_v47, %v1412_v57  ;;  %v1415_v61 = vsel %vm808_vm3, %v1412_v57, %v1414_v58  ;;  %v1418_v3 = vrot.slane %v1215_v60, 7  ;;  %v1586_v14 = vsel %vm988_vm9, %v1583_v8, %v1585_v9  ;;  %5274 = vmatprep.subr.mxu0 %v1882_v32  ;;  %v1874_v47 = vld [vmem:[#allocation9 + $0x210] sm:$0xff]  ;;  %v1872_v51 = vld [vmem:[#allocation9 + $0x200] sm:$0xff]  ;;  %v1860_v53 = vld [vmem:[#allocation9 + $0x1a8] sm:$0xff] }
 0x192   : > { %v1214_v63 = vsel %vm1190_vm1, %v1178_v52, %v1202_v59  ;;  %5205 = vmatprep.mubr.f32.mxu0 %v1413_v62  ;;  %v1588_v15 = vsel %vm988_vm9, %v1585_v9, %v1587_v12  ;;  %v1591_v16 = vrot.slane %v1213_v50, 1  ;;  %v1590_v18 = vsel %vm988_vm9, %v1587_v12, %v1589_v13  ;;  %v962_v26 = vpop.f32.mrf.mxu1  ;;  %5275 = vmatpush3.msra.mxu0 %v1882_v32  ;;  %v1862_v50 = vld [vmem:[#allocation9 + $0x1b8] sm:$0xff]  ;;  %v1861_v52 = vld [vmem:[#allocation9 + $0x1b0] sm:$0xff]  ;;  %v1859_v55 = vld [vmem:[#allocation9 + $0x1a0] sm:$0xff] }
 0x193   : > { %5158 = vmatprep.mubr.f32.mxu1 %v1214_v63  ;;  %v1416_v2 = vrot.slane %v1214_v63, 7  ;;  %5206 = vmatmul.mubr.f32.gmra.mxu0 %v1415_v61  ;;  %v1421_v7 = vsel %vm808_vm3, %v1418_v3, %v6451_v1  ;;  %v1593_v17 = vrot.slane %v1214_v63, 1  ;;  %v1595_v20 = vrot.slane %v1215_v60, 1  ;;  %v2204_v54 = vld [vmem:[#allocation9 + $0x2f8] sm:$0xff]  ;;  %v2203_v56 = vld [vmem:[#allocation9 + $0x2f0] sm:$0xff]  ;;  %v1856_v62 = vld [vmem:[#allocation9 + $0x188] sm:$0xff] }
 0x194   : > { %5159 = vmatmul.mubr.f32.gmra.mxu1 %v1215_v60  ;;  %v1592_v19 = vsel %vm988_vm9, %v1589_v13, %v1591_v16  ;;  %5276 = vmatprep.subr.mxu0 %v1881_v33  ;;  %v1858_v57 = vld [vmem:[#allocation9 + $0x198] sm:$0xff]  ;;  %v1857_v59 = vld [vmem:[#allocation9 + $0x190] sm:$0xff]  ;;  %v2201_v60 = vld [vmem:[#allocation9 + $0x2e0] sm:$0xff]  ;;  %vm2205_vm13 = vcmask 1044480  }
 0x195   : > { %v1417_v4 = vsel %vm808_vm3, %v1414_v58, %v1416_v2  ;;  %v1419_v5 = vsel %vm808_vm3, %v1416_v2, %v1418_v3  ;;  %5161 = vmatprep.mubr.f32.mxu1 %v6203_v0  ;;  %v1594_v21 = vsel %vm988_vm9, %v1591_v16, %v1593_v17  ;;  %v1596_v22 = vsel %vm988_vm9, %v1593_v17, %v1595_v20  ;;  %v5148_v27 = vpop.f32.mrf.mxu1  ;;  %v2202_v58 = vld [vmem:[#allocation9 + $0x2e8] sm:$0xff]  ;;  %v2200_v63 = vld [vmem:[#allocation9 + $0x2d8] sm:$0xff]  ;;  %v1855_v61 = vld [vmem:[#allocation9 + $0x180] sm:$0xff] }
 0x196   : > { %5208 = vmatprep.mubr.f32.mxu0 %v1417_v4  ;;  %v1598_v23 = vsel %vm988_vm9, %v1595_v20, %v6511_v24  ;;  %5277 = vmatpush3.msra.mxu0 %v1881_v33  ;;  %v6611_v2 = vrot.slane %v6203_v0, 5  ;;  %v2199_v3 = vld [vmem:[#allocation9 + $0x2d0] sm:$0xff]  ;;  %v2198_v4 = vld [vmem:[#allocation9 + $0x2c8] sm:$0xff]  ;;  %v2193_v9 = vld [vmem:[#allocation9 + $0x2a0] sm:$0xff] }
 0x197   : > { %5209 = vmatmul.mubr.f32.gmra.mxu0 %v1419_v5  ;;  %v1329_v28 = vpop.f32.mrf.mxu1  ;;  %5278 = vmatprep.subr.mxu0 %v1880_v35  ;;  %v2197_v5 = vld [vmem:[#allocation9 + $0x2c0] sm:$0xff]  ;;  %v2194_v8 = vld [vmem:[#allocation9 + $0x2a8] sm:$0xff] }
 0x198   : > { %5162 = vmatmul.mubr.f32.gmra.mxu1 %v6203_v0  ;;  %5211 = vmatprep.mubr.f32.mxu0 %v1421_v7  ;;  %v2195_v7 = vld [vmem:[#allocation9 + $0x2b0] sm:$0xff]  ;;  %v2190_v12 = vld [vmem:[#allocation9 + $0x288] sm:$0xff]  ;;  %v2189_v13 = vld [vmem:[#allocation9 + $0x280] sm:$0xff] }
 0x199   : > { %5246 = vmatprep.mubr.f32.mxu1 %v6511_v24  ;;  %5279 = vmatpush3.msra.mxu0 %v1880_v35  ;;  %v2479_v16 = vld [vmem:[#allocation11 + $0x268] sm:$0xff]  ;;  %v2478_v17 = vld [vmem:[#allocation11 + $0x260] sm:$0xff] }
 0x19a   : > { %5280 = vmatprep.subr.mxu0 %v1879_v37 }
 0x19b   : > { %5212 = vmatmul.mubr.f32.gmra.mxu0 %v6451_v1 }
 0x19c   : > { %5247 = vmatmul.mubr.f32.vlgmr.msra.gmra.mxu1 %v1582_v10  ;;  %5296 = vmatprep.mubr.f32.mxu0 %v6203_v0  ;;  %v2192_v10 = vld [vmem:[#allocation9 + $0x298] sm:$0xff] }
 0x19d   : > { %5249 = vmatprep.mubr.f32.mxu1 %v1584_v11  ;;  %5315 = vmatpush3.msra.mxu1 %v1870_v34  ;;  %v2191_v11 = vld [vmem:[#allocation9 + $0x290] sm:$0xff] }
 0x19e   : > { %5316 = vmatprep.subr.mxu1 %v1869_v36  ;;  %5281 = vmatpush3.msra.mxu0 %v1879_v37 }
 0x19f   : > { %5317 = vmatpush3.msra.mxu1 %v1869_v36  ;;  %5282 = vmatprep.subr.mxu0 %v1878_v39 }
 0x1a0   : > { %5250 = vmatmul.mubr.f32.gmra.mxu1 %v1586_v14  ;;  %5318 = vmatprep.subr.mxu1 %v1868_v38  ;;  %v2481_v14 = vld [vmem:[#allocation11 + $0x278] sm:$0xff] }
 0x1a1   : > { %5252 = vmatprep.mubr.f32.mxu1 %v1588_v15  ;;  %v5198_v29 = vpop.f32.mrf.mxu0  ;;  %5319 = vmatpush3.msra.mxu1 %v1868_v38  ;;  %v2480_v15 = vld [vmem:[#allocation11 + $0x270] sm:$0xff] }
 0x1a2   : > { %5320 = vmatprep.subr.mxu1 %v1867_v40  ;;  %5283 = vmatpush3.msra.mxu0 %v1878_v39 }
 0x1a3   : > { %v1502_v31 = vpop.f32.mrf.mxu0  ;;  %5321 = vmatpush3.msra.mxu1 %v1867_v40  ;;  %5284 = vmatprep.subr.mxu0 %v1877_v41 }
 0x1a4   : > { %5253 = vmatmul.mubr.f32.gmra.mxu1 %v1590_v18  ;;  %5322 = vmatprep.subr.mxu1 %v1866_v42  ;;  %v2477_v18 = vld [vmem:[#allocation11 + $0x258] sm:$0xff] }
 0x1a5   : > { %5255 = vmatprep.mubr.f32.mxu1 %v1592_v19  ;;  %5285 = vmatpush3.msra.mxu0 %v1877_v41 }
 0x1a6   : > { %5323 = vmatpush3.msra.mxu1 %v1866_v42  ;;  %5286 = vmatprep.subr.mxu0 %v1876_v43 }
 0x1a7   : > { %5324 = vmatprep.subr.mxu1 %v1865_v44  ;;  %5287 = vmatpush3.msra.mxu0 %v1876_v43 }
 0x1a8   : > { %5256 = vmatmul.mubr.f32.gmra.mxu1 %v1594_v21  ;;  %5288 = vmatprep.subr.mxu0 %v1875_v45 }
 0x1a9   : > { %5258 = vmatprep.mubr.f32.mxu1 %v1596_v22  ;;  %5325 = vmatpush3.msra.mxu1 %v1865_v44  ;;  %v6618_v44 = vld [vmem:[%s7021_s6] ss:$0 sm:$0xff] }
 0x1aa   : > { %5326 = vmatprep.subr.mxu1 %v1864_v46  ;;  %5289 = vmatpush3.msra.mxu0 %v1875_v45 }
 0x1ab   : > { %5327 = vmatpush3.msra.mxu1 %v1864_v46  ;;  %5290 = vmatprep.subr.mxu0 %v1874_v47 }
 0x1ac   : > { %5259 = vmatmul.mubr.f32.gmra.mxu1 %v1598_v23  ;;  %5328 = vmatprep.subr.mxu1 %v1863_v48 }
 0x1ad   : > { %5261 = vmatprep.mubr.f32.mxu1 %v6511_v24  ;;  %5291 = vmatpush3.msra.mxu0 %v1874_v47 }
 0x1ae   : > { %5329 = vmatpush3.msra.mxu1 %v1863_v48  ;;  %5292 = vmatprep.subr.mxu0 %v1873_v49 }
 0x1af   : > { %5330 = vmatprep.subr.mxu1 %v1862_v50  ;;  %5293 = vmatpush3.msra.mxu0 %v1873_v49 }
 0x1b0   : > { %5262 = vmatmul.mubr.f32.gmra.mxu1 %v6511_v24  ;;  %5294 = vmatprep.subr.mxu0 %v1872_v51 }
 0x1b1   : > { %5331 = vmatpush3.msra.mxu1 %v1862_v50  ;;  %5295 = vmatpush3.msra.mxu0 %v1872_v51 }
 0x1b2   : > { %5332 = vmatprep.subr.mxu1 %v1861_v52  ;;  %5297 = vmatmul.mubr.f32.vlgmr.msra.gmra.mxu0 %v6203_v0 }
 0x1b3   : > { %5333 = vmatpush3.msra.mxu1 %v1861_v52  ;;  %5364 = vmatprep.subr.mxu0 %v2204_v54 }
 0x1b4   : > { %5334 = vmatprep.subr.mxu1 %v1860_v53  ;;  %5365 = vmatpush3.msra.mxu0 %v2204_v54 }
 0x1b5   : > { %5335 = vmatpush3.msra.mxu1 %v1860_v53  ;;  %5366 = vmatprep.subr.mxu0 %v2203_v56  ;;  %v5962_v53 = vld [vmem:[%s6439_s13 + $0x8] sm:$0xff] }
 0x1b6   : > { %5336 = vmatprep.subr.mxu1 %v1859_v55  ;;  %5367 = vmatpush3.msra.mxu0 %v2203_v56 }
 0x1b7   : > { %5337 = vmatpush3.msra.mxu1 %v1859_v55  ;;  %5368 = vmatprep.subr.mxu0 %v2202_v58 }
 0x1b8   : > { %5338 = vmatprep.subr.mxu1 %v1858_v57  ;;  %5369 = vmatpush3.msra.mxu0 %v2202_v58 }
 0x1b9   : > { %5339 = vmatpush3.msra.mxu1 %v1858_v57  ;;  %5370 = vmatprep.subr.mxu0 %v2201_v60 }
 0x1ba   : > { %5340 = vmatprep.subr.mxu1 %v1857_v59  ;;  %5371 = vmatpush3.msra.mxu0 %v2201_v60 }
 0x1bb   : > { %5341 = vmatpush3.msra.mxu1 %v1857_v59  ;;  %5372 = vmatprep.subr.mxu0 %v2200_v63  ;;  %v5963_v59 = vld [vmem:[%s6439_s13] sm:$0xff] }
 0x1bc   : > { %5342 = vmatprep.subr.mxu1 %v1856_v62  ;;  %5373 = vmatpush3.msra.mxu0 %v2200_v63 }
 0x1bd   : > { %5343 = vmatpush3.msra.mxu1 %v1856_v62  ;;  %5346 = vmatprep.mubr.f32.mxu1 %v6611_v2 }
 0x1be   : > { %5344 = vmatprep.subr.mxu1 %v1855_v61  ;;  %5374 = vmatprep.subr.mxu0 %v2199_v3 }
 0x1bf   : > { %5345 = vmatpush3.msra.mxu1 %v1855_v61  ;;  %5375 = vmatpush3.msra.mxu0 %v2199_v3 }
 0x1c0   : > { %5347 = vmatmul.mubr.f32.vlgmr.msra.gmra.mxu1 %v6611_v2  ;;  %5376 = vmatprep.subr.mxu0 %v2198_v4 }
 0x1c1   : > { %5377 = vmatpush3.msra.mxu0 %v2198_v4  ;;  %5414 = vmatprep.subr.mxu1 %v2481_v14 }
 0x1c2   : > { %5378 = vmatprep.subr.mxu0 %v2197_v5  ;;  %5415 = vmatpush3.msra.mxu1 %v2481_v14 }
 0x1c3   : > { %5379 = vmatpush3.msra.mxu0 %v2197_v5  ;;  %5416 = vmatprep.subr.mxu1 %v2480_v15  ;;  %v5964_v5 = vld [vmem:[%s6439_s13 + $0x18] sm:$0xff] }
 0x1c4   : > { %5380 = vmatprep.subr.mxu0 %v2196_v6  ;;  %5417 = vmatpush3.msra.mxu1 %v2480_v15 }
 0x1c5   : > { %5381 = vmatpush3.msra.mxu0 %v2196_v6  ;;  %5418 = vmatprep.subr.mxu1 %v2479_v16 }
 0x1c6   : > { %5382 = vmatprep.subr.mxu0 %v2195_v7  ;;  %5419 = vmatpush3.msra.mxu1 %v2479_v16 }
 0x1c7   : > { %5383 = vmatpush3.msra.mxu0 %v2195_v7  ;;  %5420 = vmatprep.subr.mxu1 %v2478_v17 }
 0x1c8   : > { %5384 = vmatprep.subr.mxu0 %v2194_v8  ;;  %5421 = vmatpush3.msra.mxu1 %v2478_v17 }
 0x1c9   : > { %5385 = vmatpush3.msra.mxu0 %v2194_v8  ;;  %5422 = vmatprep.subr.mxu1 %v2477_v18 }
 0x1ca   : > { %5386 = vmatprep.subr.mxu0 %v2193_v9  ;;  %5423 = vmatpush3.msra.mxu1 %v2477_v18 }
 0x1cb   : > { %5387 = vmatpush3.msra.mxu0 %v2193_v9 }
 0x1cc   : > { %5388 = vmatprep.subr.mxu0 %v2192_v10 }
 0x1cd   : > { %5389 = vmatpush3.msra.mxu0 %v2192_v10 }
 0x1ce   : > { %5390 = vmatprep.subr.mxu0 %v2191_v11 }
 0x1cf   : > { %5391 = vmatpush3.msra.mxu0 %v2191_v11 }
 0x1d0   : > { %5392 = vmatprep.subr.mxu0 %v2190_v12 }
 0x1d1   : > { %5393 = vmatpush3.msra.mxu0 %v2190_v12 }
 0x1d2   : > { %5394 = vmatprep.subr.mxu0 %v2189_v13 }
 0x1d3   : > { %5395 = vmatpush3.msra.mxu0 %v2189_v13  ;;  %v5965_v13 = vld [vmem:[%s6439_s13 + $0x10] sm:$0xff] }
 0x248   : > { %v5151_v19 = vpop.f32.mrf.mxu1 }
 0x24a   : > { %v1339_v20 = vpop.f32.mrf.mxu1 }
 0x24b   : > { %v5201_v21 = vpop.f32.mrf.mxu0 }
 0x24c   : > { %v5154_v22 = vpop.f32.mrf.mxu1  ;;  %v1518_v42 = vadd.f32 %v5201_v21, %v5151_v19 }
 0x24d   : > { %v1512_v23 = vpop.f32.mrf.mxu0 }
 0x24e   : > { %v1349_v25 = vpop.f32.mrf.mxu1  ;;  %v1513_v45 = vadd.f32 %v1512_v23, %v1339_v20 }
 0x24f   : > { %v5204_v26 = vpop.f32.mrf.mxu0 }
 0x250   : > { %v5157_v27 = vpop.f32.mrf.mxu1  ;;  %v1528_v48 = vadd.f32 %v5204_v26, %v5154_v22  ;;  %v5966_v26 = vld [vmem:[%s6439_s13 + $0x28] sm:$0xff] }
 0x251   : > { %v1522_v28 = vpop.f32.mrf.mxu0 }
 0x252   : > { %v1359_v29 = vpop.f32.mrf.mxu1  ;;  %v1523_v52 = vadd.f32 %v1522_v28, %v1349_v25 }
 0x253   : > { %v5207_v30 = vpop.f32.mrf.mxu0 }
 0x254   : > { %v5160_v31 = vpop.f32.mrf.mxu1  ;;  %v1538_v57 = vadd.f32 %v5207_v30, %v5157_v27 }
 0x255   : > { %v1532_v32 = vpop.f32.mrf.mxu0 }
 0x256   : > { %v1369_v33 = vpop.f32.mrf.mxu1  ;;  %v1533_v61 = vadd.f32 %v1532_v32, %v1359_v29 }
 0x257   : > { %v5210_v34 = vpop.f32.mrf.mxu0 }
 0x258   : > { %v5163_v35 = vpop.f32.mrf.mxu1  ;;  %v1548_v12 = vadd.f32 %v5210_v34, %v5160_v31  ;;  %v5967_v31 = vld [vmem:[%s6439_s13 + $0x20] sm:$0xff] }
 0x259   : > { %v1542_v36 = vpop.f32.mrf.mxu0 }
 0x25a   : > { %v1379_v37 = vpop.f32.mrf.mxu1  ;;  %v1543_v17 = vadd.f32 %v1542_v36, %v1369_v33 }
 0x25b   : > { %v5213_v38 = vpop.f32.mrf.mxu0 }
 0x25c   : > { %v5248_v39 = vpop.f32.mrf.mxu1 }
 0x25d   : > { %v1552_v40 = vpop.f32.mrf.mxu0  ;;  %v5968_v39 = vld [vmem:[%s6439_s13 + $0x38] sm:$0xff] }
 0x25e   : > { %v1680_v41 = vpop.f32.mrf.mxu1 }
 0x260   : > { %v5251_v43 = vpop.f32.mrf.mxu1 }
 0x261   : > { %v1742_v46 = vadd.f32 %v5251_v43, %v1518_v42 }
 0x262   : > { %v1690_v47 = vpop.f32.mrf.mxu1 }
 0x263   : > { %v1761_v49 = vadd.f32 %v6618_v44, %v1742_v46  ;;  %v1741_v50 = vadd.f32 %v1690_v47, %v1513_v45 }
 0x264   : > { %v5254_v51 = vpop.f32.mrf.mxu1 }
 0x265   : > { %v6622_v54 = vadd.f32 %v5962_v53, %v1761_v49  ;;  %v1760_v55 = vadd.f32 %v6618_v44, %v1741_v50  ;;  %v1744_v56 = vadd.f32 %v5254_v51, %v1528_v48  ;;  %v5969_v48 = vld [vmem:[%s6439_s13 + $0x30] sm:$0xff]  ;;  %s6106_s13 = scalar_lea.vmem %s6964_s15, 1024 }
 0x266   : > { %v1700_v58 = vpop.f32.mrf.mxu1  ;;  %p6107_p13 = scmp.ne.s32.totalorder %s6964_s15, %s6106_s13  ;;  %p6114_p11 = scmp.lt.s32.totalorder %s6112_s28, %s6106_s13 }
 0x267   : > { %v6626_v60 = vadd.f32 %v5963_v59, %v1760_v55  ;;  %v1763_v62 = vadd.f32 %v6618_v44, %v1744_v56  ;;  %v1743_v63 = vadd.f32 %v1700_v58, %v1523_v52  ;;  %vm1809_vm2 = vcmp.ge.f32.partialorder %v6622_v54, 0.0 }
 0x268   : > { %v5257_v3 = vpop.f32.mrf.mxu1  ;;  %v1821_v4 = vmul.f32 0.1, %v6622_v54  ;;  %p6108_p10 = pnand %p6107_p13, %p7065_p3  ;;  %p6115_p9 = por %p6114_p11, %p6113_p7 }
 0x269   : > { %v6632_v6 = vadd.f32 %v5964_v5, %v1763_v62  ;;  %v1762_v7 = vadd.f32 %v6618_v44, %v1743_v63  ;;  %v1746_v8 = vadd.f32 %v5257_v3, %v1538_v57  ;;  %vm1808_vm4 = vcmp.ge.f32.partialorder %v6626_v60, 0.0 }
 0x26a   : > { %v1710_v9 = vpop.f32.mrf.mxu1  ;;  %v1820_v10 = vmul.f32 0.1, %v6626_v60  ;;  %v6638_v11 = vsel %vm1809_vm2, %v6622_v54, %v1821_v4  ;;  %p6109_p2 = pneg %p6108_p10 }
 0x26b   : > { %v6641_v14 = vadd.f32 %v5965_v13, %v1762_v7  ;;  %v1765_v15 = vadd.f32 %v6618_v44, %v1746_v8  ;;  %v1745_v16 = vadd.f32 %v1710_v9, %v1533_v61  ;;  %vm1811_vm6 = vcmp.ge.f32.partialorder %v6632_v6, 0.0 }
 0x26c   : > { %v5260_v18 = vpop.f32.mrf.mxu1  ;;  %v6645_v19 = vsel %vm1808_vm4, %v6626_v60, %v1820_v10  ;;  %v1823_v20 = vmul.f32 0.1, %v6632_v6  ;;  %v2033_v25 = vrot.slane %v6638_v11, 5  ;;  %v6706_v9 = vrot.slane %v6203_v0, 3  ;;  %p6116_p6 = pnand %p6115_p9, %p6109_p2 }
 0x26d   : > { %v1764_v21 = vadd.f32 %v6618_v44, %v1745_v16  ;;  %v1748_v22 = vadd.f32 %v5260_v18, %v1548_v12  ;;  %5299 = vmatprep.mubr.f32.mxu0 %v6645_v19  ;;  %v2031_v23 = vrot.slane %v6645_v19, 5  ;;  %v6654_v27 = vadd.f32 %v5966_v26, %v1765_v15 }
 0x26e   : > { %5300 = vmatmul.mubr.f32.gmra.mxu0 %v6638_v11  ;;  %v1720_v28 = vpop.f32.mrf.mxu1  ;;  %vm1810_vm7 = vcmp.ge.f32.partialorder %v6641_v14, 0.0  ;;  %v1822_v29 = vmul.f32 0.1, %v6641_v14  ;;  %v6660_v30 = vsel %vm1811_vm6, %v6632_v6, %v1823_v20  ;;  %v2209_v7 = vrot.slane %v6645_v19, 3 }
 0x26f   : > { %v6663_v32 = vadd.f32 %v5967_v31, %v1764_v21  ;;  %v1767_v33 = vadd.f32 %v6618_v44, %v1748_v22  ;;  %v1747_v34 = vadd.f32 %v1720_v28, %v1543_v17  ;;  %v2032_v35 = vsel %vm2025_vm5, %v6611_v2, %v2031_v23  ;;  %v2476_v31 = vld [vmem:[#allocation11 + $0x250] sm:$0xff] }
 0x270   : > { %5349 = vmatprep.mubr.f32.mxu1 %v2032_v35  ;;  %v6669_v36 = vsel %vm1810_vm7, %v6641_v14, %v1822_v29  ;;  %v2034_v37 = vsel %vm2025_vm5, %v2031_v23, %v2033_v25  ;;  %v5263_v38 = vpop.f32.mrf.mxu1  ;;  %v2037_v43 = vrot.slane %v6660_v30, 5  ;;  %vm1813_vm10 = vcmp.ge.f32.partialorder %v6654_v27, 0.0  ;;  %5424 = vmatprep.subr.mxu1 %v2476_v31 }
 0x271   : > { %v6673_v40 = vadd.f32 %v5968_v39, %v1767_v33  ;;  %v1766_v41 = vadd.f32 %v6618_v44, %v1747_v34  ;;  %5302 = vmatprep.mubr.f32.mxu0 %v6669_v36  ;;  %v2035_v42 = vrot.slane %v6669_v36, 5  ;;  %5350 = vmatmul.mubr.f32.gmra.mxu1 %v2034_v37  ;;  %vm1812_vm8 = vcmp.ge.f32.partialorder %v6663_v32, 0.0  ;;  %v2475_v33 = vld [vmem:[#allocation11 + $0x248] sm:$0xff]  ;;  %v2464_v34 = vld [vmem:[#allocation11 + $0x1f8] sm:$0xff]  ;;  %v2463_v37 = vld [vmem:[#allocation11 + $0x1f0] sm:$0xff] }
 0x272   : > { %5303 = vmatmul.mubr.f32.gmra.mxu0 %v6660_v30  ;;  %v1824_v45 = vmul.f32 0.1, %v6663_v32  ;;  %v1825_v46 = vmul.f32 0.1, %v6654_v27  ;;  %v1730_v47 = vpop.f32.mrf.mxu1  ;;  %v2211_v10 = vrot.slane %v6638_v11, 3  ;;  %v2213_v12 = vrot.slane %v6669_v36, 3  ;;  %v5298_v29 = vpop.f32.mrf.mxu0  ;;  %5425 = vmatpush3.msra.mxu1 %v2476_v31 }
 0x273   : > { %v6685_v44 = vadd.f32 %v5969_v48, %v1766_v41  ;;  %v2036_v49 = vsel %vm2025_vm5, %v2033_v25, %v2035_v42  ;;  %v2038_v50 = vsel %vm2025_vm5, %v2035_v42, %v2037_v43  ;;  %vm1815_vm11 = vcmp.ge.f32.partialorder %v6673_v40, 0.0  ;;  %5426 = vmatprep.subr.mxu1 %v2475_v33  ;;  %5464 = vmatprep.subr.mxu0 %v2464_v34  ;;  %v2474_v36 = vld [vmem:[#allocation11 + $0x240] sm:$0xff]  ;;  %v2473_v39 = vld [vmem:[#allocation11 + $0x238] sm:$0xff]  ;;  %v2462_v41 = vld [vmem:[#allocation11 + $0x1e8] sm:$0xff] }
 0x274   : > { %5352 = vmatprep.mubr.f32.mxu1 %v2036_v49  ;;  %v1836_v51 = vsel %vm1812_vm8, %v6663_v32, %v1824_v45  ;;  %v1837_v52 = vsel %vm1813_vm10, %v6654_v27, %v1825_v46  ;;  %v1827_v53 = vmul.f32 0.1, %v6673_v40  ;;  %v2210_v13 = vsel %vm2205_vm13, %v6706_v9, %v2209_v7  ;;  %5427 = vmatpush3.msra.mxu1 %v2475_v33  ;;  %v2472_v42 = vld [vmem:[#allocation11 + $0x230] sm:$0xff]  ;;  %v2471_v45 = vld [vmem:[#allocation11 + $0x228] sm:$0xff]  ;;  %v2460_v46 = vld [vmem:[#allocation11 + $0x1d8] sm:$0xff] }
 0x275   : > { %5305 = vmatprep.mubr.f32.mxu0 %v1836_v51  ;;  %v2039_v55 = vrot.slane %v1836_v51, 5  ;;  %5353 = vmatmul.mubr.f32.gmra.mxu1 %v2038_v50  ;;  %v2041_v56 = vrot.slane %v1837_v52, 5  ;;  %vm1814_vm12 = vcmp.ge.f32.partialorder %v6685_v44, 0.0  ;;  %v1826_v57 = vmul.f32 0.1, %v6685_v44  ;;  %v2470_v47 = vld [vmem:[#allocation11 + $0x220] sm:$0xff] }
 0x276   : > { %5306 = vmatmul.mubr.f32.gmra.mxu0 %v1837_v52  ;;  %v1839_v58 = vsel %vm1815_vm11, %v6673_v40, %v1827_v53  ;;  %v2212_v15 = vsel %vm2205_vm13, %v2209_v7, %v2211_v10  ;;  %v2215_v16 = vrot.slane %v6660_v30, 3  ;;  %v2217_v17 = vrot.slane %v1836_v51, 3  ;;  %v1954_v30 = vpop.f32.mrf.mxu0  ;;  %5428 = vmatprep.subr.mxu1 %v2474_v36  ;;  %v2459_v48 = vld [vmem:[#allocation11 + $0x1d0] sm:$0xff]  ;;  %v2469_v49 = vld [vmem:[#allocation11 + $0x218] sm:$0xff]  ;;  %v2458_v50 = vld [vmem:[#allocation11 + $0x1c8] sm:$0xff] }
 0x277   : > { %v2040_v59 = vsel %vm2025_vm5, %v2037_v43, %v2039_v55  ;;  %v2042_v62 = vsel %vm2025_vm5, %v2039_v55, %v2041_v56  ;;  %v1838_v63 = vsel %vm1814_vm12, %v6685_v44, %v1826_v57  ;;  %v2045_v3 = vrot.slane %v1839_v58, 5  ;;  %5429 = vmatpush3.msra.mxu1 %v2474_v36  ;;  %v2461_v43 = vld [vmem:[#allocation11 + $0x1e0] sm:$0xff]  ;;  %v2468_v51 = vld [vmem:[#allocation11 + $0x210] sm:$0xff]  ;;  %v2467_v53 = vld [vmem:[#allocation11 + $0x208] sm:$0xff] }
 0x278   : > { %5355 = vmatprep.mubr.f32.mxu1 %v2040_v59  ;;  %5308 = vmatprep.mubr.f32.mxu0 %v1838_v63  ;;  %v2043_v61 = vrot.slane %v1838_v63, 5  ;;  %v2214_v18 = vsel %vm2205_vm13, %v2211_v10, %v2213_v12  ;;  %v2216_v11 = vsel %vm2205_vm13, %v2213_v12, %v2215_v16  ;;  %v2219_v19 = vrot.slane %v1837_v52, 3  ;;  %v2457_v52 = vld [vmem:[#allocation11 + $0x1c0] sm:$0xff]  ;;  %v2456_v55 = vld [vmem:[#allocation11 + $0x1b8] sm:$0xff]  ;;  %v2455_v57 = vld [vmem:[#allocation11 + $0x1b0] sm:$0xff] }
 0x279   : > { %5356 = vmatmul.mubr.f32.gmra.mxu1 %v2042_v62  ;;  %v2048_v8 = vsel %vm2025_vm5, %v2045_v3, %v6611_v2  ;;  %v2221_v20 = vrot.slane %v1838_v63, 3  ;;  %v2218_v21 = vsel %vm2205_vm13, %v2215_v16, %v2217_v17  ;;  %v2223_v23 = vrot.slane %v1839_v58, 3  ;;  %5430 = vmatprep.subr.mxu1 %v2473_v39  ;;  %v2796_v59 = vld [vmem:[#allocation11 + $0x2f8] sm:$0xff]  ;;  %v2453_v62 = vld [vmem:[#allocation11 + $0x1a0] sm:$0xff]  ;;  %v2795_v63 = vld [vmem:[#allocation11 + $0x2f0] sm:$0xff] }
 0x27a   : > { %5309 = vmatmul.mubr.f32.gmra.mxu0 %v1839_v58  ;;  %v2044_v4 = vsel %vm2025_vm5, %v2041_v56, %v2043_v61  ;;  %v2046_v5 = vsel %vm2025_vm5, %v2043_v61, %v2045_v3  ;;  %v2220_v22 = vsel %vm2205_vm13, %v2217_v17, %v2219_v19  ;;  %5431 = vmatpush3.msra.mxu1 %v2473_v39  ;;  %v2466_v56 = vld [vmem:[#allocation11 + $0x200] sm:$0xff]  ;;  %v2454_v58 = vld [vmem:[#allocation11 + $0x1a8] sm:$0xff]  ;;  %v2452_v61 = vld [vmem:[#allocation11 + $0x198] sm:$0xff] }
 0x27b   : > { %5311 = vmatprep.mubr.f32.mxu0 %v6203_v0  ;;  %5358 = vmatprep.mubr.f32.mxu1 %v2044_v4  ;;  %v2222_v25 = vsel %vm2205_vm13, %v2219_v19, %v2221_v20  ;;  %v2224_v26 = vsel %vm2205_vm13, %v2221_v20, %v2223_v23  ;;  %v2226_v28 = vsel %vm2205_vm13, %v2223_v23, %v6706_v9  ;;  %v2794_v3 = vld [vmem:[#allocation11 + $0x2e8] sm:$0xff]  ;;  %v2451_v4 = vld [vmem:[#allocation11 + $0x190] sm:$0xff]  ;;  %v2449_v10 = vld [vmem:[#allocation11 + $0x180] sm:$0xff] }
 0x27c   : > { %5432 = vmatprep.subr.mxu1 %v2472_v42  ;;  %v2450_v7 = vld [vmem:[#allocation11 + $0x188] sm:$0xff]  ;;  %v2791_v12 = vld [vmem:[#allocation11 + $0x2d0] sm:$0xff]  ;;  %v2788_v16 = vld [vmem:[#allocation11 + $0x2b8] sm:$0xff] }
 0x27d   : > { %5359 = vmatmul.mubr.f32.gmra.mxu1 %v2046_v5  ;;  %v2793_v5 = vld [vmem:[#allocation11 + $0x2e0] sm:$0xff]  ;;  %v2787_v17 = vld [vmem:[#allocation11 + $0x2b0] sm:$0xff]  ;;  %v2784_v19 = vld [vmem:[#allocation11 + $0x298] sm:$0xff] }
 0x27e   : > { %5312 = vmatmul.mubr.f32.gmra.mxu0 %v6203_v0  ;;  %5361 = vmatprep.mubr.f32.mxu1 %v2048_v8  ;;  %v2792_v8 = vld [vmem:[#allocation11 + $0x2d8] sm:$0xff]  ;;  %v2783_v20 = vld [vmem:[#allocation11 + $0x290] sm:$0xff] }
 0x27f   : > { %5396 = vmatprep.mubr.f32.mxu0 %v6706_v9  ;;  %5433 = vmatpush3.msra.mxu1 %v2472_v42  ;;  %v3107_v23 = vld [vmem:[#allocation9 + $0x3f8] sm:$0xff] }
 0x280   : > { %v5348_v35 = vpop.f32.mrf.mxu1  ;;  %5434 = vmatprep.subr.mxu1 %v2471_v45 }
 0x281   : > { %5362 = vmatmul.mubr.f32.gmra.mxu1 %v6611_v2 }
 0x282   : > { %5397 = vmatmul.mubr.f32.vlgmr.msra.gmra.mxu0 %v2210_v13  ;;  %5446 = vmatprep.mubr.f32.mxu1 %v6203_v0  ;;  %v2129_v38 = vpop.f32.mrf.mxu1  ;;  %v2790_v13 = vld [vmem:[#allocation11 + $0x2c8] sm:$0xff] }
 0x283   : > { %5399 = vmatprep.mubr.f32.mxu0 %v2212_v15  ;;  %5465 = vmatpush3.msra.mxu0 %v2464_v34  ;;  %v2789_v15 = vld [vmem:[#allocation11 + $0x2c0] sm:$0xff] }
 0x284   : > { %5466 = vmatprep.subr.mxu0 %v2463_v37  ;;  %5435 = vmatpush3.msra.mxu1 %v2471_v45 }
 0x285   : > { %5467 = vmatpush3.msra.mxu0 %v2463_v37  ;;  %5436 = vmatprep.subr.mxu1 %v2470_v47 }
 0x286   : > { %5400 = vmatmul.mubr.f32.gmra.mxu0 %v2214_v18  ;;  %5468 = vmatprep.subr.mxu0 %v2462_v41  ;;  %v2786_v18 = vld [vmem:[#allocation11 + $0x2a8] sm:$0xff] }
 0x287   : > { %5402 = vmatprep.mubr.f32.mxu0 %v2216_v11  ;;  %5469 = vmatpush3.msra.mxu0 %v2462_v41  ;;  %v2785_v11 = vld [vmem:[#allocation11 + $0x2a0] sm:$0xff] }
 0x288   : > { %5470 = vmatprep.subr.mxu0 %v2461_v43  ;;  %5437 = vmatpush3.msra.mxu1 %v2470_v47 }
 0x289   : > { %5471 = vmatpush3.msra.mxu0 %v2461_v43  ;;  %5438 = vmatprep.subr.mxu1 %v2469_v49 }
 0x28a   : > { %5403 = vmatmul.mubr.f32.gmra.mxu0 %v2218_v21  ;;  %5472 = vmatprep.subr.mxu0 %v2460_v46  ;;  %v2782_v21 = vld [vmem:[#allocation11 + $0x288] sm:$0xff] }
 0x28b   : > { %5405 = vmatprep.mubr.f32.mxu0 %v2220_v22  ;;  %5473 = vmatpush3.msra.mxu0 %v2460_v46  ;;  %v2781_v22 = vld [vmem:[#allocation11 + $0x280] sm:$0xff] }
 0x28c   : > { %5474 = vmatprep.subr.mxu0 %v2459_v48  ;;  %5439 = vmatpush3.msra.mxu1 %v2469_v49 }
 0x28d   : > { %5475 = vmatpush3.msra.mxu0 %v2459_v48  ;;  %5440 = vmatprep.subr.mxu1 %v2468_v51 }
 0x28e   : > { %5406 = vmatmul.mubr.f32.gmra.mxu0 %v2222_v25  ;;  %5476 = vmatprep.subr.mxu0 %v2458_v50  ;;  %v3106_v25 = vld [vmem:[#allocation9 + $0x3f0] sm:$0xff] }
 0x28f   : > { %5408 = vmatprep.mubr.f32.mxu0 %v2224_v26  ;;  %5477 = vmatpush3.msra.mxu0 %v2458_v50  ;;  %v3105_v26 = vld [vmem:[#allocation9 + $0x3e8] sm:$0xff] }
 0x290   : > { %5478 = vmatprep.subr.mxu0 %v2457_v52  ;;  %5441 = vmatpush3.msra.mxu1 %v2468_v51 }
 0x291   : > { %5479 = vmatpush3.msra.mxu0 %v2457_v52  ;;  %5442 = vmatprep.subr.mxu1 %v2467_v53 }
 0x292   : > { %5409 = vmatmul.mubr.f32.gmra.mxu0 %v2226_v28  ;;  %5480 = vmatprep.subr.mxu0 %v2456_v55  ;;  %v3104_v28 = vld [vmem:[#allocation9 + $0x3e0] sm:$0xff] }
 0x293   : > { %5411 = vmatprep.mubr.f32.mxu0 %v6706_v9  ;;  %5443 = vmatpush3.msra.mxu1 %v2467_v53 }
 0x294   : > { %5481 = vmatpush3.msra.mxu0 %v2456_v55  ;;  %5444 = vmatprep.subr.mxu1 %v2466_v56 }
 0x295   : > { %5482 = vmatprep.subr.mxu0 %v2455_v57  ;;  %5445 = vmatpush3.msra.mxu1 %v2466_v56 }
 0x296   : > { %5412 = vmatmul.mubr.f32.gmra.mxu0 %v6706_v9  ;;  %5447 = vmatmul.mubr.f32.vlgmr.msra.gmra.mxu1 %v6203_v0 }
 0x297   : > { %5496 = vmatprep.mubr.f32.mxu0 %v6451_v1  ;;  %5483 = vmatpush3.msra.mxu0 %v2455_v57  ;;  %v4442_v57 = vld [vmem:[%s7019_s4 + $0x1] ss:$0 sm:$0xff] }
 0x298   : > { %5484 = vmatprep.subr.mxu0 %v2454_v58  ;;  %5514 = vmatprep.subr.mxu1 %v2796_v59 }
 0x299   : > { %5485 = vmatpush3.msra.mxu0 %v2454_v58  ;;  %5515 = vmatpush3.msra.mxu1 %v2796_v59 }
 0x29a   : > { %5486 = vmatprep.subr.mxu0 %v2453_v62  ;;  %5516 = vmatprep.subr.mxu1 %v2795_v63 }
 0x29b   : > { %5487 = vmatpush3.msra.mxu0 %v2453_v62  ;;  %5517 = vmatpush3.msra.mxu1 %v2795_v63 }
 0x29c   : > { %5488 = vmatprep.subr.mxu0 %v2452_v61  ;;  %5518 = vmatprep.subr.mxu1 %v2794_v3 }
 0x29d   : > { %5489 = vmatpush3.msra.mxu0 %v2452_v61  ;;  %5519 = vmatpush3.msra.mxu1 %v2794_v3 }
 0x29e   : > { %5490 = vmatprep.subr.mxu0 %v2451_v4  ;;  %5520 = vmatprep.subr.mxu1 %v2793_v5 }
 0x29f   : > { %5491 = vmatpush3.msra.mxu0 %v2451_v4  ;;  %5521 = vmatpush3.msra.mxu1 %v2793_v5 }
 0x2a0   : > { %5492 = vmatprep.subr.mxu0 %v2450_v7  ;;  %5522 = vmatprep.subr.mxu1 %v2792_v8 }
 0x2a1   : > { %5493 = vmatpush3.msra.mxu0 %v2450_v7  ;;  %5523 = vmatpush3.msra.mxu1 %v2792_v8 }
 0x2a2   : > { %5494 = vmatprep.subr.mxu0 %v2449_v10  ;;  %5524 = vmatprep.subr.mxu1 %v2791_v12 }
 0x2a3   : > { %5495 = vmatpush3.msra.mxu0 %v2449_v10  ;;  %5525 = vmatpush3.msra.mxu1 %v2791_v12 }
 0x2a4   : > { %5497 = vmatmul.mubr.f32.vlgmr.msra.gmra.mxu0 %v6451_v1  ;;  %5526 = vmatprep.subr.mxu1 %v2790_v13 }
 0x2a5   : > { %5527 = vmatpush3.msra.mxu1 %v2790_v13  ;;  %5564 = vmatprep.subr.mxu0 %v3107_v23 }
 0x2a6   : > { %5528 = vmatprep.subr.mxu1 %v2789_v15  ;;  %5565 = vmatpush3.msra.mxu0 %v3107_v23 }
 0x2a7   : > { %5529 = vmatpush3.msra.mxu1 %v2789_v15  ;;  %5566 = vmatprep.subr.mxu0 %v3106_v25 }
 0x2a8   : > { %5530 = vmatprep.subr.mxu1 %v2788_v16  ;;  %5567 = vmatpush3.msra.mxu0 %v3106_v25 }
 0x2a9   : > { %5531 = vmatpush3.msra.mxu1 %v2788_v16  ;;  %5568 = vmatprep.subr.mxu0 %v3105_v26 }
 0x2aa   : > { %5532 = vmatprep.subr.mxu1 %v2787_v17  ;;  %5569 = vmatpush3.msra.mxu0 %v3105_v26 }
 0x2ab   : > { %5533 = vmatpush3.msra.mxu1 %v2787_v17  ;;  %5570 = vmatprep.subr.mxu0 %v3104_v28 }
 0x2ac   : > { %5534 = vmatprep.subr.mxu1 %v2786_v18  ;;  %5571 = vmatpush3.msra.mxu0 %v3104_v28 }
 0x2ad   : > { %5535 = vmatpush3.msra.mxu1 %v2786_v18 }
 0x2ae   : > { %5536 = vmatprep.subr.mxu1 %v2785_v11 }
 0x2af   : > { %5537 = vmatpush3.msra.mxu1 %v2785_v11 }
 0x2b0   : > { %5538 = vmatprep.subr.mxu1 %v2784_v19 }
 0x2b1   : > { %5539 = vmatpush3.msra.mxu1 %v2784_v19 }
 0x2b2   : > { %5540 = vmatprep.subr.mxu1 %v2783_v20 }
 0x2b3   : > { %5541 = vmatpush3.msra.mxu1 %v2783_v20 }
 0x2b4   : > { %5542 = vmatprep.subr.mxu1 %v2782_v21 }
 0x2b5   : > { %5543 = vmatpush3.msra.mxu1 %v2782_v21 }
 0x2b6   : > { %5544 = vmatprep.subr.mxu1 %v2781_v22 }
 0x2b7   : > { %5545 = vmatpush3.msra.mxu1 %v2781_v22 }
 0x32e   : > { %v5301_v29 = vpop.f32.mrf.mxu0 }
 0x330   : > { %v1964_v30 = vpop.f32.mrf.mxu0 }
 0x331   : > { %v5351_v31 = vpop.f32.mrf.mxu1 }
 0x332   : > { %v5304_v33 = vpop.f32.mrf.mxu0  ;;  %v2145_v55 = vadd.f32 %v5351_v31, %v5301_v29 }
 0x333   : > { %v2139_v34 = vpop.f32.mrf.mxu1 }
 0x334   : > { %v1974_v35 = vpop.f32.mrf.mxu0  ;;  %v2140_v58 = vadd.f32 %v2139_v34, %v1964_v30 }
 0x335   : > { %v5354_v36 = vpop.f32.mrf.mxu1 }
 0x336   : > { %v5307_v37 = vpop.f32.mrf.mxu0  ;;  %v2155_v63 = vadd.f32 %v5354_v36, %v5304_v33 }
 0x337   : > { %v2149_v38 = vpop.f32.mrf.mxu1 }
 0x338   : > { %v1984_v39 = vpop.f32.mrf.mxu0  ;;  %v2150_v4 = vadd.f32 %v2149_v38, %v1974_v35 }
 0x339   : > { %v5357_v41 = vpop.f32.mrf.mxu1 }
 0x33a   : > { %v5310_v42 = vpop.f32.mrf.mxu0  ;;  %v2165_v12 = vadd.f32 %v5357_v41, %v5307_v37 }
 0x33b   : > { %v2159_v43 = vpop.f32.mrf.mxu1 }
 0x33c   : > { %v1994_v45 = vpop.f32.mrf.mxu0  ;;  %v2160_v19 = vadd.f32 %v2159_v43, %v1984_v39 }
 0x33d   : > { %v5360_v46 = vpop.f32.mrf.mxu1 }
 0x33e   : > { %v5313_v47 = vpop.f32.mrf.mxu0  ;;  %v2175_v23 = vadd.f32 %v5360_v46, %v5310_v42 }
 0x33f   : > { %v2169_v48 = vpop.f32.mrf.mxu1 }
 0x340   : > { %v2004_v49 = vpop.f32.mrf.mxu0  ;;  %v2170_v33 = vadd.f32 %v2169_v48, %v1994_v45 }
 0x341   : > { %v5363_v50 = vpop.f32.mrf.mxu1 }
 0x342   : > { %v5398_v51 = vpop.f32.mrf.mxu0 }
 0x343   : > { %v2179_v52 = vpop.f32.mrf.mxu1 }
 0x344   : > { %v2309_v53 = vpop.f32.mrf.mxu0 }
 0x346   : > { %v5401_v56 = vpop.f32.mrf.mxu0 }
 0x347   : > { %v2371_v59 = vadd.f32 %v5401_v56, %v2145_v55 }
 0x348   : > { %v2319_v62 = vpop.f32.mrf.mxu0 }
 0x349   : > { %v2391_v61 = vadd.f32 %v4442_v57, %v2371_v59  ;;  %v2370_v3 = vadd.f32 %v2319_v62, %v2140_v58 }
 0x34a   : > { %v5404_v5 = vpop.f32.mrf.mxu0 }
 0x34b   : > { %v2390_v7 = vadd.f32 %v4442_v57, %v2370_v3  ;;  %v2373_v8 = vadd.f32 %v5404_v5, %v2155_v63  ;;  %vm2403_vm14 = vcmp.ge.f32.partialorder %v2391_v61, 0.0  ;;  %v2415_v10 = vmul.f32 0.1, %v2391_v61 }
 0x34c   : > { %v2329_v13 = vpop.f32.mrf.mxu0 }
 0x34d   : > { %v2393_v15 = vadd.f32 %v4442_v57, %v2373_v8  ;;  %v2372_v16 = vadd.f32 %v2329_v13, %v2150_v4  ;;  %vm2402_vm15 = vcmp.ge.f32.partialorder %v2390_v7, 0.0  ;;  %v2414_v17 = vmul.f32 0.1, %v2390_v7 }
 0x34e   : > { %v5407_v18 = vpop.f32.mrf.mxu0  ;;  %v6734_v11 = vsel %vm2403_vm14, %v2391_v61, %v2415_v10 }
 0x34f   : > { %v2392_v20 = vadd.f32 %v4442_v57, %v2372_v16  ;;  %v2375_v21 = vadd.f32 %v5407_v18, %v2165_v12  ;;  %v6736_v22 = vsel %vm2402_vm15, %v2390_v7, %v2414_v17  ;;  %v2625_v28 = vrot.slane %v6734_v11, 7 }
 0x350   : > { %v2339_v25 = vpop.f32.mrf.mxu0  ;;  %5449 = vmatprep.mubr.f32.mxu1 %v6736_v22  ;;  %v2623_v26 = vrot.slane %v6736_v22, 7  ;;  %vm2405_vm0 = vcmp.ge.f32.partialorder %v2393_v15, 0.0  ;;  %v2417_v37 = vmul.f32 0.1, %v2393_v15  ;;  %v2802_v17 = vrot.slane %v6734_v11, 1 }
 0x351   : > { %v2395_v29 = vadd.f32 %v4442_v57, %v2375_v21  ;;  %v2374_v30 = vadd.f32 %v2339_v25, %v2160_v19  ;;  %5450 = vmatmul.mubr.f32.gmra.mxu1 %v6734_v11  ;;  %vm2404_vm1 = vcmp.ge.f32.partialorder %v2392_v20, 0.0  ;;  %v2416_v31 = vmul.f32 0.1, %v2392_v20 }
 0x352   : > { %v5410_v34 = vpop.f32.mrf.mxu0  ;;  %v2624_v35 = vsel %vm808_vm3, %v6451_v1, %v2623_v26  ;;  %v2626_v36 = vsel %vm808_vm3, %v2623_v26, %v2625_v28  ;;  %v6750_v45 = vsel %vm2405_vm0, %v2393_v15, %v2417_v37  ;;  %v2800_v15 = vrot.slane %v6736_v22, 1  ;;  %v3103_v37 = vld [vmem:[#allocation9 + $0x3d8] sm:$0xff] }
 0x353   : > { %v2394_v38 = vadd.f32 %v4442_v57, %v2374_v30  ;;  %v2377_v39 = vadd.f32 %v5410_v34, %v2175_v23  ;;  %5499 = vmatprep.mubr.f32.mxu0 %v2624_v35  ;;  %v6745_v41 = vsel %vm2404_vm1, %v2392_v20, %v2416_v31  ;;  %vm2407_vm2 = vcmp.ge.f32.partialorder %v2395_v29, 0.0  ;;  %5572 = vmatprep.subr.mxu0 %v3103_v37 }
 0x354   : > { %v2349_v42 = vpop.f32.mrf.mxu0  ;;  %5452 = vmatprep.mubr.f32.mxu1 %v6745_v41  ;;  %v2627_v43 = vrot.slane %v6745_v41, 7  ;;  %5500 = vmatmul.mubr.f32.gmra.mxu0 %v2626_v36  ;;  %v2419_v46 = vmul.f32 0.1, %v2395_v29  ;;  %v2629_v49 = vrot.slane %v6750_v45, 7  ;;  %v2804_v18 = vrot.slane %v6745_v41, 1  ;;  %v3101_v41 = vld [vmem:[#allocation9 + $0x3c8] sm:$0xff] }
 0x355   : > { %v2397_v47 = vadd.f32 %v4442_v57, %v2377_v39  ;;  %v2376_v48 = vadd.f32 %v2349_v42, %v2170_v33  ;;  %5453 = vmatmul.mubr.f32.gmra.mxu1 %v6750_v45  ;;  %vm2406_vm4 = vcmp.ge.f32.partialorder %v2394_v38, 0.0  ;;  %v2418_v51 = vmul.f32 0.1, %v2394_v38  ;;  %5573 = vmatpush3.msra.mxu0 %v3103_v37  ;;  %v3090_v42 = vld [vmem:[#allocation9 + $0x378] sm:$0xff] }
 0x356   : > { %v2628_v50 = vsel %vm808_vm3, %v2625_v28, %v2627_v43  ;;  %v2431_v52 = vsel %vm2407_vm2, %v2395_v29, %v2419_v46  ;;  %v5413_v53 = vpop.f32.mrf.mxu0  ;;  %v2630_v56 = vsel %vm808_vm3, %v2627_v43, %v2629_v49  ;;  %v2801_v19 = vsel %vm988_vm9, %v6511_v24, %v2800_v15  ;;  %v5448_v35 = vpop.f32.mrf.mxu1  ;;  %5614 = vmatprep.subr.mxu1 %v3090_v42  ;;  %v3089_v46 = vld [vmem:[#allocation9 + $0x370] sm:$0xff] }
 0x357   : > { %v2396_v55 = vadd.f32 %v4442_v57, %v2376_v48  ;;  %5502 = vmatprep.mubr.f32.mxu0 %v2628_v50  ;;  %v2430_v58 = vsel %vm2406_vm4, %v2394_v38, %v2418_v51  ;;  %vm2409_vm6 = vcmp.ge.f32.partialorder %v2397_v47, 0.0  ;;  %v2421_v59 = vmul.f32 0.1, %v2397_v47  ;;  %v3102_v38 = vld [vmem:[#allocation9 + $0x3d0] sm:$0xff]  ;;  %v3088_v48 = vld [vmem:[#allocation9 + $0x368] sm:$0xff]  ;;  %v3087_v50 = vld [vmem:[#allocation9 + $0x360] sm:$0xff] }
 0x358   : > { %5503 = vmatmul.mubr.f32.gmra.mxu0 %v2630_v56  ;;  %v2359_v62 = vpop.f32.mrf.mxu0  ;;  %5455 = vmatprep.mubr.f32.mxu1 %v2430_v58  ;;  %v2631_v63 = vrot.slane %v2430_v58, 7  ;;  %v2633_v61 = vrot.slane %v2431_v52, 7  ;;  %v2803_v20 = vsel %vm988_vm9, %v2800_v15, %v2802_v17  ;;  %v2806_v21 = vrot.slane %v6750_v45, 1  ;;  %v2548_v36 = vpop.f32.mrf.mxu1  ;;  %v3100_v45 = vld [vmem:[#allocation9 + $0x3c0] sm:$0xff]  ;;  %v3097_v51 = vld [vmem:[#allocation9 + $0x3a8] sm:$0xff]  ;;  %v3095_v56 = vld [vmem:[#allocation9 + $0x398] sm:$0xff] }
 0x359   : > { %vm2408_vm7 = vcmp.ge.f32.partialorder %v2396_v55, 0.0  ;;  %v2420_v3 = vmul.f32 0.1, %v2396_v55  ;;  %5456 = vmatmul.mubr.f32.gmra.mxu1 %v2431_v52  ;;  %v2433_v4 = vsel %vm2409_vm6, %v2397_v47, %v2421_v59  ;;  %v2808_v22 = vrot.slane %v2430_v58, 1  ;;  %5574 = vmatprep.subr.mxu0 %v3102_v38  ;;  %v3099_v47 = vld [vmem:[#allocation9 + $0x3b8] sm:$0xff]  ;;  %v3096_v53 = vld [vmem:[#allocation9 + $0x3a0] sm:$0xff] }
 0x35a   : > { %v2632_v5 = vsel %vm808_vm3, %v2629_v49, %v2631_v63  ;;  %v2634_v57 = vsel %vm808_vm3, %v2631_v63, %v2633_v61  ;;  %v2637_v10 = vrot.slane %v2433_v4, 7  ;;  %v2805_v23 = vsel %vm988_vm9, %v2802_v17, %v2804_v18  ;;  %5575 = vmatpush3.msra.mxu0 %v3102_v38  ;;  %v3098_v49 = vld [vmem:[#allocation9 + $0x3b0] sm:$0xff]  ;;  %v3084_v58 = vld [vmem:[#allocation9 + $0x348] sm:$0xff]  ;;  %v3083_v62 = vld [vmem:[#allocation9 + $0x340] sm:$0xff] }
 0x35b   : > { %v2432_v7 = vsel %vm2408_vm7, %v2396_v55, %v2420_v3  ;;  %5505 = vmatprep.mubr.f32.mxu0 %v2632_v5  ;;  %v2807_v11 = vsel %vm988_vm9, %v2804_v18, %v2806_v21  ;;  %v2810_v25 = vrot.slane %v2431_v52, 1  ;;  %v2809_v28 = vsel %vm988_vm9, %v2806_v21, %v2808_v22  ;;  %5576 = vmatprep.subr.mxu0 %v3101_v41  ;;  %v3086_v52 = vld [vmem:[#allocation9 + $0x358] sm:$0xff]  ;;  %v3085_v55 = vld [vmem:[#allocation9 + $0x350] sm:$0xff]  ;;  %v3093_v63 = vld [vmem:[#allocation9 + $0x388] sm:$0xff] }
 0x35c   : > { %5458 = vmatprep.mubr.f32.mxu1 %v2432_v7  ;;  %v2635_v8 = vrot.slane %v2432_v7, 7  ;;  %5506 = vmatmul.mubr.f32.gmra.mxu0 %v2634_v57  ;;  %v2640_v16 = vsel %vm808_vm3, %v2637_v10, %v6451_v1  ;;  %v2812_v26 = vrot.slane %v2432_v7, 1  ;;  %v2814_v30 = vrot.slane %v2433_v4, 1  ;;  %v3094_v59 = vld [vmem:[#allocation9 + $0x390] sm:$0xff]  ;;  %v3092_v3 = vld [vmem:[#allocation9 + $0x380] sm:$0xff]  ;;  %v3080_v5 = vld [vmem:[#allocation9 + $0x328] sm:$0xff] }
 0x35d   : > { %5459 = vmatmul.mubr.f32.gmra.mxu1 %v2433_v4  ;;  %v2811_v29 = vsel %vm988_vm9, %v2808_v22, %v2810_v25  ;;  %5577 = vmatpush3.msra.mxu0 %v3101_v41  ;;  %v3081_v4 = vld [vmem:[#allocation9 + $0x330] sm:$0xff]  ;;  %v3422_v7 = vld [vmem:[#allocation9 + $0x478] sm:$0xff]  ;;  %v3079_v57 = vld [vmem:[#allocation9 + $0x320] sm:$0xff] }
 0x35e   : > { %v2636_v12 = vsel %vm808_vm3, %v2633_v61, %v2635_v8  ;;  %v2638_v13 = vsel %vm808_vm3, %v2635_v8, %v2637_v10  ;;  %5461 = vmatprep.mubr.f32.mxu1 %v6203_v0  ;;  %v2813_v31 = vsel %vm988_vm9, %v2810_v25, %v2812_v26  ;;  %v2815_v33 = vsel %vm988_vm9, %v2812_v26, %v2814_v30  ;;  %v3082_v61 = vld [vmem:[#allocation9 + $0x338] sm:$0xff]  ;;  %v3421_v8 = vld [vmem:[#allocation9 + $0x470] sm:$0xff]  ;;  %v3419_v15 = vld [vmem:[#allocation9 + $0x460] sm:$0xff] }
 0x35f   : > { %5508 = vmatprep.mubr.f32.mxu0 %v2636_v12  ;;  %v2817_v34 = vsel %vm988_vm9, %v2814_v30, %v6511_v24  ;;  %5578 = vmatprep.subr.mxu0 %v3100_v45  ;;  %v3078_v10 = vld [vmem:[#allocation9 + $0x318] sm:$0xff]  ;;  %v3420_v12 = vld [vmem:[#allocation9 + $0x468] sm:$0xff]  ;;  %v3075_v18 = vld [vmem:[#allocation9 + $0x300] sm:$0xff] }
 0x360   : > { %5509 = vmatmul.mubr.f32.gmra.mxu0 %v2638_v13  ;;  %v3077_v13 = vld [vmem:[#allocation9 + $0x310] sm:$0xff]  ;;  %v3418_v17 = vld [vmem:[#allocation9 + $0x458] sm:$0xff]  ;;  %v3415_v21 = vld [vmem:[#allocation9 + $0x440] sm:$0xff] }
 0x361   : > { %5462 = vmatmul.mubr.f32.gmra.mxu1 %v6203_v0  ;;  %5511 = vmatprep.mubr.f32.mxu0 %v2640_v16  ;;  %v3076_v16 = vld [vmem:[#allocation9 + $0x308] sm:$0xff]  ;;  %v3414_v22 = vld [vmem:[#allocation9 + $0x438] sm:$0xff]  ;;  %v3411_v25 = vld [vmem:[#allocation9 + $0x420] sm:$0xff] }
 0x362   : > { %5546 = vmatprep.mubr.f32.mxu1 %v6511_v24  ;;  %5579 = vmatpush3.msra.mxu0 %v3100_v45  ;;  %v3410_v26 = vld [vmem:[#allocation9 + $0x418] sm:$0xff]  ;;  %v3407_v30 = vld [vmem:[#allocation9 + $0x400] sm:$0xff] }
 0x363   : > { %5580 = vmatprep.subr.mxu0 %v3099_v47  ;;  %v3694_v35 = vld [vmem:[#allocation11 + $0x3e0] sm:$0xff]  ;;  %v3693_v36 = vld [vmem:[#allocation11 + $0x3d8] sm:$0xff] }
 0x364   : > { %5512 = vmatmul.mubr.f32.gmra.mxu0 %v6451_v1  ;;  %v5498_v39 = vpop.f32.mrf.mxu0 }
 0x365   : > { %5547 = vmatmul.mubr.f32.vlgmr.msra.gmra.mxu1 %v2801_v19  ;;  %5596 = vmatprep.mubr.f32.mxu0 %v6203_v0  ;;  %v3417_v19 = vld [vmem:[#allocation9 + $0x450] sm:$0xff] }
 0x366   : > { %5549 = vmatprep.mubr.f32.mxu1 %v2803_v20  ;;  %v2721_v43 = vpop.f32.mrf.mxu0  ;;  %5615 = vmatpush3.msra.mxu1 %v3090_v42  ;;  %v3416_v20 = vld [vmem:[#allocation9 + $0x448] sm:$0xff] }
 0x367   : > { %5616 = vmatprep.subr.mxu1 %v3089_v46  ;;  %5581 = vmatpush3.msra.mxu0 %v3099_v47 }
 0x368   : > { %5617 = vmatpush3.msra.mxu1 %v3089_v46  ;;  %5582 = vmatprep.subr.mxu0 %v3098_v49 }
 0x369   : > { %5550 = vmatmul.mubr.f32.gmra.mxu1 %v2805_v23  ;;  %5618 = vmatprep.subr.mxu1 %v3088_v48  ;;  %v3413_v23 = vld [vmem:[#allocation9 + $0x430] sm:$0xff] }
 0x36a   : > { %5552 = vmatprep.mubr.f32.mxu1 %v2807_v11  ;;  %5619 = vmatpush3.msra.mxu1 %v3088_v48  ;;  %v3412_v11 = vld [vmem:[#allocation9 + $0x428] sm:$0xff] }
 0x36b   : > { %5620 = vmatprep.subr.mxu1 %v3087_v50  ;;  %5583 = vmatpush3.msra.mxu0 %v3098_v49 }
 0x36c   : > { %5621 = vmatpush3.msra.mxu1 %v3087_v50  ;;  %5584 = vmatprep.subr.mxu0 %v3097_v51 }
 0x36d   : > { %5553 = vmatmul.mubr.f32.gmra.mxu1 %v2809_v28  ;;  %5622 = vmatprep.subr.mxu1 %v3086_v52  ;;  %v3409_v28 = vld [vmem:[#allocation9 + $0x410] sm:$0xff] }
 0x36e   : > { %5555 = vmatprep.mubr.f32.mxu1 %v2811_v29  ;;  %5585 = vmatpush3.msra.mxu0 %v3097_v51  ;;  %v3408_v29 = vld [vmem:[#allocation9 + $0x408] sm:$0xff] }
 0x36f   : > { %5623 = vmatpush3.msra.mxu1 %v3086_v52  ;;  %5586 = vmatprep.subr.mxu0 %v3096_v53 }
 0x370   : > { %5624 = vmatprep.subr.mxu1 %v3085_v55  ;;  %5587 = vmatpush3.msra.mxu0 %v3096_v53 }
 0x371   : > { %5556 = vmatmul.mubr.f32.gmra.mxu1 %v2813_v31  ;;  %5588 = vmatprep.subr.mxu0 %v3095_v56  ;;  %v3697_v31 = vld [vmem:[#allocation11 + $0x3f8] sm:$0xff] }
 0x372   : > { %5558 = vmatprep.mubr.f32.mxu1 %v2815_v33  ;;  %5625 = vmatpush3.msra.mxu1 %v3085_v55  ;;  %v3696_v33 = vld [vmem:[#allocation11 + $0x3f0] sm:$0xff] }
 0x373   : > { %5626 = vmatprep.subr.mxu1 %v3084_v58  ;;  %5589 = vmatpush3.msra.mxu0 %v3095_v56 }
 0x374   : > { %5627 = vmatpush3.msra.mxu1 %v3084_v58  ;;  %5590 = vmatprep.subr.mxu0 %v3094_v59 }
 0x375   : > { %5559 = vmatmul.mubr.f32.gmra.mxu1 %v2817_v34  ;;  %5628 = vmatprep.subr.mxu1 %v3083_v62  ;;  %v3695_v34 = vld [vmem:[#allocation11 + $0x3e8] sm:$0xff] }
 0x376   : > { %5561 = vmatprep.mubr.f32.mxu1 %v6511_v24  ;;  %5591 = vmatpush3.msra.mxu0 %v3094_v59 }
 0x377   : > { %5629 = vmatpush3.msra.mxu1 %v3083_v62  ;;  %5592 = vmatprep.subr.mxu0 %v3093_v63 }
 0x378   : > { %5630 = vmatprep.subr.mxu1 %v3082_v61  ;;  %5593 = vmatpush3.msra.mxu0 %v3093_v63 }
 0x379   : > { %5562 = vmatmul.mubr.f32.gmra.mxu1 %v6511_v24  ;;  %5594 = vmatprep.subr.mxu0 %v3092_v3 }
 0x37a   : > { %5646 = vmatprep.mubr.f32.mxu1 %v6706_v9  ;;  %5631 = vmatpush3.msra.mxu1 %v3082_v61 }
 0x37b   : > { %5632 = vmatprep.subr.mxu1 %v3081_v4  ;;  %5595 = vmatpush3.msra.mxu0 %v3092_v3 }
 0x37c   : > { %5633 = vmatpush3.msra.mxu1 %v3081_v4  ;;  %5597 = vmatmul.mubr.f32.vlgmr.msra.gmra.mxu0 %v6203_v0 }
 0x37d   : > { %5634 = vmatprep.subr.mxu1 %v3080_v5  ;;  %5664 = vmatprep.subr.mxu0 %v3422_v7 }
 0x37e   : > { %5635 = vmatpush3.msra.mxu1 %v3080_v5  ;;  %5665 = vmatpush3.msra.mxu0 %v3422_v7  ;;  %v4444_v5 = vld [vmem:[%s7021_s6 + $0x1] ss:$0 sm:$0xff] }
 0x37f   : > { %5636 = vmatprep.subr.mxu1 %v3079_v57  ;;  %5666 = vmatprep.subr.mxu0 %v3421_v8 }
 0x380   : > { %5637 = vmatpush3.msra.mxu1 %v3079_v57  ;;  %5667 = vmatpush3.msra.mxu0 %v3421_v8 }
 0x381   : > { %5638 = vmatprep.subr.mxu1 %v3078_v10  ;;  %5668 = vmatprep.subr.mxu0 %v3420_v12 }
 0x382   : > { %5639 = vmatpush3.msra.mxu1 %v3078_v10  ;;  %5669 = vmatpush3.msra.mxu0 %v3420_v12 }
 0x383   : > { %5640 = vmatprep.subr.mxu1 %v3077_v13  ;;  %5670 = vmatprep.subr.mxu0 %v3419_v15 }
 0x384   : > { %5641 = vmatpush3.msra.mxu1 %v3077_v13  ;;  %5671 = vmatpush3.msra.mxu0 %v3419_v15 }
 0x385   : > { %5642 = vmatprep.subr.mxu1 %v3076_v16  ;;  %5672 = vmatprep.subr.mxu0 %v3418_v17 }
 0x386   : > { %5643 = vmatpush3.msra.mxu1 %v3076_v16  ;;  %5673 = vmatpush3.msra.mxu0 %v3418_v17 }
 0x387   : > { %5644 = vmatprep.subr.mxu1 %v3075_v18  ;;  %5674 = vmatprep.subr.mxu0 %v3417_v19 }
 0x388   : > { %5645 = vmatpush3.msra.mxu1 %v3075_v18  ;;  %5675 = vmatpush3.msra.mxu0 %v3417_v19 }
 0x389   : > { %5647 = vmatmul.mubr.f32.vlgmr.msra.gmra.mxu1 %v6706_v9  ;;  %5676 = vmatprep.subr.mxu0 %v3416_v20 }
 0x38a   : > { %5677 = vmatpush3.msra.mxu0 %v3416_v20  ;;  %5714 = vmatprep.subr.mxu1 %v3697_v31 }
 0x38b   : > { %5678 = vmatprep.subr.mxu0 %v3415_v21  ;;  %5715 = vmatpush3.msra.mxu1 %v3697_v31 }
 0x38c   : > { %5679 = vmatpush3.msra.mxu0 %v3415_v21  ;;  %5716 = vmatprep.subr.mxu1 %v3696_v33 }
 0x38d   : > { %5680 = vmatprep.subr.mxu0 %v3414_v22  ;;  %5717 = vmatpush3.msra.mxu1 %v3696_v33 }
 0x38e   : > { %5681 = vmatpush3.msra.mxu0 %v3414_v22  ;;  %5718 = vmatprep.subr.mxu1 %v3695_v34 }
 0x38f   : > { %5682 = vmatprep.subr.mxu0 %v3413_v23  ;;  %5719 = vmatpush3.msra.mxu1 %v3695_v34 }
 0x390   : > { %5683 = vmatpush3.msra.mxu0 %v3413_v23  ;;  %5720 = vmatprep.subr.mxu1 %v3694_v35 }
 0x391   : > { %5684 = vmatprep.subr.mxu0 %v3412_v11  ;;  %5721 = vmatpush3.msra.mxu1 %v3694_v35 }
 0x392   : > { %5685 = vmatpush3.msra.mxu0 %v3412_v11  ;;  %5722 = vmatprep.subr.mxu1 %v3693_v36 }
 0x393   : > { %5686 = vmatprep.subr.mxu0 %v3411_v25  ;;  %5723 = vmatpush3.msra.mxu1 %v3693_v36 }
 0x394   : > { %5687 = vmatpush3.msra.mxu0 %v3411_v25 }
 0x395   : > { %5688 = vmatprep.subr.mxu0 %v3410_v26 }
 0x396   : > { %5689 = vmatpush3.msra.mxu0 %v3410_v26 }
 0x397   : > { %5690 = vmatprep.subr.mxu0 %v3409_v28 }
 0x398   : > { %5691 = vmatpush3.msra.mxu0 %v3409_v28 }
 0x399   : > { %5692 = vmatprep.subr.mxu0 %v3408_v29 }
 0x39a   : > { %5693 = vmatpush3.msra.mxu0 %v3408_v29 }
 0x39b   : > { %5694 = vmatprep.subr.mxu0 %v3407_v30 }
 0x39c   : > { %5695 = vmatpush3.msra.mxu0 %v3407_v30 }
 0x411   : > { %v5451_v37 = vpop.f32.mrf.mxu1 }
 0x413   : > { %v2558_v38 = vpop.f32.mrf.mxu1 }
 0x414   : > { %v5501_v39 = vpop.f32.mrf.mxu0 }
 0x415   : > { %v5454_v41 = vpop.f32.mrf.mxu1  ;;  %v2737_v3 = vadd.f32 %v5501_v39, %v5451_v37 }
 0x416   : > { %v2731_v42 = vpop.f32.mrf.mxu0 }
 0x417   : > { %v2568_v43 = vpop.f32.mrf.mxu1  ;;  %v2732_v7 = vadd.f32 %v2731_v42, %v2558_v38 }
 0x418   : > { %v5504_v45 = vpop.f32.mrf.mxu0 }
 0x419   : > { %v5457_v46 = vpop.f32.mrf.mxu1  ;;  %v2747_v10 = vadd.f32 %v5504_v45, %v5454_v41 }
 0x41a   : > { %v2741_v47 = vpop.f32.mrf.mxu0 }
 0x41b   : > { %v2578_v48 = vpop.f32.mrf.mxu1  ;;  %v2742_v16 = vadd.f32 %v2741_v47, %v2568_v43 }
 0x41c   : > { %v5507_v49 = vpop.f32.mrf.mxu0 }
 0x41d   : > { %v5460_v50 = vpop.f32.mrf.mxu1  ;;  %v2757_v20 = vadd.f32 %v5507_v49, %v5457_v46 }
 0x41e   : > { %v2751_v51 = vpop.f32.mrf.mxu0 }
 0x41f   : > { %v2588_v52 = vpop.f32.mrf.mxu1  ;;  %v2752_v25 = vadd.f32 %v2751_v51, %v2578_v48 }
 0x420   : > { %v5510_v53 = vpop.f32.mrf.mxu0 }
 0x421   : > { %v5463_v55 = vpop.f32.mrf.mxu1  ;;  %v2767_v34 = vadd.f32 %v5510_v53, %v5460_v50 }
 0x422   : > { %v2761_v56 = vpop.f32.mrf.mxu0 }
 0x423   : > { %v2598_v58 = vpop.f32.mrf.mxu1  ;;  %v2762_v38 = vadd.f32 %v2761_v56, %v2588_v52 }
 0x424   : > { %v5513_v59 = vpop.f32.mrf.mxu0 }
 0x425   : > { %v5548_v62 = vpop.f32.mrf.mxu1 }
 0x426   : > { %v2771_v63 = vpop.f32.mrf.mxu0 }
 0x427   : > { %v2899_v61 = vpop.f32.mrf.mxu1 }
 0x429   : > { %v5551_v4 = vpop.f32.mrf.mxu1 }
 0x42a   : > { %v2961_v57 = vadd.f32 %v5551_v4, %v2737_v3 }
 0x42b   : > { %v2909_v8 = vpop.f32.mrf.mxu1 }
 0x42c   : > { %v2981_v12 = vadd.f32 %v4444_v5, %v2961_v57  ;;  %v2960_v13 = vadd.f32 %v2909_v8, %v2732_v7 }
 0x42d   : > { %v5554_v15 = vpop.f32.mrf.mxu1 }
 0x42e   : > { %v6791_v17 = vadd.f32 %v2981_v12, %v6622_v54  ;;  %v2980_v18 = vadd.f32 %v4444_v5, %v2960_v13  ;;  %v2963_v19 = vadd.f32 %v5554_v15, %v2747_v10 }
 0x42f   : > { %v2919_v21 = vpop.f32.mrf.mxu1 }
 0x430   : > { %v6794_v22 = vadd.f32 %v2980_v18, %v6626_v60  ;;  %v2983_v23 = vadd.f32 %v4444_v5, %v2963_v19  ;;  %v2962_v11 = vadd.f32 %v2919_v21, %v2742_v16  ;;  %vm3029_vm8 = vcmp.ge.f32.partialorder %v6791_v17, 0.0 }
 0x431   : > { %v5557_v26 = vpop.f32.mrf.mxu1  ;;  %v3041_v28 = vmul.f32 0.1, %v6791_v17 }
 0x432   : > { %v6799_v29 = vadd.f32 %v2983_v23, %v6632_v6  ;;  %v2982_v54 = vadd.f32 %v4444_v5, %v2962_v11  ;;  %v2965_v30 = vadd.f32 %v5557_v26, %v2757_v20  ;;  %vm3028_vm10 = vcmp.ge.f32.partialorder %v6794_v22, 0.0 }
 0x433   : > { %v2929_v31 = vpop.f32.mrf.mxu1  ;;  %v3040_v33 = vmul.f32 0.1, %v6794_v22  ;;  %v6804_v60 = vsel %vm3029_vm8, %v6791_v17, %v3041_v28 }
 0x434   : > { %v6807_v35 = vadd.f32 %v2982_v54, %v6641_v14  ;;  %v2985_v36 = vadd.f32 %v4444_v5, %v2965_v30  ;;  %v2964_v37 = vadd.f32 %v2929_v31, %v2752_v25  ;;  %vm3031_vm11 = vcmp.ge.f32.partialorder %v6799_v29, 0.0 }
 0x435   : > { %v5560_v39 = vpop.f32.mrf.mxu1  ;;  %v6810_v6 = vsel %vm3028_vm10, %v6794_v22, %v3040_v33  ;;  %v3043_v41 = vmul.f32 0.1, %v6799_v29  ;;  %v3251_v14 = vrot.slane %v6804_v60, 3  ;;  %v3428_v26 = vrot.slane %v6804_v60, 5 }
 0x436   : > { %v2984_v42 = vadd.f32 %v4444_v5, %v2964_v37  ;;  %v2967_v43 = vadd.f32 %v5560_v39, %v2767_v34  ;;  %5599 = vmatprep.mubr.f32.mxu0 %v6810_v6  ;;  %v3249_v45 = vrot.slane %v6810_v6, 3  ;;  %v6818_v46 = vadd.f32 %v2985_v36, %v6654_v27 }
 0x437   : > { %5600 = vmatmul.mubr.f32.gmra.mxu0 %v6804_v60  ;;  %v2939_v47 = vpop.f32.mrf.mxu1  ;;  %vm3030_vm12 = vcmp.ge.f32.partialorder %v6807_v35, 0.0  ;;  %v3042_v48 = vmul.f32 0.1, %v6807_v35  ;;  %v6824_v49 = vsel %vm3031_vm11, %v6799_v29, %v3043_v41  ;;  %v3426_v11 = vrot.slane %v6810_v6, 5 }
 0x438   : > { %v6827_v50 = vadd.f32 %v2984_v42, %v6663_v32  ;;  %v2987_v51 = vadd.f32 %v4444_v5, %v2967_v43  ;;  %v2966_v52 = vadd.f32 %v2939_v47, %v2762_v38  ;;  %v3250_v53 = vsel %vm2205_vm13, %v6706_v9, %v3249_v45  ;;  %v3691_v47 = vld [vmem:[#allocation11 + $0x3c8] sm:$0xff] }
 0x439   : > { %5649 = vmatprep.mubr.f32.mxu1 %v3250_v53  ;;  %v6832_v27 = vsel %vm3030_vm12, %v6807_v35, %v3042_v48  ;;  %v3252_v55 = vsel %vm2205_vm13, %v3249_v45, %v3251_v14  ;;  %v5563_v56 = vpop.f32.mrf.mxu1  ;;  %v3255_v62 = vrot.slane %v6824_v49, 3  ;;  %vm3033_vm15 = vcmp.ge.f32.partialorder %v6818_v46, 0.0  ;;  %v3680_v48 = vld [vmem:[#allocation11 + $0x378] sm:$0xff] }
 0x43a   : > { %v6836_v58 = vadd.f32 %v2987_v51, %v6673_v40  ;;  %v2986_v59 = vadd.f32 %v4444_v5, %v2966_v52  ;;  %5602 = vmatprep.mubr.f32.mxu0 %v6832_v27  ;;  %v3253_v32 = vrot.slane %v6832_v27, 3  ;;  %5650 = vmatmul.mubr.f32.gmra.mxu1 %v3252_v55  ;;  %vm3032_vm14 = vcmp.ge.f32.partialorder %v6827_v50, 0.0  ;;  %v3690_v51 = vld [vmem:[#allocation11 + $0x3c0] sm:$0xff]  ;;  %v3679_v52 = vld [vmem:[#allocation11 + $0x370] sm:$0xff] }
 0x43b   : > { %5603 = vmatmul.mubr.f32.gmra.mxu0 %v6824_v49  ;;  %v3044_v63 = vmul.f32 0.1, %v6827_v50  ;;  %v3045_v61 = vmul.f32 0.1, %v6818_v46  ;;  %v2949_v40 = vpop.f32.mrf.mxu1  ;;  %v3430_v28 = vrot.slane %v6832_v27, 5  ;;  %v3427_v54 = vsel %vm2025_vm5, %v6611_v2, %v3426_v11  ;;  %5764 = vmatprep.subr.mxu0 %v3680_v48  ;;  %v3678_v27 = vld [vmem:[#allocation11 + $0x368] sm:$0xff] }
 0x43c   : > { %v6847_v3 = vadd.f32 %v2986_v59, %v6685_v44  ;;  %v3254_v4 = vsel %vm2205_vm13, %v3251_v14, %v3253_v32  ;;  %v3256_v5 = vsel %vm2205_vm13, %v3253_v32, %v3255_v62  ;;  %vm3035_vm0 = vcmp.ge.f32.partialorder %v6836_v58, 0.0  ;;  %v5598_v43 = vpop.f32.mrf.mxu0  ;;  %v3692_v14 = vld [vmem:[#allocation11 + $0x3d0] sm:$0xff]  ;;  %v3677_v56 = vld [vmem:[#allocation11 + $0x360] sm:$0xff]  ;;  %v3687_v59 = vld [vmem:[#allocation11 + $0x3a8] sm:$0xff] }
 0x43d   : > { %5652 = vmatprep.mubr.f32.mxu1 %v3254_v4  ;;  %v3056_v7 = vsel %vm3032_vm14, %v6827_v50, %v3044_v63  ;;  %v3057_v57 = vsel %vm3033_vm15, %v6818_v46, %v3045_v61  ;;  %v3047_v8 = vmul.f32 0.1, %v6836_v58  ;;  %v3429_v30 = vsel %vm2025_vm5, %v3426_v11, %v3428_v26  ;;  %5724 = vmatprep.subr.mxu1 %v3692_v14  ;;  %v3688_v55 = vld [vmem:[#allocation11 + $0x3b0] sm:$0xff]  ;;  %v3676_v32 = vld [vmem:[#allocation11 + $0x358] sm:$0xff]  ;;  %v3674_v40 = vld [vmem:[#allocation11 + $0x348] sm:$0xff] }
 0x43e   : > { %5605 = vmatprep.mubr.f32.mxu0 %v3056_v7  ;;  %v3257_v10 = vrot.slane %v3056_v7, 3  ;;  %5653 = vmatmul.mubr.f32.gmra.mxu1 %v3256_v5  ;;  %v3259_v12 = vrot.slane %v3057_v57, 3  ;;  %vm3034_vm1 = vcmp.ge.f32.partialorder %v6847_v3, 0.0  ;;  %v3046_v44 = vmul.f32 0.1, %v6847_v3  ;;  %v3174_v45 = vpop.f32.mrf.mxu0  ;;  %v3675_v63 = vld [vmem:[#allocation11 + $0x350] sm:$0xff] }
 0x43f   : > { %5606 = vmatmul.mubr.f32.gmra.mxu0 %v3057_v57  ;;  %v3059_v13 = vsel %vm3035_vm0, %v6836_v58, %v3047_v8  ;;  %v3432_v31 = vrot.slane %v6824_v49, 5  ;;  %v3434_v33 = vrot.slane %v3056_v7, 5  ;;  %v3431_v34 = vsel %vm2025_vm5, %v3428_v26, %v3430_v28  ;;  %5725 = vmatpush3.msra.mxu1 %v3692_v14  ;;  %v3685_v61 = vld [vmem:[#allocation11 + $0x398] sm:$0xff]  ;;  %v3684_v4 = vld [vmem:[#allocation11 + $0x390] sm:$0xff]  ;;  %v3673_v5 = vld [vmem:[#allocation11 + $0x340] sm:$0xff] }
 0x440   : > { %v3258_v15 = vsel %vm2205_vm13, %v3255_v62, %v3257_v10  ;;  %v3260_v16 = vsel %vm2205_vm13, %v3257_v10, %v3259_v12  ;;  %v3058_v18 = vsel %vm3034_vm1, %v6847_v3, %v3046_v44  ;;  %v3263_v20 = vrot.slane %v3059_v13, 3  ;;  %5726 = vmatprep.subr.mxu1 %v3691_v47  ;;  %v3686_v62 = vld [vmem:[#allocation11 + $0x3a0] sm:$0xff]  ;;  %v3683_v7 = vld [vmem:[#allocation11 + $0x388] sm:$0xff]  ;;  %v3671_v10 = vld [vmem:[#allocation11 + $0x330] sm:$0xff] }
 0x441   : > { %5655 = vmatprep.mubr.f32.mxu1 %v3258_v15  ;;  %5608 = vmatprep.mubr.f32.mxu0 %v3058_v18  ;;  %v3261_v19 = vrot.slane %v3058_v18, 3  ;;  %v3433_v60 = vsel %vm2025_vm5, %v3430_v28, %v3432_v31  ;;  %v3436_v36 = vrot.slane %v3057_v57, 5  ;;  %v3438_v37 = vrot.slane %v3058_v18, 5  ;;  %v3672_v57 = vld [vmem:[#allocation11 + $0x338] sm:$0xff]  ;;  %v3682_v8 = vld [vmem:[#allocation11 + $0x380] sm:$0xff]  ;;  %v4011_v15 = vld [vmem:[#allocation11 + $0x470] sm:$0xff] }
 0x442   : > { %5656 = vmatmul.mubr.f32.gmra.mxu1 %v3260_v16  ;;  %v3266_v25 = vsel %vm2205_vm13, %v3263_v20, %v6706_v9  ;;  %v3435_v38 = vsel %vm2025_vm5, %v3432_v31, %v3434_v33  ;;  %v3440_v39 = vrot.slane %v3059_v13, 5  ;;  %v4012_v44 = vld [vmem:[#allocation11 + $0x478] sm:$0xff]  ;;  %v4010_v18 = vld [vmem:[#allocation11 + $0x468] sm:$0xff]  ;;  %v3665_v11 = vld [vmem:[#allocation11 + $0x300] sm:$0xff] }
 0x443   : > { %5609 = vmatmul.mubr.f32.gmra.mxu0 %v3059_v13  ;;  %v3262_v21 = vsel %vm2205_vm13, %v3259_v12, %v3261_v19  ;;  %v3264_v23 = vsel %vm2205_vm13, %v3261_v19, %v3263_v20  ;;  %v3439_v6 = vsel %vm2025_vm5, %v3436_v36, %v3438_v37  ;;  %5727 = vmatpush3.msra.mxu1 %v3691_v47  ;;  %v3670_v12 = vld [vmem:[#allocation11 + $0x328] sm:$0xff]  ;;  %v3669_v13 = vld [vmem:[#allocation11 + $0x320] sm:$0xff]  ;;  %v3668_v16 = vld [vmem:[#allocation11 + $0x318] sm:$0xff] }
 0x444   : > { %5611 = vmatprep.mubr.f32.mxu0 %v6203_v0  ;;  %5658 = vmatprep.mubr.f32.mxu1 %v3262_v21  ;;  %v3441_v41 = vsel %vm2025_vm5, %v3438_v37, %v3440_v39  ;;  %v3443_v42 = vsel %vm2025_vm5, %v3440_v39, %v6611_v2  ;;  %v3667_v19 = vld [vmem:[#allocation11 + $0x310] sm:$0xff]  ;;  %v4009_v20 = vld [vmem:[#allocation11 + $0x460] sm:$0xff]  ;;  %v3666_v21 = vld [vmem:[#allocation11 + $0x308] sm:$0xff] }
 0x445   : > { %5728 = vmatprep.subr.mxu1 %v3690_v51  ;;  %v4006_v26 = vld [vmem:[#allocation11 + $0x448] sm:$0xff]  ;;  %v4005_v28 = vld [vmem:[#allocation11 + $0x440] sm:$0xff] }
 0x446   : > { %5659 = vmatmul.mubr.f32.gmra.mxu1 %v3264_v23  ;;  %v4008_v23 = vld [vmem:[#allocation11 + $0x458] sm:$0xff]  ;;  %v4002_v31 = vld [vmem:[#allocation11 + $0x428] sm:$0xff]  ;;  %v3997_v37 = vld [vmem:[#allocation11 + $0x400] sm:$0xff] }
 0x447   : > { %5612 = vmatmul.mubr.f32.gmra.mxu0 %v6203_v0  ;;  %5661 = vmatprep.mubr.f32.mxu1 %v3266_v25  ;;  %v4007_v25 = vld [vmem:[#allocation11 + $0x450] sm:$0xff] }
 0x448   : > { %5696 = vmatprep.mubr.f32.mxu0 %v6611_v2  ;;  %5729 = vmatpush3.msra.mxu1 %v3690_v51 }
 0x449   : > { %v5648_v49 = vpop.f32.mrf.mxu1 }
 0x44a   : > { %5662 = vmatmul.mubr.f32.gmra.mxu1 %v6706_v9  ;;  %v3437_v9 = vsel %vm2025_vm5, %v3434_v33, %v3436_v36  ;;  %v4001_v33 = vld [vmem:[#allocation11 + $0x420] sm:$0xff]  ;;  %v3998_v36 = vld [vmem:[#allocation11 + $0x408] sm:$0xff] }
 0x44b   : > { %5697 = vmatmul.mubr.f32.vlgmr.msra.gmra.mxu0 %v3427_v54  ;;  %5746 = vmatprep.mubr.f32.mxu1 %v6203_v0  ;;  %v3347_v53 = vpop.f32.mrf.mxu1  ;;  %v4004_v54 = vld [vmem:[#allocation11 + $0x438] sm:$0xff] }
 0x44c   : > { %5699 = vmatprep.mubr.f32.mxu0 %v3429_v30  ;;  %5765 = vmatpush3.msra.mxu0 %v3680_v48  ;;  %v4003_v30 = vld [vmem:[#allocation11 + $0x430] sm:$0xff] }
 0x44d   : > { %5766 = vmatprep.subr.mxu0 %v3679_v52 }
 0x44e   : > { %5767 = vmatpush3.msra.mxu0 %v3679_v52 }
 0x44f   : > { %5700 = vmatmul.mubr.f32.gmra.mxu0 %v3431_v34  ;;  %5768 = vmatprep.subr.mxu0 %v3678_v27  ;;  %v4000_v34 = vld [vmem:[#allocation11 + $0x418] sm:$0xff] }
 0x450   : > { %5702 = vmatprep.mubr.f32.mxu0 %v3433_v60  ;;  %5769 = vmatpush3.msra.mxu0 %v3678_v27  ;;  %v3999_v60 = vld [vmem:[#allocation11 + $0x410] sm:$0xff] }
 0x451   : > { %5770 = vmatprep.subr.mxu0 %v3677_v56 }
 0x452   : > { %5771 = vmatpush3.msra.mxu0 %v3677_v56 }
 0x453   : > { %5703 = vmatmul.mubr.f32.gmra.mxu0 %v3435_v38  ;;  %5772 = vmatprep.subr.mxu0 %v3676_v32 }
 0x454   : > { %5705 = vmatprep.mubr.f32.mxu0 %v3437_v9  ;;  %5773 = vmatpush3.msra.mxu0 %v3676_v32 }
 0x455   : > { %5774 = vmatprep.subr.mxu0 %v3675_v63 }
 0x456   : > { %5775 = vmatpush3.msra.mxu0 %v3675_v63 }
 0x457   : > { %5706 = vmatmul.mubr.f32.gmra.mxu0 %v3439_v6  ;;  %5776 = vmatprep.subr.mxu0 %v3674_v40 }
 0x458   : > { %5708 = vmatprep.mubr.f32.mxu0 %v3441_v41  ;;  %5777 = vmatpush3.msra.mxu0 %v3674_v40  ;;  %v4446_v40 = vld [vmem:[%s7019_s4 + $0x2] ss:$0 sm:$0xff] }
 0x459   : > { %5778 = vmatprep.subr.mxu0 %v3673_v5 }
 0x45a   : > { %5779 = vmatpush3.msra.mxu0 %v3673_v5 }
 0x45b   : > { %5709 = vmatmul.mubr.f32.gmra.mxu0 %v3443_v42  ;;  %5780 = vmatprep.subr.mxu0 %v3672_v57 }
 0x45c   : > { %5711 = vmatprep.mubr.f32.mxu0 %v6611_v2  ;;  %5781 = vmatpush3.msra.mxu0 %v3672_v57 }
 0x45d   : > { %5782 = vmatprep.subr.mxu0 %v3671_v10 }
 0x45e   : > { %5783 = vmatpush3.msra.mxu0 %v3671_v10 }
 0x45f   : > { %5712 = vmatmul.mubr.f32.gmra.mxu0 %v6611_v2  ;;  %v3689_v2 = vld [vmem:[#allocation11 + $0x3b8] sm:$0xff]  ;;  %5784 = vmatprep.subr.mxu0 %v3670_v12 }
 0x460   : > { %5796 = vmatprep.mubr.f32.mxu0 %v6451_v1  ;;  %5730 = vmatprep.subr.mxu1 %v3689_v2 }
 0x461   : > { %5731 = vmatpush3.msra.mxu1 %v3689_v2  ;;  %5785 = vmatpush3.msra.mxu0 %v3670_v12 }
 0x462   : > { %5732 = vmatprep.subr.mxu1 %v3688_v55  ;;  %5786 = vmatprep.subr.mxu0 %v3669_v13 }
 0x463   : > { %5733 = vmatpush3.msra.mxu1 %v3688_v55  ;;  %5787 = vmatpush3.msra.mxu0 %v3669_v13 }
 0x464   : > { %5734 = vmatprep.subr.mxu1 %v3687_v59  ;;  %5788 = vmatprep.subr.mxu0 %v3668_v16 }
 0x465   : > { %5735 = vmatpush3.msra.mxu1 %v3687_v59  ;;  %5789 = vmatpush3.msra.mxu0 %v3668_v16 }
 0x466   : > { %5736 = vmatprep.subr.mxu1 %v3686_v62  ;;  %5790 = vmatprep.subr.mxu0 %v3667_v19 }
 0x467   : > { %5737 = vmatpush3.msra.mxu1 %v3686_v62  ;;  %5791 = vmatpush3.msra.mxu0 %v3667_v19 }
 0x468   : > { %5738 = vmatprep.subr.mxu1 %v3685_v61  ;;  %5792 = vmatprep.subr.mxu0 %v3666_v21 }
 0x469   : > { %5739 = vmatpush3.msra.mxu1 %v3685_v61  ;;  %5793 = vmatpush3.msra.mxu0 %v3666_v21 }
 0x46a   : > { %5740 = vmatprep.subr.mxu1 %v3684_v4  ;;  %5794 = vmatprep.subr.mxu0 %v3665_v11 }
 0x46b   : > { %5741 = vmatpush3.msra.mxu1 %v3684_v4  ;;  %5795 = vmatpush3.msra.mxu0 %v3665_v11 }
 0x46c   : > { %5742 = vmatprep.subr.mxu1 %v3683_v7  ;;  %5797 = vmatmul.mubr.f32.vlgmr.msra.gmra.mxu0 %v6451_v1 }
 0x46d   : > { %5743 = vmatpush3.msra.mxu1 %v3683_v7 }
 0x46e   : > { %5744 = vmatprep.subr.mxu1 %v3682_v8 }
 0x46f   : > { %5745 = vmatpush3.msra.mxu1 %v3682_v8 }
 0x470   : > { %5747 = vmatmul.mubr.f32.vlgmr.msra.gmra.mxu1 %v6203_v0  ;;  %5814 = vmatprep.subr.mxu1 %v4012_v44 }
 0x471   : > { %5815 = vmatpush3.msra.mxu1 %v4012_v44 }
 0x472   : > { %5816 = vmatprep.subr.mxu1 %v4011_v15 }
 0x473   : > { %5817 = vmatpush3.msra.mxu1 %v4011_v15 }
 0x474   : > { %5818 = vmatprep.subr.mxu1 %v4010_v18 }
 0x475   : > { %5819 = vmatpush3.msra.mxu1 %v4010_v18 }
 0x476   : > { %5820 = vmatprep.subr.mxu1 %v4009_v20 }
 0x477   : > { %5821 = vmatpush3.msra.mxu1 %v4009_v20 }
 0x478   : > { %5822 = vmatprep.subr.mxu1 %v4008_v23 }
 0x479   : > { %5823 = vmatpush3.msra.mxu1 %v4008_v23 }
 0x47a   : > { %5824 = vmatprep.subr.mxu1 %v4007_v25 }
 0x47b   : > { %5825 = vmatpush3.msra.mxu1 %v4007_v25 }
 0x47c   : > { %5826 = vmatprep.subr.mxu1 %v4006_v26 }
 0x47d   : > { %5827 = vmatpush3.msra.mxu1 %v4006_v26 }
 0x47e   : > { %5828 = vmatprep.subr.mxu1 %v4005_v28 }
 0x47f   : > { %5829 = vmatpush3.msra.mxu1 %v4005_v28 }
 0x480   : > { %5830 = vmatprep.subr.mxu1 %v4004_v54 }
 0x481   : > { %5831 = vmatpush3.msra.mxu1 %v4004_v54 }
 0x482   : > { %5832 = vmatprep.subr.mxu1 %v4003_v30 }
 0x483   : > { %5833 = vmatpush3.msra.mxu1 %v4003_v30 }
 0x484   : > { %5834 = vmatprep.subr.mxu1 %v4002_v31 }
 0x485   : > { %5835 = vmatpush3.msra.mxu1 %v4002_v31 }
 0x486   : > { %5836 = vmatprep.subr.mxu1 %v4001_v33 }
 0x487   : > { %5837 = vmatpush3.msra.mxu1 %v4001_v33 }
 0x488   : > { %5838 = vmatprep.subr.mxu1 %v4000_v34 }
 0x489   : > { %5839 = vmatpush3.msra.mxu1 %v4000_v34 }
 0x48a   : > { %5840 = vmatprep.subr.mxu1 %v3999_v60 }
 0x48b   : > { %5841 = vmatpush3.msra.mxu1 %v3999_v60 }
 0x48c   : > { %5842 = vmatprep.subr.mxu1 %v3998_v36 }
 0x48d   : > { %5843 = vmatpush3.msra.mxu1 %v3998_v36 }
 0x48e   : > { %5844 = vmatprep.subr.mxu1 %v3997_v37 }
 0x48f   : > { %5845 = vmatpush3.msra.mxu1 %v3997_v37 }
 0x4f7   : > { %v5601_v38 = vpop.f32.mrf.mxu0 }
 0x4f9   : > { %v3184_v9 = vpop.f32.mrf.mxu0 }
 0x4fa   : > { %v5651_v39 = vpop.f32.mrf.mxu1 }
 0x4fb   : > { %v5604_v6 = vpop.f32.mrf.mxu0  ;;  %v3363_v63 = vadd.f32 %v5651_v39, %v5601_v38 }
 0x4fc   : > { %v3357_v41 = vpop.f32.mrf.mxu1 }
 0x4fd   : > { %v3194_v42 = vpop.f32.mrf.mxu0  ;;  %v3358_v4 = vadd.f32 %v3357_v41, %v3184_v9 }
 0x4fe   : > { %v5654_v43 = vpop.f32.mrf.mxu1 }
 0x4ff   : > { %v5607_v45 = vpop.f32.mrf.mxu0  ;;  %v3373_v57 = vadd.f32 %v5654_v43, %v5604_v6 }
 0x500   : > { %v3367_v14 = vpop.f32.mrf.mxu1 }
 0x501   : > { %v3204_v47 = vpop.f32.mrf.mxu0  ;;  %v3368_v12 = vadd.f32 %v3367_v14, %v3194_v42 }
 0x502   : > { %v5657_v48 = vpop.f32.mrf.mxu1 }
 0x503   : > { %v5610_v49 = vpop.f32.mrf.mxu0  ;;  %v3383_v18 = vadd.f32 %v5657_v48, %v5607_v45 }
 0x504   : > { %v3377_v51 = vpop.f32.mrf.mxu1 }
 0x505   : > { %v3214_v52 = vpop.f32.mrf.mxu0  ;;  %v3378_v26 = vadd.f32 %v3377_v51, %v3204_v47 }
 0x506   : > { %v5660_v53 = vpop.f32.mrf.mxu1 }
 0x507   : > { %v5613_v2 = vpop.f32.mrf.mxu0  ;;  %v3393_v31 = vadd.f32 %v5660_v53, %v5610_v49 }
 0x508   : > { %v3387_v27 = vpop.f32.mrf.mxu1 }
 0x509   : > { %v3224_v55 = vpop.f32.mrf.mxu0  ;;  %v3388_v9 = vadd.f32 %v3387_v27, %v3214_v52 }
 0x50a   : > { %v5663_v56 = vpop.f32.mrf.mxu1 }
 0x50b   : > { %v5698_v59 = vpop.f32.mrf.mxu0 }
 0x50c   : > { %v3397_v32 = vpop.f32.mrf.mxu1 }
 0x50d   : > { %v3525_v62 = vpop.f32.mrf.mxu0 }
 0x50f   : > { %v5701_v61 = vpop.f32.mrf.mxu0 }
 0x510   : > { %v3587_v5 = vadd.f32 %v5701_v61, %v3363_v63 }
 0x511   : > { %v3535_v7 = vpop.f32.mrf.mxu0 }
 0x512   : > { %v3607_v8 = vadd.f32 %v4446_v40, %v3587_v5  ;;  %v3586_v10 = vadd.f32 %v3535_v7, %v3358_v4 }
 0x513   : > { %v5704_v44 = vpop.f32.mrf.mxu0 }
 0x514   : > { %v3606_v13 = vadd.f32 %v4446_v40, %v3586_v10  ;;  %v3589_v15 = vadd.f32 %v5704_v44, %v3373_v57  ;;  %vm3619_vm5 = vcmp.ge.f32.partialorder %v3607_v8, 0.0  ;;  %v3631_v16 = vmul.f32 0.1, %v3607_v8 }
 0x515   : > { %v3545_v19 = vpop.f32.mrf.mxu0 }
 0x516   : > { %v3609_v20 = vadd.f32 %v4446_v40, %v3589_v15  ;;  %v3588_v21 = vadd.f32 %v3545_v19, %v3368_v12  ;;  %vm3618_vm13 = vcmp.ge.f32.partialorder %v3606_v13, 0.0  ;;  %v3630_v23 = vmul.f32 0.1, %v3606_v13 }
 0x517   : > { %v5707_v11 = vpop.f32.mrf.mxu0  ;;  %v6893_v25 = vsel %vm3619_vm5, %v3607_v8, %v3631_v16 }
 0x518   : > { %v3608_v28 = vadd.f32 %v4446_v40, %v3588_v21  ;;  %v3591_v54 = vadd.f32 %v5707_v11, %v3383_v18  ;;  %v6895_v30 = vsel %vm3618_vm13, %v3606_v13, %v3630_v23  ;;  %v3841_v60 = vrot.slane %v6893_v25, 7 }
 0x519   : > { %v3555_v33 = vpop.f32.mrf.mxu0  ;;  %5749 = vmatprep.mubr.f32.mxu1 %v6895_v30  ;;  %v3839_v34 = vrot.slane %v6895_v30, 7  ;;  %vm3621_vm2 = vcmp.ge.f32.partialorder %v3609_v20, 0.0  ;;  %v3633_v42 = vmul.f32 0.1, %v3609_v20  ;;  %v4016_v18 = vrot.slane %v6895_v30, 1 }
 0x51a   : > { %v3611_v36 = vadd.f32 %v4446_v40, %v3591_v54  ;;  %v3590_v37 = vadd.f32 %v3555_v33, %v3378_v26  ;;  %5750 = vmatmul.mubr.f32.gmra.mxu1 %v6893_v25  ;;  %vm3620_vm4 = vcmp.ge.f32.partialorder %v3608_v28, 0.0  ;;  %v3632_v38 = vmul.f32 0.1, %v3608_v28 }
 0x51b   : > { %v5710_v39 = vpop.f32.mrf.mxu0  ;;  %v3840_v6 = vsel %vm808_vm3, %v6451_v1, %v3839_v34  ;;  %v3842_v41 = vsel %vm808_vm3, %v3839_v34, %v3841_v60  ;;  %v3645_v49 = vsel %vm3621_vm2, %v3609_v20, %v3633_v42  ;;  %v4018_v20 = vrot.slane %v6893_v25, 1 }
 0x51c   : > { %v3610_v43 = vadd.f32 %v4446_v40, %v3590_v37  ;;  %v3593_v45 = vadd.f32 %v5710_v39, %v3393_v31  ;;  %5799 = vmatprep.mubr.f32.mxu0 %v3840_v6  ;;  %v6904_v14 = vsel %vm3620_vm4, %v3608_v28, %v3632_v38  ;;  %vm3623_vm6 = vcmp.ge.f32.partialorder %v3611_v36, 0.0 }
 0x51d   : > { %v3565_v47 = vpop.f32.mrf.mxu0  ;;  %5752 = vmatprep.mubr.f32.mxu1 %v6904_v14  ;;  %v3843_v48 = vrot.slane %v6904_v14, 7  ;;  %5800 = vmatmul.mubr.f32.gmra.mxu0 %v3842_v41  ;;  %v3635_v51 = vmul.f32 0.1, %v3611_v36  ;;  %v3845_v2 = vrot.slane %v3645_v49, 7  ;;  %v4020_v21 = vrot.slane %v6904_v14, 1 }
 0x51e   : > { %v3613_v52 = vadd.f32 %v4446_v40, %v3593_v45  ;;  %v3592_v53 = vadd.f32 %v3565_v47, %v3388_v9  ;;  %5753 = vmatmul.mubr.f32.gmra.mxu1 %v3645_v49  ;;  %vm3622_vm7 = vcmp.ge.f32.partialorder %v3610_v43, 0.0  ;;  %v3634_v55 = vmul.f32 0.1, %v3610_v43 }
 0x51f   : > { %v3844_v27 = vsel %vm808_vm3, %v3841_v60, %v3843_v48  ;;  %v3647_v56 = vsel %vm3623_vm6, %v3611_v36, %v3635_v51  ;;  %v5713_v59 = vpop.f32.mrf.mxu0  ;;  %v3846_v62 = vsel %vm808_vm3, %v3843_v48, %v3845_v2  ;;  %v4017_v23 = vsel %vm988_vm9, %v6511_v24, %v4016_v18 }
 0x520   : > { %v3612_v32 = vadd.f32 %v4446_v40, %v3592_v53  ;;  %5802 = vmatprep.mubr.f32.mxu0 %v3844_v27  ;;  %v3646_v63 = vsel %vm3622_vm7, %v3610_v43, %v3634_v55  ;;  %vm3625_vm8 = vcmp.ge.f32.partialorder %v3613_v52, 0.0  ;;  %v3637_v61 = vmul.f32 0.1, %v3613_v52 }
 0x521   : > { %5803 = vmatmul.mubr.f32.gmra.mxu0 %v3846_v62  ;;  %v3575_v4 = vpop.f32.mrf.mxu0  ;;  %5755 = vmatprep.mubr.f32.mxu1 %v3646_v63  ;;  %v3847_v5 = vrot.slane %v3646_v63, 7  ;;  %v3849_v7 = vrot.slane %v3647_v56, 7  ;;  %v4019_v11 = vsel %vm988_vm9, %v4016_v18, %v4018_v20  ;;  %v4022_v26 = vrot.slane %v3645_v49, 1 }
 0x522   : > { %vm3624_vm10 = vcmp.ge.f32.partialorder %v3612_v32, 0.0  ;;  %v3636_v57 = vmul.f32 0.1, %v3612_v32  ;;  %5756 = vmatmul.mubr.f32.gmra.mxu1 %v3647_v56  ;;  %v3649_v8 = vsel %vm3625_vm8, %v3613_v52, %v3637_v61  ;;  %v4024_v28 = vrot.slane %v3646_v63, 1 }
 0x523   : > { %v3848_v10 = vsel %vm808_vm3, %v3845_v2, %v3847_v5  ;;  %v3850_v40 = vsel %vm808_vm3, %v3847_v5, %v3849_v7  ;;  %v3853_v13 = vrot.slane %v3649_v8, 7  ;;  %v4023_v54 = vsel %vm988_vm9, %v4020_v21, %v4022_v26 }
 0x524   : > { %v3648_v12 = vsel %vm3624_vm10, %v3612_v32, %v3636_v57  ;;  %5805 = vmatprep.mubr.f32.mxu0 %v3848_v10  ;;  %v4026_v25 = vrot.slane %v3647_v56, 1  ;;  %v4025_v31 = vsel %vm988_vm9, %v4022_v26, %v4024_v28 }
 0x525   : > { %5758 = vmatprep.mubr.f32.mxu1 %v3648_v12  ;;  %v3851_v44 = vrot.slane %v3648_v12, 7  ;;  %5806 = vmatmul.mubr.f32.gmra.mxu0 %v3850_v40  ;;  %v3856_v19 = vsel %vm808_vm3, %v3853_v13, %v6451_v1  ;;  %v4028_v30 = vrot.slane %v3648_v12, 1 }
 0x526   : > { %5759 = vmatmul.mubr.f32.gmra.mxu1 %v3649_v8  ;;  %v4027_v33 = vsel %vm988_vm9, %v4024_v28, %v4026_v25 }
 0x527   : > { %v3852_v15 = vsel %vm808_vm3, %v3849_v7, %v3851_v44  ;;  %v3854_v16 = vsel %vm808_vm3, %v3851_v44, %v3853_v13  ;;  %5761 = vmatprep.mubr.f32.mxu1 %v6203_v0  ;;  %v4029_v34 = vsel %vm988_vm9, %v4026_v25, %v4028_v30  ;;  %v4448_v7 = vld [vmem:[%s7021_s6 + $0x2] ss:$0 sm:$0xff] }
 0x528   : > { %5808 = vmatprep.mubr.f32.mxu0 %v3852_v15 }
 0x529   : > { %5809 = vmatmul.mubr.f32.gmra.mxu0 %v3854_v16 }
 0x52a   : > { %5762 = vmatmul.mubr.f32.gmra.mxu1 %v6203_v0  ;;  %5811 = vmatprep.mubr.f32.mxu0 %v3856_v19  ;;  %v4021_v0 = vsel %vm988_vm9, %v4018_v20, %v4020_v21 }
 0x52b   : > { %5846 = vmatprep.mubr.f32.mxu1 %v6511_v24 }
 0x52c   : > { %v5798_v9 = vpop.f32.mrf.mxu0 }
 0x52d   : > { %5812 = vmatmul.mubr.f32.gmra.mxu0 %v6451_v1  ;;  %v4030_v1 = vrot.slane %v3649_v8, 1 }
 0x52e   : > { %5847 = vmatmul.mubr.f32.vlgmr.msra.gmra.mxu1 %v4017_v23  ;;  %v3937_v39 = vpop.f32.mrf.mxu0 }
 0x52f   : > { %5849 = vmatprep.mubr.f32.mxu1 %v4019_v11  ;;  %v4031_v60 = vsel %vm988_vm9, %v4028_v30, %v4030_v1  ;;  %v4033_v36 = vsel %vm988_vm9, %v4030_v1, %v6511_v24 }
 0x530   : > { %v5748_v37 = vpop.f32.mrf.mxu1 }
 0x532   : > { %5850 = vmatmul.mubr.f32.gmra.mxu1 %v4021_v0  ;;  %v3764_v38 = vpop.f32.mrf.mxu1 }
 0x533   : > { %5852 = vmatprep.mubr.f32.mxu1 %v4023_v54 }
 0x536   : > { %5853 = vmatmul.mubr.f32.gmra.mxu1 %v4025_v31 }
 0x537   : > { %5855 = vmatprep.mubr.f32.mxu1 %v4027_v33 }
 0x53a   : > { %5856 = vmatmul.mubr.f32.gmra.mxu1 %v4029_v34 }
 0x53b   : > { %5858 = vmatprep.mubr.f32.mxu1 %v4031_v60 }
 0x53e   : > { %5859 = vmatmul.mubr.f32.gmra.mxu1 %v4033_v36 }
 0x53f   : > { %5861 = vmatprep.mubr.f32.mxu1 %v6511_v24 }
 0x542   : > { %5862 = vmatmul.mubr.f32.gmra.mxu1 %v6511_v24 }
 0x5da   : > { %v5751_v6 = vpop.f32.mrf.mxu1 }
 0x5dc   : > { %v3774_v41 = vpop.f32.mrf.mxu1 }
 0x5dd   : > { %v5801_v42 = vpop.f32.mrf.mxu0 }
 0x5de   : > { %v5754_v43 = vpop.f32.mrf.mxu1  ;;  %v3953_v4 = vadd.f32 %v5801_v42, %v5751_v6 }
 0x5df   : > { %v3947_v45 = vpop.f32.mrf.mxu0 }
 0x5e0   : > { %v3784_v14 = vpop.f32.mrf.mxu1  ;;  %v3948_v57 = vadd.f32 %v3947_v45, %v3774_v41 }
 0x5e1   : > { %v5804_v47 = vpop.f32.mrf.mxu0 }
 0x5e2   : > { %v5757_v48 = vpop.f32.mrf.mxu1  ;;  %v3963_v12 = vadd.f32 %v5804_v47, %v5754_v43 }
 0x5e3   : > { %v3957_v49 = vpop.f32.mrf.mxu0 }
 0x5e4   : > { %v3794_v51 = vpop.f32.mrf.mxu1  ;;  %v3958_v15 = vadd.f32 %v3957_v49, %v3784_v14 }
 0x5e5   : > { %v5807_v52 = vpop.f32.mrf.mxu0 }
 0x5e6   : > { %v5760_v53 = vpop.f32.mrf.mxu1  ;;  %v3973_v21 = vadd.f32 %v5807_v52, %v5757_v48 }
 0x5e7   : > { %v3967_v2 = vpop.f32.mrf.mxu0 }
 0x5e8   : > { %v3804_v27 = vpop.f32.mrf.mxu1  ;;  %v3968_v0 = vadd.f32 %v3967_v2, %v3794_v51 }
 0x5e9   : > { %v5810_v55 = vpop.f32.mrf.mxu0 }
 0x5ea   : > { %v5763_v24 = vpop.f32.mrf.mxu1  ;;  %v3983_v31 = vadd.f32 %v5810_v55, %v5760_v53 }
 0x5eb   : > { %v3977_v56 = vpop.f32.mrf.mxu0 }
 0x5ec   : > { %v3814_v59 = vpop.f32.mrf.mxu1  ;;  %v3978_v60 = vadd.f32 %v3977_v56, %v3804_v27 }
 0x5ed   : > { %v5813_v32 = vpop.f32.mrf.mxu0 }
 0x5ee   : > { %v5848_v62 = vpop.f32.mrf.mxu1 }
 0x5ef   : > { %v3987_v63 = vpop.f32.mrf.mxu0 }
 0x5f0   : > { %v4115_v61 = vpop.f32.mrf.mxu1 }
 0x5f2   : > { %v5851_v5 = vpop.f32.mrf.mxu1 }
 0x5f3   : > { %v4177_v8 = vadd.f32 %v5851_v5, %v3953_v4 }
 0x5f4   : > { %v4125_v10 = vpop.f32.mrf.mxu1 }
 0x5f5   : > { %v4197_v40 = vadd.f32 %v4448_v7, %v4177_v8  ;;  %v4176_v44 = vadd.f32 %v4125_v10, %v3948_v57 }
 0x5f6   : > { %v5854_v13 = vpop.f32.mrf.mxu1 }
 0x5f7   : > { %v4209_v16 = vadd.f32 %v4197_v40, %v6791_v17  ;;  %v4196_v18 = vadd.f32 %v4448_v7, %v4176_v44  ;;  %v4179_v19 = vadd.f32 %v5854_v13, %v3963_v12 }
 0x5f8   : > { %v4135_v20 = vpop.f32.mrf.mxu1 }
 0x5f9   : > { %4239 = vst [vmem:[%s6943_s26 + $0x8] sm:$0xff] %v4209_v16  ;;  %v4208_v23 = vadd.f32 %v4196_v18, %v6794_v22  ;;  %v4199_v11 = vadd.f32 %v4448_v7, %v4179_v19  ;;  %v4178_v26 = vadd.f32 %v4135_v20, %v3958_v15 }
 0x5fa   : > { %v5857_v28 = vpop.f32.mrf.mxu1 }
 0x5fb   : > { %4238 = vst [vmem:[%s6943_s26] sm:$0xff] %v4208_v23  ;;  %v4211_v17 = vadd.f32 %v4199_v11, %v6799_v29  ;;  %v4198_v54 = vadd.f32 %v4448_v7, %v4178_v26  ;;  %v4181_v25 = vadd.f32 %v5857_v28, %v3973_v21 }
 0x5fc   : > { %v4145_v30 = vpop.f32.mrf.mxu1 }
 0x5fd   : > { %4241 = vst [vmem:[%s6943_s26 + $0x18] sm:$0xff] %v4211_v17  ;;  %v4210_v33 = vadd.f32 %v4198_v54, %v6807_v35  ;;  %v4201_v1 = vadd.f32 %v4448_v7, %v4181_v25  ;;  %v4180_v22 = vadd.f32 %v4145_v30, %v3968_v0 }
 0x5fe   : > { %v5860_v34 = vpop.f32.mrf.mxu1 }
 0x5ff   : > { %4240 = vst [vmem:[%s6943_s26 + $0x10] sm:$0xff] %v4210_v33  ;;  %v4213_v36 = vadd.f32 %v4201_v1, %v6818_v46  ;;  %v4200_v37 = vadd.f32 %v4448_v7, %v4180_v22  ;;  %v4183_v29 = vadd.f32 %v5860_v34, %v3983_v31 }
 0x600   : > { %v4155_v38 = vpop.f32.mrf.mxu1 }
 0x601   : > { %4243 = vst [vmem:[%s6943_s26 + $0x28] sm:$0xff] %v4213_v36  ;;  %v4212_v9 = vadd.f32 %v4200_v37, %v6827_v50  ;;  %v4203_v39 = vadd.f32 %v4448_v7, %v4183_v29  ;;  %v4182_v6 = vadd.f32 %v4155_v38, %v3978_v60 }
 0x602   : > { %v5863_v35 = vpop.f32.mrf.mxu1 }
 0x603   : > { %4242 = vst [vmem:[%s6943_s26 + $0x20] sm:$0xff] %v4212_v9  ;;  %v4215_v41 = vadd.f32 %v4203_v39, %v6836_v58  ;;  %v4202_v42 = vadd.f32 %v4448_v7, %v4182_v6 }
 0x604   : > { %v4165_v46 = vpop.f32.mrf.mxu1 }
 0x605   : > { %4245 = vst [vmem:[%s6943_s26 + $0x38] sm:$0xff] %v4215_v41  ;;  %v4214_v50 = vadd.f32 %v4202_v42, %v6847_v3 }
 0x607   : > { %4244 = vst [vmem:[%s6943_s26 + $0x30] sm:$0xff] %v4214_v50 }
 0x608   : > { %6119 = shalt.err (!%p6116_p6)
}
 0x609   : > { %s6120_s8 = scalar_lea.hbm %s6962_s3, 1024  ;;  %s6124_s7 = scalar_lea.hbm %s7064_s9, 2048 }
 0x60a   : > { %p6121_p8 = scmp.ne.s32.totalorder %s6962_s3, %s6120_s8  ;;  %p6125_p1 = scmp.lt.s32.totalorder %s6962_s3, %s7064_s9 }
 0x60b   : > { %p6126_p12 = scmp.lt.s32.totalorder %s6124_s7, %s6120_s8 }
 0x60c   : > { %p6122_p5 = pnand %p6121_p8, %p7065_p3 }
 0x60d   : > { %p6127_p0 = por %p6126_p12, %p6125_p1 }
 0x60e   : > { %p6123_p4 = pneg %p6122_p5 }
 0x610   : > { %p6128_p13 = pnand %p6127_p0, %p6123_p4 }
 0x612   : > { %6131 = shalt.err (!%p6128_p13)
}
 0x613   : > { %s6205_s17 = smov 128   ;;  %s6206_s22 = smov 8  }
 0x614   : > { %5878 = dma.vmem_to_hbm [thread:$0]  (%p7065_p3), %s6964_s15, 1024, %s6962_s3, %s4247_s27, %s6205_s17, %s6205_s17, %s6206_s22  }
 0x615 PF: > { %s7066_s23 = sld [smem:[#allocation17_spill]]  ;;  %p7069_p2 = scmp.ge.s32.totalorder %s6194_s29, 2 }
 0x616   : > { %s7067_s26 = sld [smem:[#allocation20_spill]] }
 0x61b   : > { %s4277_s18 = sand.u32 1, %s7066_s23  }
 0x61c   : > { %p7068_p10 = scmp.ne.s32.totalorder %s7067_s26, 0  ;;  %s4278_s20 = scalar_lea.sflag [#allocation5], %s4277_s18 }
 0x61e   : > { %p5898_p7 = pnand %p7069_p2, %p7068_p10 }
 0x620   : > { %p5899_p11 = pneg %p5898_p7 }
 0x622   : > { %6169 = dma.done.wait (%p5899_p11), %s4278_s20, 1024  }
 0x623   : > { %6171 = vsyncadd (%p5899_p11), %s4278_s20, 4294966272  ;;  %s27_s29 = sadd.s32 1, %s6194_s29   ;;  %s7070_s12 = sld [smem:[#allocation18_spill]] }
 0x624   : > { %p24_p9 = scmp.ge.s32.totalorder %s27_s29, 4   ;;  %s7071_s26 = sld [smem:[#allocation22_spill]] }
 0x625   : > { %s7072_s27 = sld [smem:[#allocation19_spill]]  ;;  %s7074_s24 = smov %s6178_s25 }
 0x626   : > { %s7073_s28 = sld [smem:[#allocation21_spill]]  ;;  %26 = sbr.rel (!%p24_p9) target bundleno = 13 (0xd), region = 145 }
 0x629   : > { %s7075_s25 = smov %s7070_s12 }
 0x62b   :  { %4283 = vsyncpa [#allocation4], 1 }
 0x62c   :  { %4285 = vsyncpa [#allocation4 + $0x1], 1 }
 0x62d   :  { %4286 = vsyncpa [#allocation7], 1 }
 0x62e   :  { %4288 = vsyncpa [#allocation7 + $0x1], 1 }
 0x62f   :  { %4289 = vsyncpa [#allocation10], 1 }
 0x630   :  { %4290 = vsyncpa [#allocation5], 1 }
 0x631   :  { %4292 = vsyncpa [#allocation5 + $0x1], 1 }

</bundles_post_ra>
